<compile_context>
chip_gen: v6e
topology: v6e:2x2x1
jax: 0.10.0
libtpu: 0.0.40
codegen_flags: <defaults>
</compile_context>

<pallas_src>
import numpy as np
import jax
import jax.numpy as jnp
from jax.experimental import pallas as pl
from jax.experimental.pallas import tpu as pltpu
from functools import partial


def _round_up(x, m):
    return (x + m - 1) // m * m


def _cdiv(a, b):
    return (a + b - 1) // b


def _pick_tn(n_padded, tn_request):
    """Largest multiple of 128 that divides n_padded and is <= tn_request."""
    tn_request = max(128, min(tn_request, n_padded))
    best = 128
    t = 128
    while t <= tn_request:
        if n_padded % t == 0:
            best = t
        t += 128
    return best


# ----------------------------------------------------------------------------
# Fused linear + sine kernels (omega_0 already folded into W / b)
# ----------------------------------------------------------------------------

def _sine_linear_kernel(x_ref, w_ref, b_ref, o_ref, *, precision):
    # x_ref: (tm, K)   w_ref: (K, tn)   b_ref: (1, tn)   o_ref: (tm, tn)
    acc = jnp.dot(x_ref[...], w_ref[...],
                  preferred_element_type=jnp.float32, precision=precision)
    o_ref[...] = jnp.sin(acc + b_ref[...]).astype(o_ref.dtype)


def _sine_linear_kernel_nobias(x_ref, w_ref, o_ref, *, precision):
    acc = jnp.dot(x_ref[...], w_ref[...],
                  preferred_element_type=jnp.float32, precision=precision)
    o_ref[...] = jnp.sin(acc).astype(o_ref.dtype)


# ----------------------------------------------------------------------------
# Wrapper
# ----------------------------------------------------------------------------

def sine_layer(x, weight, bias=None, omega_0=30.0, *, tm=1024, tn=512,
               precision=None, operand_dtype=None, pad_output=False):
    """SIREN SineLayer forward.

    x:      (..., in_features)
    weight: (out_features, in_features)   -- PyTorch nn.Linear layout
    bias:   (out_features,) or None
    returns (..., out_features) = sin(omega_0 * (x @ weight.T + bias))

    precision:     pass jax.lax.Precision.HIGHEST for strict f32 matmul parity
                   with PyTorch (default = TPU default matmul precision).
    operand_dtype: e.g. jnp.bfloat16 to use the native MXU path on v5e
                   (accumulation stays f32; output keeps x.dtype).
    pad_output:    return the lane-padded (…, round_up(N,128)) activation for
                   chaining SineLayers without a per-layer slice.
    """
    in_features = weight.shape[1]
    out_features = weight.shape[0]
    lead_shape = x.shape[:-1]
    out_dtype = x.dtype

    x2 = x.reshape(-1, in_features)
    M, K = x2.shape
    N = out_features

    # Fold omega_0 into the (small) parameters once; the large activation x is
    # untouched (this is NOT the "pre-scale the big input" anti-pattern).
    omega_0 = float(omega_0)
    w = jnp.transpose(weight).astype(jnp.float32) * omega_0     # (K, N)
    has_bias = bias is not None
    if has_bias:
        b = (bias.astype(jnp.float32) * omega_0).reshape(1, N)  # (1, N)

    # --- N tiling: pad only to the lane requirement (multiple of 128), then
    # pick tn as a divisor of the padded N.
    Np = _round_up(N, 128)
    tn = _pick_tn(Np, tn)
    if Np != N:
        w = jnp.pad(w, ((0, 0), (0, Np - N)))
        if has_bias:
            b = jnp.pad(b, ((0, 0), (0, Np - N)))

    # --- M tiling: no host-side pad; Pallas masks the partial last block.
    tm = max(8, min(tm, _round_up(M, 8)))
    if M > 16 and _cdiv(M, tm) < 2:
        # Keep >= 2 row tiles so both v7x TensorCores get work on the
        # "parallel" row axis.
        tm = _round_up(_cdiv(M, 2), 8)
    grid = (_cdiv(M, tm), Np // tn)

    # Optional operand cast (v5e: bf16 operands keep the MXU single-pass).
    if operand_dtype is not None:
        x2 = x2.astype(operand_dtype)
        w = w.astype(operand_dtype)

    x_item = jnp.dtype(x2.dtype).itemsize
    w_item = jnp.dtype(w.dtype).itemsize
    o_item = jnp.dtype(out_dtype).itemsize

    cost = pl.CostEstimate(
        flops=2 * M * K * Np,
        transcendentals=M * Np,
        bytes_accessed=x_item * M * K + w_item * K * Np
        + (4 * Np if has_bias else 0) + o_item * M * Np,
    )

    # Double-buffered VMEM footprint; only raise the scoped limit if needed.
    vmem_needed = 2 * (tm * K * x_item + K * tn * w_item
                       + (tn * 4 if has_bias else 0) + tm * tn * o_item)
    cp_kwargs = dict(dimension_semantics=("parallel", "parallel"))
    if vmem_needed > (16 << 20):
        cp_kwargs["vmem_limit_bytes"] = min(int(vmem_needed * 3 // 2) + (2 << 20),
                                            60 << 20)
    compiler_params = pltpu.CompilerParams(**cp_kwargs)

    x_spec = pl.BlockSpec((tm, K), lambda i, j: (i, 0))     # row tile, full K
    w_spec = pl.BlockSpec((K, tn), lambda i, j: (0, j))     # full K, col tile
    o_spec = pl.BlockSpec((tm, tn), lambda i, j: (i, j))

    if has_bias:
        kernel = partial(_sine_linear_kernel, precision=precision)
        in_specs = [x_spec, w_spec, pl.BlockSpec((1, tn), lambda i, j: (0, j))]
        operands = (x2, w, b)
    else:
        kernel = partial(_sine_linear_kernel_nobias, precision=precision)
        in_specs = [x_spec, w_spec]
        operands = (x2, w)

    out = pl.pallas_call(
        kernel,
        out_shape=jax.ShapeDtypeStruct((M, Np), out_dtype),
        grid_spec=pltpu.PrefetchScalarGridSpec(
            num_scalar_prefetch=0,
            grid=grid,
            in_specs=in_specs,
            out_specs=o_spec,
        ),
        compiler_params=compiler_params,
        cost_estimate=cost,
    )(*operands)

    if pad_output:
        return out.reshape(*lead_shape, Np)
    if Np != N:
        out = out[:, :N]
    return out.reshape(*lead_shape, N)


# ----------------------------------------------------------------------------
# Parameter init matching the PyTorch SineLayer
# ----------------------------------------------------------------------------

def make_sine_layer_params(key, in_features, out_features, bias=True,
                           is_first=False, omega_0=30.0):
    kw, kb = jax.random.split(key)
    if is_first:
        bound_w = 1.0 / in_features
    else:
        bound_w = float(np.sqrt(6.0 / in_features)) / omega_0
    weight = jax.random.uniform(kw, (out_features, in_features), jnp.float32,
                                minval=-bound_w, maxval=bound_w)
    if bias:
        # nn.Linear default bias init: U(-1/sqrt(in), 1/sqrt(in))
        bound_b = 1.0 / float(np.sqrt(in_features))
        b = jax.random.uniform(kb, (out_features,), jnp.float32,
                               minval=-bound_b, maxval=bound_b)
    else:
        b = None
    return {"weight": weight, "bias": b, "omega_0": float(omega_0)}


def sine_layer_forward(params, x, **kwargs):
    return sine_layer(x, params["weight"], params["bias"],
                      omega_0=params["omega_0"], **kwargs)


# ----------------------------------------------------------------------------
# Demo / self-check
# ----------------------------------------------------------------------------

if __name__ == "__main__":
    key = jax.random.PRNGKey(0)
    k_param, k_x = jax.random.split(key)

    # SIREN first layer: coordinates (batch=2, 256 points, 2 coords)
    in_features, out_features, omega_0 = 2, 32, 30.0
    params = make_sine_layer_params(k_param, in_features, out_features,
                                    bias=True, is_first=True, omega_0=omega_0)

    x = jax.random.uniform(k_x, (2, 256, in_features), jnp.float32,
                           minval=-1.0, maxval=1.0)

    # With-bias path
    out = sine_layer_forward(params, x)
    out = jax.block_until_ready(out)
    ref = jnp.sin(omega_0 * (x @ params["weight"].T + params["bias"]))
    assert out.shape == (2, 256, out_features), out.shape
    assert bool(jnp.isfinite(out).all())
    np.testing.assert_allclose(np.asarray(out), np.asarray(ref),
                               rtol=1e-5, atol=1e-4)

    # No-bias path (separate kernel variant)
    out_nb = sine_layer(x, params["weight"], None, omega_0=omega_0)
    out_nb = jax.block_until_ready(out_nb)
    ref_nb = jnp.sin(omega_0 * (x @ params["weight"].T))
    np.testing.assert_allclose(np.asarray(out_nb), np.asarray(ref_nb),
                               rtol=1e-5, atol=1e-4)

    print("KERNEL_OK")
</pallas_src>

<mosaic_0001>
module attributes {stable_mosaic.version = 11 : i64} {
  func.func @_sine_linear_kernel(%arg0: i32, %arg1: i32, %arg2: memref<256x2xf32, #tpu.memory_space<vmem>>, %arg3: memref<2x128xf32, #tpu.memory_space<vmem>>, %arg4: memref<1x128xf32, #tpu.memory_space<vmem>>, %arg5: memref<256x128xf32, #tpu.memory_space<vmem>>) attributes {dimension_semantics = [#tpu.dimension_semantics<parallel>, #tpu.dimension_semantics<parallel>], iteration_bounds = array<i64: 2, 1>, scalar_prefetch = 0 : i64, scratch_operands = 0 : i64, tpu.core_type = #tpu.core_type<tc>, window_params = [{transform_indices = @transform_0, window_bounds = array<i64: 256, 2>}, {transform_indices = @transform_1, window_bounds = array<i64: 2, 128>}, {transform_indices = @transform_2, window_bounds = array<i64: 1, 128>}, {transform_indices = @transform_3, window_bounds = array<i64: 256, 128>}]} {
    %c0 = arith.constant 0 : index
    %c0_0 = arith.constant 0 : index
    %0 = vector.load %arg2[%c0, %c0_0] : memref<256x2xf32, #tpu.memory_space<vmem>>, vector<256x2xf32>
    %c0_1 = arith.constant 0 : index
    %c0_2 = arith.constant 0 : index
    %1 = vector.load %arg3[%c0_1, %c0_2] : memref<2x128xf32, #tpu.memory_space<vmem>>, vector<2x128xf32>
    %cst = arith.constant dense<0.000000e+00> : vector<256x128xf32>
    %2 = tpu.matmul %0, %1, %cst {dimension_numbers = #tpu.dot_dimension_numbers<[1], [0], [0], [1], [0, 0, 1, 1], [], []>} : vector<256x2xf32>, vector<2x128xf32>, vector<256x128xf32> -> vector<256x128xf32>
    %c0_3 = arith.constant 0 : index
    %c0_4 = arith.constant 0 : index
    %3 = vector.load %arg4[%c0_3, %c0_4] : memref<1x128xf32, #tpu.memory_space<vmem>>, vector<1x128xf32>
    %4 = vector.broadcast %3 : vector<1x128xf32> to vector<256x128xf32>
    %5 = arith.addf %2, %4 : vector<256x128xf32>
    %6 = math.sin %5 : vector<256x128xf32>
    %c0_5 = arith.constant 0 : index
    %c0_6 = arith.constant 0 : index
    %7 = vector.load %arg5[%c0_5, %c0_6] : memref<256x128xf32, #tpu.memory_space<vmem>>, vector<256x128xf32>
    tpu.vector_store %arg5[%c0_5, %c0_6], %6 {strides = array<i32>} : memref<256x128xf32, #tpu.memory_space<vmem>>, vector<256x128xf32>,
    return
  }
  func.func @transform_0(%arg0: i32, %arg1: i32) -> (i32, i32) {
    %c0_i32 = arith.constant 0 : i32
    %c0_i32_0 = arith.constant 0 : i32
    return %arg0, %c0_i32 : i32, i32
  }
  func.func @transform_1(%arg0: i32, %arg1: i32) -> (i32, i32) {
    %c0_i32 = arith.constant 0 : i32
    %c0_i32_0 = arith.constant 0 : i32
    return %c0_i32, %arg1 : i32, i32
  }
  func.func @transform_2(%arg0: i32, %arg1: i32) -> (i32, i32) {
    %c0_i32 = arith.constant 0 : i32
    %c0_i32_0 = arith.constant 0 : i32
    return %c0_i32, %arg1 : i32, i32
  }
  func.func @transform_3(%arg0: i32, %arg1: i32) -> (i32, i32) {
    %c0_i32 = arith.constant 0 : i32
    return %arg0, %arg1 : i32, i32
  }
}

</mosaic_0001>

<bundles_post_ra>
// kernel: tpu_custom_call.1
= control target key start
LH: loop header
LB: loop body
LE: loop exit
PB: predicated region body
PF: predicated region fallthrough
CT: control target
= control target key end

     0   :  { %8 = vsyncpa [#allocation3], 0  ;;  %s7326_s0 = inlined_call_operand.vmem [shape: f32[512,2], index: 0, kind: input, shape index: {}]   ;;  %s7327_s1 = inlined_call_operand.vmem [shape: f32[2,128], index: 1, kind: input, shape index: {}]   ;;  %s7328_s2 = inlined_call_operand.vmem [shape: f32[1,128], index: 2, kind: input, shape index: {}]   ;;  %s7329_s3 = inlined_call_operand.hbm [shape: f32[512,128], index: 3, kind: output, shape index: {}]  }
   0x1   :  { %10 = vsyncpa [#allocation3 + $0x1], 0  ;;  %s4751_s12 = smov 0   ;;  %s4753_s13 = smov 0  }
   0x2   :  { %s4755_s14 = smov 0   ;;  %s4757_s15 = smov 0  }
   0x3   :  { %s4759_s16 = smov 0   ;;  %s4761_s17 = smov 0  }
   0x4 LB: > { %s4057_s18 = sadd.s32 4294967295, %s4720_s17   ;;  %s4058_s19 = sadd.s32 4294967294, %s4720_s17   ;;  %s4720_s17 = sphi %s4761_s17, %s16_s17   ;;  %s4716_s16 = sphi %s4759_s16, %s7396_s16   ;;  %s4712_s15 = sphi %s4757_s15, %s7395_s15   ;;  %s4708_s14 = sphi %s4755_s14, %s7394_s14   ;;  %s4704_s13 = sphi %s4753_s13, %s7393_s13   ;;  %s4700_s12 = sphi %s4751_s12, %s7392_s12  }
   0x5   : > { %s28_s20 = sadd.s32 1, %s4716_s16  ;;  %s115_s21 = sadd.s32 1, %s4708_s14 }
   0x6   : > { %p30_p0 = scmp.ge.s32.totalorder %s28_s20, 2  ;;  %p125_p1 = scmp.ne.s32.totalorder %s4708_s14, %s4704_s13 }
   0x7   : > { %p126_p2 = scmp.eq.s32.totalorder %s4057_s18, 1  ;;  %p131_p3 = scmp.ne.s32.totalorder %s4704_s13, %s4700_s12 }
   0x8   : > { %s7398_s20 = smov (%p30_p0, %s28_s20), 0  ;;  %p132_p5 = scmp.eq.s32.totalorder %s4058_s19, 1 }
   0x9   : > { %p4791_p4 = por %p126_p2, %p125_p1  ;;  %s110_s23 = ssub.s32 %s4716_s16, %s7398_s20 }
   0xa   : > { %p4063_p6 = scmp.ge.s32.totalorder %s4720_s17, 1  ;;  %p113_p7 = scmp.eq.s32.totalorder %s110_s23, 0 }
   0xb   : > { %p4798_p8 = por %p132_p5, %p131_p3  ;;  %p172_p9 = scmp.lt.s32.totalorder %s4720_s17, 3 }
   0xc   : > { %s4804_s25 = scalar_select %p113_p7, %s4708_s14, %s115_s21  }
   0xd   : > { %p173_p10 = pnand %p4063_p6, %p172_p9 }
   0xe   : > { %s4065_s28 = sshll.u32 (!%p173_p10), %s4712_s15, 5  ;;  %s200_s8 = sand.u32 (!%p173_p10), 1, %s4704_s13  }
   0xf   : > { %176 = sbr.rel (%p173_p10) target bundleno = 1064 (0x428), region = 32  ;;  %p204_p11 = scmp.lt.s32.totalorder (!%p173_p10), %s4065_s28, 63 }
  0x10   : > { %s4064_s9 = sshll.u32 (!%p173_p10), %s200_s8, 8  ;;  %s4234_s4 = sshll.u32 (!%p173_p10), %s4712_s15, 12 }
  0x11   : > { %s5188_s10 = scalar_lea.vmem (!%p173_p10), [#allocation2], %s4064_s9  ;;  %s7273_s9 = scalar_lea.hbm (!%p173_p10), %s7329_s3, %s4234_s4 }
  0x12   : > { %s7281_s15 = scalar_lea.sflag (!%p173_p10), [#allocation3], %s200_s8  ;;  %s4728_s18 = smov (!%p173_p10), [#allocation2]  }
  0x13   : > { %s4648_s19 = sshll.u32 (!%p173_p10), %s4728_s18, 4  ;;  %s4649_s19 = int_to_ptr.vmem [resolvable:$false] %s4648_s19 }
  0x14   : > { %v249_v0 = vld [vmem:[%s7327_s1] sm:$0x3]  ;;  %vm354_vm0 = vcmask 1041408   ;;  %s7400_s28 = smov (!%p204_p11, %s4065_s28), 63  ;;  %vm257_vm1 = vcmask 15360   ;;  %s4650_s21 = scalar_lea.vmem %s4649_s19, 8192 }
  0x15   : > { %4268 = vmatprep.subr.msk.mxu0 %vm354_vm0, %v249_v0  ;;  %4318 = vmatprep.subr.msk.mxu1 %vm354_vm0, %v249_v0  ;;  %s4066_s29 = sshll.u32 %s7400_s28, 3  ;;  %v4882_v33 = vld [vmem:[%s7328_s2] ss:$0 sm:$0xff] }
  0x16   : > { %4269 = vmatpush3.msk.msra.mxu0 %vm354_vm0, %v249_v0  ;;  %4319 = vmatpush3.msk.msra.mxu1 %vm354_vm0, %v249_v0  ;;  %s4813_s5 = scalar_lea.vmem %s7326_s0, %s4066_s29 }
  0x17   : > { %v217_v1 = vld [vmem:[%s4813_s5] sm:$0xff]  ;;  %v218_v3 = vld [vmem:[%s4813_s5 + $0x8] sm:$0xff]  ;;  %v219_v5 = vld [vmem:[%s4813_s5 + $0x10] sm:$0xff] }
  0x18   : > { %v233_v2 = vld [vmem:[%s4813_s5 + $0x80] sm:$0xff]  ;;  %4270 = vmatprep.mubr.msk.f32.mxu0 %vm257_vm1, %v217_v1  ;;  %v234_v4 = vld [vmem:[%s4813_s5 + $0x88] sm:$0xff]  ;;  %v235_v6 = vld [vmem:[%s4813_s5 + $0x90] sm:$0xff] }
  0x19   : > { %4294 = vmatprep.mubr.msk.f32.mxu1 %vm257_vm1, %v233_v2  ;;  %4271 = vmatmul.mubr.msk.f32.vlgmr.msra.gmra.mxu0 %vm257_vm1, %v218_v3  ;;  %v220_v7 = vld [vmem:[%s4813_s5 + $0x18] sm:$0xff]  ;;  %v221_v9 = vld [vmem:[%s4813_s5 + $0x20] sm:$0xff]  ;;  %v222_v11 = vld [vmem:[%s4813_s5 + $0x28] sm:$0xff] }
  0x1a   : > { %4295 = vmatmul.mubr.msk.f32.vlgmr.msra.gmra.mxu1 %vm257_vm1, %v234_v4  ;;  %4273 = vmatprep.mubr.msk.f32.mxu0 %vm257_vm1, %v219_v5  ;;  %v236_v8 = vld [vmem:[%s4813_s5 + $0x98] sm:$0xff]  ;;  %v237_v10 = vld [vmem:[%s4813_s5 + $0xa0] sm:$0xff]  ;;  %v238_v12 = vld [vmem:[%s4813_s5 + $0xa8] sm:$0xff]  ;;  %v4722_v5 = vmov 683565275  }
  0x1b   : > { %4297 = vmatprep.mubr.msk.f32.mxu1 %vm257_vm1, %v235_v6  ;;  %v223_v13 = vld [vmem:[%s4813_s5 + $0x30] sm:$0xff]  ;;  %v224_v15 = vld [vmem:[%s4813_s5 + $0x38] sm:$0xff]  ;;  %v225_v17 = vld [vmem:[%s4813_s5 + $0x40] sm:$0xff] }
  0x1c   : > { %v239_v14 = vld [vmem:[%s4813_s5 + $0xb0] sm:$0xff]  ;;  %v240_v16 = vld [vmem:[%s4813_s5 + $0xb8] sm:$0xff]  ;;  %v241_v18 = vld [vmem:[%s4813_s5 + $0xc0] sm:$0xff] }
  0x1d   : > { %4274 = vmatmul.mubr.msk.f32.gmra.mxu0 %vm257_vm1, %v220_v7  ;;  %v226_v19 = vld [vmem:[%s4813_s5 + $0x48] sm:$0xff]  ;;  %v227_v21 = vld [vmem:[%s4813_s5 + $0x50] sm:$0xff]  ;;  %v228_v23 = vld [vmem:[%s4813_s5 + $0x58] sm:$0xff] }
  0x1e   : > { %4298 = vmatmul.mubr.msk.f32.gmra.mxu1 %vm257_vm1, %v236_v8  ;;  %4276 = vmatprep.mubr.msk.f32.mxu0 %vm257_vm1, %v221_v9  ;;  %v242_v20 = vld [vmem:[%s4813_s5 + $0xc8] sm:$0xff]  ;;  %v243_v22 = vld [vmem:[%s4813_s5 + $0xd0] sm:$0xff]  ;;  %v244_v24 = vld [vmem:[%s4813_s5 + $0xd8] sm:$0xff]  ;;  %v4723_v9 = vmov 2475754826  }
  0x1f   : > { %4300 = vmatprep.mubr.msk.f32.mxu1 %vm257_vm1, %v237_v10  ;;  %v229_v25 = vld [vmem:[%s4813_s5 + $0x60] sm:$0xff]  ;;  %v230_v27 = vld [vmem:[%s4813_s5 + $0x68] sm:$0xff]  ;;  %v231_v29 = vld [vmem:[%s4813_s5 + $0x70] sm:$0xff] }
  0x20   : > { %v245_v26 = vld [vmem:[%s4813_s5 + $0xe0] sm:$0xff]  ;;  %v246_v28 = vld [vmem:[%s4813_s5 + $0xe8] sm:$0xff]  ;;  %v247_v30 = vld [vmem:[%s4813_s5 + $0xf0] sm:$0xff] }
  0x21   : > { %4277 = vmatmul.mubr.msk.f32.gmra.mxu0 %vm257_vm1, %v222_v11  ;;  %v232_v31 = vld [vmem:[%s4813_s5 + $0x78] sm:$0xff]  ;;  %v4724_v11 = vmov 2131351028  }
  0x22   : > { %4301 = vmatmul.mubr.msk.f32.gmra.mxu1 %vm257_vm1, %v238_v12  ;;  %4279 = vmatprep.mubr.msk.f32.mxu0 %vm257_vm1, %v223_v13  ;;  %v248_v32 = vld [vmem:[%s4813_s5 + $0xf8] sm:$0xff]  ;;  %v4725_v13 = vmov 2102212464   ;;  %s3958_s5 = sshll.u32 %s5188_s10, 4  ;;  %s7275_s5 = int_to_ptr.vmem [resolvable:$true] %s3958_s5 }
  0x23   : > { %4303 = vmatprep.mubr.msk.f32.mxu1 %vm257_vm1, %v239_v14  ;;  %s4644_s11 = scalar_lea.vmem %s7275_s5, 4096  ;;  %p4651_p1 = scmp.lt.s32.totalorder %s7275_s5, %s4649_s19 }
  0x24   : > { %p4645_p12 = scmp.ne.s32.totalorder %s7275_s5, %s4644_s11  ;;  %p4652_p2 = scmp.lt.s32.totalorder %s4650_s21, %s4644_s11 }
  0x25   : > { %4280 = vmatmul.mubr.msk.f32.gmra.mxu0 %vm257_vm1, %v224_v15  ;;  %v4726_v15 = vmov 920167782  }
  0x26   : > { %4304 = vmatmul.mubr.msk.f32.gmra.mxu1 %vm257_vm1, %v240_v16  ;;  %4282 = vmatprep.mubr.msk.f32.mxu0 %vm257_vm1, %v225_v17  ;;  %p4646_p13 = pnand %p4645_p12, %p4791_p4  ;;  %p4653_p3 = por %p4652_p2, %p4651_p1 }
  0x27   : > { %4306 = vmatprep.mubr.msk.f32.mxu1 %vm257_vm1, %v241_v18 }
  0x28   : > { %p4647_p0 = pneg %p4646_p13 }
  0x29   : > { %4283 = vmatmul.mubr.msk.f32.gmra.mxu0 %vm257_vm1, %v226_v19 }
  0x2a   : > { %4307 = vmatmul.mubr.msk.f32.gmra.mxu1 %vm257_vm1, %v242_v20  ;;  %4285 = vmatprep.mubr.msk.f32.mxu0 %vm257_vm1, %v227_v21  ;;  %p4654_p5 = pnand %p4653_p3, %p4647_p0 }
  0x2b   : > { %4309 = vmatprep.mubr.msk.f32.mxu1 %vm257_vm1, %v243_v22  ;;  %v4727_v22 = vmov 1326507024  }
  0x2d   : > { %4286 = vmatmul.mubr.msk.f32.gmra.mxu0 %vm257_vm1, %v228_v23 }
  0x2e   : > { %4310 = vmatmul.mubr.msk.f32.gmra.mxu1 %vm257_vm1, %v244_v24  ;;  %4288 = vmatprep.mubr.msk.f32.mxu0 %vm257_vm1, %v229_v25 }
  0x2f   : > { %4312 = vmatprep.mubr.msk.f32.mxu1 %vm257_vm1, %v245_v26 }
  0x31   : > { %4289 = vmatmul.mubr.msk.f32.gmra.mxu0 %vm257_vm1, %v230_v27 }
  0x32   : > { %4313 = vmatmul.mubr.msk.f32.gmra.mxu1 %vm257_vm1, %v246_v28  ;;  %4291 = vmatprep.mubr.msk.f32.mxu0 %vm257_vm1, %v231_v29 }
  0x33   : > { %4315 = vmatprep.mubr.msk.f32.mxu1 %vm257_vm1, %v247_v30 }
  0x35   : > { %4292 = vmatmul.mubr.msk.f32.gmra.mxu0 %vm257_vm1, %v232_v31 }
  0x36   : > { %4316 = vmatmul.mubr.msk.f32.gmra.mxu1 %vm257_vm1, %v248_v32 }
  0xd9   : > { %v4272_v34 = vpop.f32.mrf.mxu0 }
  0xda   : > { %v4296_v35 = vpop.f32.mrf.mxu1  ;;  %v4885_v36 = vadd.f32 %v4272_v34, %v4882_v33 }
  0xdb   : > { %v4888_v37 = vadd.f32 %v4296_v35, %v4882_v33  ;;  %v424_v38 = vpop.f32.mrf.mxu0 }
  0xdc   : > { %v687_v39 = vand.u32 2147483647, %v4885_v36  ;;  %v690_v40 = vand.u32 2139095040, %v4885_v36  ;;  %v4897_v45 = vadd.f32 %v4882_v33, %v424_v38  ;;  %v504_v57 = vpop.f32.mrf.mxu1  ;;  %vm689_vm15 = vcmp.lt.s32.totalorder %v4885_v36, 0 }
  0xdd   : > { %v2351_v41 = vand.u32 2147483647, %v4888_v37  ;;  %v2354_v42 = vand.u32 2139095040, %v4888_v37  ;;  %v4904_v63 = vadd.f32 %v4882_v33, %v504_v57 }
  0xde   : > { %v691_v43 = vshrl.u32 %v690_v40, 23  ;;  %v694_v44 = vand.u32 8388607, %v687_v39  ;;  %v586_v50 = vand.u32 2139095040, %v4897_v45  ;;  %v583_v55 = vand.u32 2147483647, %v4897_v45 }
  0xdf   : > { %v2355_v46 = vshrl.u32 %v2354_v42, 23  ;;  %v2358_v47 = vand.u32 8388607, %v2351_v41  ;;  %vm5009_vm0 = vcmp.le.f32.partialorder %v687_v39, 0.7853982 }
  0xe0   : > { %v4105_v48 = vadd.s32 4294967169, %v691_v43  ;;  %v695_v51 = vor.u32 8388608, %v694_v44  ;;  %v587_v56 = vshrl.u32 %v586_v50, 23  ;;  %v4914_v3 = vand.u32 8388607, %v583_v55 }
  0xe1   : > { %v4169_v49 = vadd.s32 4294967169, %v2355_v46  ;;  %v2359_v53 = vor.u32 8388608, %v2358_v47 }
  0xe2   : > { %v697_v52 = vadd.s32 1, %v4105_v48  ;;  %v4101_v59 = vadd.s32 4294967169, %v587_v56  ;;  %v4906_v0 = vshll.u32 %v695_v51, 8 }
  0xe3   : > { %v2361_v54 = vadd.s32 1, %v4169_v49  ;;  %v4910_v2 = vshll.u32 %v2359_v53, 8 }
  0xe4   : > { %vm698_vm2 = vcmp.gt.s32.totalorder %v697_v52, 0  ;;  %v4917_v8 = vadd.s32 1, %v4101_v59 }
  0xe5   : > { %v699_v58 = vsel %vm698_vm2, %v697_v52, 0  ;;  %vm2362_vm3 = vcmp.gt.s32.totalorder %v2361_v54, 0 }
  0xe6   : > { %v700_v60 = vshrl.u32 %v699_v58, 5  ;;  %v701_v61 = vand.u32 31, %v699_v58  ;;  %v2363_v62 = vsel %vm2362_vm3, %v2361_v54, 0  ;;  %vm594_vm13 = vcmp.gt.s32.totalorder %v4917_v8, 0 }
  0xe7   : > { %v4908_v1 = vshrl.u32 %v2363_v62, 5  ;;  %v2365_v7 = vand.u32 31, %v2363_v62 }
  0xe8   : > { %v702_v4 = vsub.s32 32, %v701_v61  ;;  %v704_v6 = vshll.u32 %v4722_v5, %v701_v61  ;;  %v707_v10 = vshll.u32 %v4723_v9, %v701_v61  ;;  %v710_v12 = vshll.u32 %v4724_v11, %v701_v61 }
  0xe9   : > { %v713_v14 = vshll.u32 %v4725_v13, %v701_v61  ;;  %v716_v16 = vshll.u32 %v4726_v15, %v701_v61  ;;  %vm719_vm4 = vcmp.lt.s32.totalorder %v700_v60, 1  ;;  %vm720_vm5 = vcmp.lt.s32.totalorder %v700_v60, 2 }
  0xea   : > { %v705_v17 = vshrl.u32 %v4723_v9, %v702_v4  ;;  %v708_v18 = vshrl.u32 %v4724_v11, %v702_v4  ;;  %v711_v19 = vshrl.u32 %v4725_v13, %v702_v4  ;;  %v703_v20 = vshrl.u32 %v4722_v5, %v702_v4 }
  0xeb   : > { %v714_v21 = vshrl.u32 %v4726_v15, %v702_v4  ;;  %v717_v23 = vshrl.u32 %v4727_v22, %v702_v4  ;;  %v2366_v27 = vsub.s32 32, %v2365_v7  ;;  %vm721_vm6 = vcmp.lt.s32.totalorder %v700_v60, 3 }
  0xec   : > { %v706_v24 = vor.u32 %v705_v17, %v704_v6  ;;  %v709_v25 = vor.u32 %v708_v18, %v707_v10  ;;  %v712_v26 = vor.u32 %v711_v19, %v710_v12  ;;  %vm722_vm7 = vcmp.lt.s32.totalorder %v700_v60, 4 }
  0xed   : > { %v715_v28 = vor.u32 %v714_v21, %v713_v14  ;;  %v718_v29 = vor.u32 %v717_v23, %v716_v16  ;;  %v2368_v42 = vshll.u32 %v4722_v5, %v2365_v7  ;;  %v2369_v46 = vshrl.u32 %v4723_v9, %v2366_v27 }
  0xee   : > { %v723_v30 = vsel %vm719_vm4, %v703_v20, %v706_v24  ;;  %v724_v31 = vsel %vm722_vm7, %v712_v26, 2102212464  ;;  %v727_v32 = vsel %vm719_vm4, %v706_v24, %v709_v25  ;;  %v731_v34 = vsel %vm719_vm4, %v709_v25, %v712_v26 }
  0xef   : > { %v725_v35 = vsel %vm721_vm6, %v709_v25, %v724_v31  ;;  %v728_v38 = vsel %vm722_vm7, %v715_v28, 920167782  ;;  %v732_v40 = vsel %vm722_vm7, %v718_v29, 1326507024  ;;  %v2371_v47 = vshll.u32 %v4723_v9, %v2365_v7 }
  0xf0   : > { %v729_v43 = vsel %vm721_vm6, %v712_v26, %v728_v38  ;;  %v733_v44 = vsel %vm721_vm6, %v715_v28, %v732_v40  ;;  %v726_v48 = vsel %vm720_vm5, %v723_v30, %v725_v35  ;;  %v2372_v51 = vshrl.u32 %v4724_v11, %v2366_v27 }
  0xf1   : > { %v730_v49 = vsel %vm720_vm5, %v727_v32, %v729_v43  ;;  %v734_v50 = vsel %vm720_vm5, %v731_v34, %v733_v44  ;;  %v2370_v57 = vor.u32 %v2369_v46, %v2368_v42  ;;  %v2374_v59 = vshll.u32 %v4724_v11, %v2365_v7 }
  0xf2   : > { %v4940_v52 = vmul.u32.u64.low %v4906_v0, %v734_v50  ;;  %v4941_v53 = vmul.u32.u64.high %v4906_v0, %v734_v50, %v4940_v52  ;;  %v4944_v54 = vmul.u32.u64.low %v4906_v0, %v730_v49  ;;  %v4945_v56 = vmul.u32.u64.high %v4906_v0, %v730_v49, %v4944_v54 }
  0xf3   : > { %v2373_v58 = vor.u32 %v2372_v51, %v2371_v47  ;;  %v2375_v61 = vshrl.u32 %v4725_v13, %v2366_v27  ;;  %v2367_v62 = vshrl.u32 %v4722_v5, %v2366_v27  ;;  %v2377_v60 = vshll.u32 %v4725_v13, %v2365_v7 }
  0xf4   : > { %v2378_v4 = vshrl.u32 %v4726_v15, %v2366_v27  ;;  %v2381_v6 = vshrl.u32 %v4727_v22, %v2366_v27  ;;  %v742_v10 = vmul.u32 %v4906_v0, %v726_v48  ;;  %v2380_v14 = vshll.u32 %v4726_v15, %v2365_v7 }
  0xf5   : > { %v2376_v12 = vor.u32 %v2375_v61, %v2374_v59  ;;  %vm2383_vm8 = vcmp.lt.s32.totalorder %v4908_v1, 1  ;;  %vm744_vm9 = vc.u32 %v4941_v53, %v4944_v54  ;;  %v745_v16 = vadd.s32 1, %v4945_v56 }
  0xf6   : > { %v2379_v17 = vor.u32 %v2378_v4, %v2377_v60  ;;  %vm2384_vm10 = vcmp.lt.s32.totalorder %v4908_v1, 2  ;;  %v2382_v18 = vor.u32 %v2381_v6, %v2380_v14  ;;  %vm2385_vm11 = vcmp.lt.s32.totalorder %v4908_v1, 3 }
  0xf7   : > { %vm2386_vm12 = vcmp.lt.s32.totalorder %v4908_v1, 4  ;;  %v2391_v19 = vsel %vm2383_vm8, %v2370_v57, %v2373_v58  ;;  %v746_v0 = vsel %vm744_vm9, %v745_v16, %v4945_v56  ;;  %v2395_v7 = vsel %vm2383_vm8, %v2373_v58, %v2376_v12 }
  0xf8   : > { %v2388_v20 = vsel %vm2386_vm12, %v2376_v12, 2102212464  ;;  %v2392_v21 = vsel %vm2386_vm12, %v2379_v17, 920167782  ;;  %v747_v23 = vadd.s32 %v746_v0, %v742_v10  ;;  %v2387_v24 = vsel %vm2383_vm8, %v2367_v62, %v2370_v57 }
  0xf9   : > { %v2393_v25 = vsel %vm2385_vm11, %v2376_v12, %v2392_v21  ;;  %v2396_v26 = vsel %vm2386_vm12, %v2382_v18, 1326507024  ;;  %v2389_v27 = vsel %vm2385_vm11, %v2373_v58, %v2388_v20  ;;  %v595_v40 = vsel %vm594_vm13, %v4917_v8, 0 }
  0xfa   : > { %v2394_v28 = vsel %vm2384_vm10, %v2391_v19, %v2393_v25  ;;  %v2397_v29 = vsel %vm2385_vm11, %v2379_v17, %v2396_v26  ;;  %v748_v30 = vadd.s32 536870912, %v747_v23  ;;  %v2390_v43 = vsel %vm2384_vm10, %v2387_v24, %v2389_v27 }
  0xfb   : > { %v2398_v31 = vsel %vm2384_vm10, %v2395_v7, %v2397_v29  ;;  %v4968_v32 = vmul.u32.u64.low %v4910_v2, %v2394_v28  ;;  %v4969_v34 = vmul.u32.u64.high %v4910_v2, %v2394_v28, %v4968_v32  ;;  %v597_v44 = vand.u32 31, %v595_v40 }
  0xfc   : > { %v4973_v35 = vmul.u32.u64.low %v4910_v2, %v2398_v31  ;;  %v4974_v38 = vmul.u32.u64.high %v4910_v2, %v2398_v31, %v4973_v35  ;;  %v749_v42 = vshrl.u32 %v748_v30, 30  ;;  %v2250_v46 = vand.u32 2139095040, %v4904_v63 }
  0xfd   : > { %v2409_v48 = vadd.s32 1, %v4969_v34  ;;  %v591_v49 = vor.u32 8388608, %v4914_v3  ;;  %v2406_v50 = vmul.u32 %v4910_v2, %v2390_v43  ;;  %v598_v51 = vsub.s32 32, %v597_v44 }
  0xfe   : > { %v750_v47 = vshll.u32 %v749_v42, 30  ;;  %vm2408_vm14 = vc.u32 %v4974_v38, %v4968_v32  ;;  %v2251_v1 = vshrl.u32 %v2250_v46, 23  ;;  %v743_v57 = vadd.s32 %v4944_v54, %v4941_v53 }
  0xff   : > { %v2410_v8 = vsel %vm2408_vm14, %v2409_v48, %v4969_v34  ;;  %v4991_v59 = vshll.u32 %v591_v49, 8  ;;  %v2247_v2 = vand.u32 2147483647, %v4904_v63  ;;  %v4994_v61 = vshrl.u32 %v595_v40, 5 }
 0x100   : > { %v4985_v52 = vsub.s32 %v747_v23, %v750_v47  ;;  %v2411_v56 = vadd.s32 %v2410_v8, %v2406_v50  ;;  %v601_v62 = vshrl.u32 %v4723_v9, %v598_v51  ;;  %v604_v60 = vshrl.u32 %v4724_v11, %v598_v51 }
 0x101   : > { %v607_v6 = vshrl.u32 %v4725_v13, %v598_v51  ;;  %v610_v10 = vshrl.u32 %v4726_v15, %v598_v51  ;;  %v5001_v53 = vadd.s32 4294967169, %v2251_v1  ;;  %v773_v54 = vsub.s32 4, %v749_v42 }
 0x102   : > { %v753_v58 = vsub.s32 0, %v4985_v52  ;;  %v2412_v3 = vadd.s32 536870912, %v2411_v56  ;;  %v600_v14 = vshll.u32 %v4722_v5, %v597_v44  ;;  %v603_v16 = vshll.u32 %v4723_v9, %v597_v44 }
 0x103   : > { %v606_v19 = vshll.u32 %v4724_v11, %v597_v44  ;;  %v609_v0 = vshll.u32 %v4725_v13, %v597_v44  ;;  %v613_v20 = vshrl.u32 %v4727_v22, %v598_v51  ;;  %v5019_v24 = vand.u32 8388607, %v2247_v2 }
 0x104   : > { %v4106_v4 = vmin.u32 %v753_v58, %v4985_v52  ;;  %v5003_v12 = vshrl.u32 %v2412_v3, 30  ;;  %v602_v7 = vor.u32 %v601_v62, %v600_v14  ;;  %v605_v23 = vor.u32 %v604_v60, %v603_v16 }
 0x105   : > { %v608_v39 = vor.u32 %v607_v6, %v606_v19  ;;  %v611_v26 = vor.u32 %v610_v10, %v609_v0  ;;  %v612_v27 = vshll.u32 %v4726_v15, %v597_v44  ;;  %v774_v28 = vsel %vm689_vm15, %v773_v54, %v749_v42 }
 0x106   : > { %v755_v18 = vclz %v4106_v4  ;;  %v2414_v21 = vshll.u32 %v5003_v12, 30  ;;  %v599_v30 = vshrl.u32 %v4722_v5, %v598_v51  ;;  %vm615_vm1 = vcmp.lt.s32.totalorder %v4994_v61, 1 }
 0x107   : > { %v614_v31 = vor.u32 %v613_v20, %v612_v27  ;;  %vm616_vm3 = vcmp.lt.s32.totalorder %v4994_v61, 2  ;;  %vm617_vm4 = vcmp.lt.s32.totalorder %v4994_v61, 3  ;;  %vm2353_vm5 = vcmp.lt.s32.totalorder %v4888_v37, 0 }
 0x108   : > { %v4107_v25 = vadd.s32 4294967294, %v755_v18  ;;  %v5024_v29 = vsub.s32 %v2411_v56, %v2414_v21  ;;  %vm618_vm6 = vcmp.lt.s32.totalorder %v4994_v61, 4  ;;  %v623_v40 = vsel %vm615_vm1, %v602_v7, %v605_v23 }
 0x109   : > { %v620_v44 = vsel %vm618_vm6, %v608_v39, 2102212464  ;;  %v624_v46 = vsel %vm618_vm6, %v611_v26, 920167782  ;;  %v627_v50 = vsel %vm615_vm1, %v605_v23, %v608_v39  ;;  %v628_v56 = vsel %vm618_vm6, %v614_v31, 1326507024 }
 0x10a   : > { %vm4108_vm2 = vcmp.lt.s32.totalorder %v4107_v25, 0  ;;  %v2417_v35 = vsub.s32 0, %v5024_v29  ;;  %v625_v49 = vsel %vm617_vm4, %v608_v39, %v624_v46  ;;  %v776_v58 = vsel %vm5009_vm0, 0, %v774_v28 }
 0x10b   : > { %v758_v34 = vsel %vm4108_vm2, 0, %v4107_v25  ;;  %v626_v1 = vsel %vm616_vm3, %v623_v40, %v625_v49  ;;  %vm5047_vm7 = vcmp.le.f32.partialorder %v2351_v41, 0.7853982  ;;  %v619_v62 = vsel %vm615_vm1, %v599_v30, %v602_v7 }
 0x10c   : > { %v759_v42 = vsub.s32 32, %v758_v34  ;;  %v763_v43 = vsub.s32 4294967266, %v758_v34  ;;  %v760_v47 = vshll.u32 %v4985_v52, %v758_v34  ;;  %v4170_v48 = vmin.u32 %v2417_v35, %v5024_v29 }
 0x10d   : > { %v2437_v6 = vsub.s32 4, %v5003_v12  ;;  %v629_v10 = vsel %vm617_vm4, %v611_v26, %v628_v56  ;;  %v5061_v14 = vmul.u32.u64.low %v4991_v59, %v626_v1  ;;  %v5062_v16 = vmul.u32.u64.high %v4991_v59, %v626_v1, %v5061_v14 }
 0x10e   : > { %v761_v51 = vshrl.u32 %v743_v57, %v759_v42  ;;  %v764_v8 = vadd.s32 127, %v763_v43  ;;  %v2419_v3 = vclz %v4170_v48  ;;  %v621_v57 = vsel %vm617_vm4, %v605_v23, %v620_v44  ;;  %v4275_v42 = vpop.f32.mrf.mxu0 }
 0x10f   : > { %v630_v41 = vsel %vm616_vm3, %v627_v50, %v629_v10  ;;  %v622_v19 = vsel %vm616_vm3, %v619_v62, %v621_v57  ;;  %v780_v21 = vadd.s32 3, %v776_v58  ;;  %v2407_v7 = vadd.s32 %v4968_v32, %v4974_v38 }
 0x110   : > { %v762_v60 = vor.u32 %v761_v51, %v760_v47  ;;  %v765_v4 = vshll.u32 %v764_v8, 23  ;;  %v4171_v54 = vadd.s32 4294967294, %v2419_v3  ;;  %v2257_v23 = vadd.s32 1, %v5001_v53 }
 0x111   : > { %v5068_v0 = vmul.u32.u64.low %v4991_v59, %v630_v41  ;;  %v5069_v20 = vmul.u32.u64.high %v4991_v59, %v630_v41, %v5068_v0  ;;  %v2438_v27 = vsel %vm2353_vm5, %v2437_v6, %v5003_v12  ;;  %v638_v30 = vmul.u32 %v4991_v59, %v622_v19 }
 0x112   : > { %v766_v18 = vor.u32 4788187, %v765_v4  ;;  %vm4172_vm8 = vcmp.lt.s32.totalorder %v4171_v54, 0  ;;  %v769_v39 = vcvt.s32.f32 %v762_v60  ;;  %v641_v31 = vadd.s32 1, %v5062_v16 }
 0x113   : > { %v2422_v26 = vsel %vm4172_vm8, 0, %v4171_v54  ;;  %vm640_vm9 = vc.u32 %v5069_v20, %v5061_v14  ;;  %vm2258_vm10 = vcmp.gt.s32.totalorder %v2257_v23, 0  ;;  %v2440_v43 = vsel %vm5047_vm7, 0, %v2438_v27 }
 0x114   : > { %v767_v25 = vand.u32 2147483647, %v766_v18  ;;  %v2423_v61 = vsub.s32 32, %v2422_v26  ;;  %v2427_v28 = vsub.s32 4294967266, %v2422_v26  ;;  %v2424_v35 = vshll.u32 %v5024_v29, %v2422_v26 }
 0x115   : > { %v642_v53 = vsel %vm640_vm9, %v641_v31, %v5062_v16  ;;  %v2259_v40 = vsel %vm2258_vm10, %v2257_v23, 0  ;;  %v5088_v50 = vadd.f32 %v4275_v42, %v4882_v33  ;;  %v5093_v8 = vand.u32 3, %v780_v21 }
 0x116   : > { %v770_v34 = vmul.f32 %v769_v39, %v767_v25  ;;  %v2425_v32 = vshrl.u32 %v2407_v7, %v2423_v61  ;;  %v2428_v38 = vadd.s32 127, %v2427_v28  ;;  %v643_v59 = vadd.s32 %v642_v53, %v638_v30 }
 0x117   : > { %v2261_v44 = vand.u32 31, %v2259_v40  ;;  %v5095_v56 = vadd.s32 3, %v2440_v43  ;;  %v2255_v3 = vor.u32 8388608, %v5019_v24  ;;  %vm585_vm11 = vcmp.lt.s32.totalorder %v4897_v45, 0 }
 0x118   : > { %v771_v12 = vxor.u32 2147483648, %v770_v34  ;;  %v2426_v46 = vor.u32 %v2425_v32, %v2424_v35  ;;  %v2429_v47 = vshll.u32 %v2428_v38, 23  ;;  %v644_v48 = vadd.s32 536870912, %v643_v59 }
 0x119   : > { %v2262_v49 = vsub.s32 32, %v2261_v44  ;;  %v5101_v6 = vshrl.u32 %v2259_v40, 5  ;;  %v2264_v10 = vshll.u32 %v4722_v5, %v2261_v44  ;;  %v2267_v16 = vshll.u32 %v4723_v9, %v2261_v44 }
 0x11a   : > { %v772_v29 = vsel %vm689_vm15, %v771_v12, %v770_v34  ;;  %v2430_v1 = vor.u32 4788187, %v2429_v47  ;;  %v645_v58 = vshrl.u32 %v644_v48, 30  ;;  %v2433_v60 = vcvt.s32.f32 %v2426_v46 }
 0x11b   : > { %v775_v51 = vsel %vm5009_vm0, %v4885_v36, %v772_v29  ;;  %v2265_v62 = vshrl.u32 %v4723_v9, %v2262_v49  ;;  %v2268_v4 = vshrl.u32 %v4724_v11, %v2262_v49  ;;  %v2271_v54 = vshrl.u32 %v4725_v13, %v2262_v49 }
 0x11c   : > { %4511 = vcosq.f32 %v775_v51  ;;  %v2431_v57 = vand.u32 2147483647, %v2430_v1  ;;  %v646_v17 = vshll.u32 %v645_v58, 30  ;;  %v2273_v24 = vshll.u32 %v4725_v13, %v2261_v44 }
 0x11d   : > { %4513 = vsinq.f32 %v775_v51  ;;  %v2274_v18 = vshrl.u32 %v4726_v15, %v2262_v49  ;;  %v2266_v0 = vor.u32 %v2265_v62, %v2264_v10  ;;  %v2270_v21 = vshll.u32 %v4724_v11, %v2261_v44 }
 0x11e   : > { %v2434_v41 = vmul.f32 %v2433_v60, %v2431_v57  ;;  %v5108_v19 = vsub.s32 %v643_v59, %v646_v17  ;;  %v898_v7 = vand.u32 2139095040, %v5088_v50  ;;  %v2269_v25 = vor.u32 %v2268_v4, %v2267_v16 }
 0x11f   : > { %v2275_v39 = vor.u32 %v2274_v18, %v2273_v24  ;;  %v2277_v26 = vshrl.u32 %v4727_v22, %v2262_v49  ;;  %v639_v27 = vadd.s32 %v5061_v14, %v5069_v20  ;;  %v2272_v28 = vor.u32 %v2271_v54, %v2270_v21 }
 0x120   : > { %v2435_v23 = vxor.u32 2147483648, %v2434_v41  ;;  %v649_v61 = vsub.s32 0, %v5108_v19  ;;  %v2276_v30 = vshll.u32 %v4726_v15, %v2261_v44  ;;  %vm786_vm12 = vcmp.eq.s32.totalorder %v5093_v8, 2 }
 0x121   : > { %v669_v34 = vsub.s32 4, %v645_v58  ;;  %vm2279_vm13 = vcmp.lt.s32.totalorder %v5101_v6, 1  ;;  %v5121_v35 = vshll.u32 %v2255_v3, 8  ;;  %vm783_vm14 = vcmp.eq.s32.totalorder %v5093_v8, 0 }
 0x122   : > { %v2436_v31 = vsel %vm2353_vm5, %v2435_v23, %v2434_v41  ;;  %v4102_v20 = vmin.u32 %v649_v61, %v5108_v19  ;;  %v2278_v32 = vor.u32 %v2277_v26, %v2276_v30  ;;  %vm2282_vm15 = vcmp.lt.s32.totalorder %v5101_v6, 4 }
 0x123   : > { %v2439_v14 = vsel %vm5047_vm7, %v4888_v37, %v2436_v31  ;;  %vm782_vm0 = vcmp.lt.s32.totalorder %v5093_v8, 2  ;;  %v2263_v38 = vshrl.u32 %v4722_v5, %v2262_v49  ;;  %v2287_v53 = vsel %vm2279_vm13, %v2266_v0, %v2269_v25 }
 0x124   : > { %4515 = vcosq.f32 %v2439_v14  ;;  %v2288_v40 = vsel %vm2282_vm15, %v2275_v39, 920167782  ;;  %vm779_vm1 = vweird.f32 %v4885_v36  ;;  %vm5138_vm2 = vcmp.le.f32.partialorder %v583_v55, 0.7853982 }
 0x125   : > { %4517 = vsinq.f32 %v2439_v14  ;;  %v651_v42 = vclz %v4102_v20  ;;  %vm2281_vm3 = vcmp.lt.s32.totalorder %v5101_v6, 3  ;;  %v2284_v12 = vsel %vm2282_vm15, %v2272_v28, 2102212464 }
 0x126   : > { %v670_v43 = vsel %vm585_vm11, %v669_v34, %v645_v58  ;;  %vm2280_vm4 = vcmp.lt.s32.totalorder %v5101_v6, 2  ;;  %v2289_v59 = vsel %vm2281_vm3, %v2272_v28, %v2288_v40  ;;  %v2291_v55 = vsel %vm2279_vm13, %v2269_v25, %v2272_v28 }
 0x127   : > { %v4103_v44 = vadd.s32 4294967294, %v651_v42  ;;  %v2283_v46 = vsel %vm2279_vm13, %v2263_v38, %v2266_v0  ;;  %v2290_v47 = vsel %vm2280_vm4, %v2287_v53, %v2289_v59  ;;  %v2292_v29 = vsel %vm2282_vm15, %v2278_v32, 1326507024 }
 0x128   : > { %v2285_v49 = vsel %vm2281_vm3, %v2269_v25, %v2284_v12  ;;  %v2293_v51 = vsel %vm2281_vm3, %v2275_v39, %v2292_v29  ;;  %v5158_v1 = vmul.u32.u64.low %v5121_v35, %v2290_v47  ;;  %v5159_v58 = vmul.u32.u64.high %v5121_v35, %v2290_v47, %v5158_v1 }
 0x129   : > { %v4512_v48 = vpop.eup %4511  ;;  %vm4104_vm5 = vcmp.lt.s32.totalorder %v4103_v44, 0  ;;  %v2294_v57 = vsel %vm2280_vm4, %v2291_v55, %v2293_v51  ;;  %v899_v60 = vshrl.u32 %v898_v7, 23  ;;  %v2286_v18 = vsel %vm2280_vm4, %v2283_v46, %v2285_v49 }
 0x12a   : > { %v4514_v3 = vpop.eup %4513  ;;  %v787_v62 = vxor.u32 2147483648, %v4512_v48  ;;  %v654_v17 = vsel %vm4104_vm5, 0, %v4103_v44  ;;  %v5167_v10 = vmul.u32.u64.low %v5121_v35, %v2294_v57  ;;  %v5168_v54 = vmul.u32.u64.high %v5121_v35, %v2294_v57, %v5167_v10 }
 0x12b   : > { %v784_v4 = vxor.u32 2147483648, %v4514_v3  ;;  %v655_v16 = vsub.s32 32, %v654_v17  ;;  %v659_v24 = vsub.s32 4294967266, %v654_v17  ;;  %v2445_v21 = vand.u32 3, %v5095_v56  ;;  %v4299_v56 = vpop.f32.mrf.mxu1 }
 0x12c   : > { %v788_v41 = vsel %vm786_vm12, %v787_v62, %v4514_v3  ;;  %v2305_v7 = vadd.s32 1, %v5159_v58  ;;  %v4113_v23 = vadd.s32 4294967169, %v899_v60  ;;  %v656_v39 = vshll.u32 %v5108_v19, %v654_v17 }
 0x12d   : > { %v785_v0 = vsel %vm783_vm14, %v4512_v48, %v784_v4  ;;  %v657_v26 = vshrl.u32 %v639_v27, %v655_v16  ;;  %v660_v61 = vadd.s32 127, %v659_v24  ;;  %v672_v6 = vsel %vm5138_vm2, 0, %v670_v43 }
 0x12e   : > { %v789_v25 = vsel %vm782_vm0, %v785_v0, %v788_v41  ;;  %v2302_v30 = vmul.u32 %v5121_v35, %v2286_v18  ;;  %vm2304_vm6 = vc.u32 %v5168_v54, %v5158_v1  ;;  %v905_v31 = vadd.s32 1, %v4113_v23 }
 0x12f   : > { %v790_v28 = vsel %vm779_vm1, nan, %v789_v25  ;;  %v658_v8 = vor.u32 %v657_v26, %v656_v39  ;;  %v661_v19 = vshll.u32 %v660_v61, 23  ;;  %v2306_v27 = vsel %vm2304_vm6, %v2305_v7, %v5159_v58 }
 0x130   : > { %3912 = vst [vmem:[%s5188_s10 + $0x8] sm:$0xff] %v790_v28  ;;  %v2307_v36 = vadd.s32 %v2306_v27, %v2302_v30  ;;  %v895_v34 = vand.u32 2147483647, %v5088_v50  ;;  %vm2450_vm7 = vcmp.eq.s32.totalorder %v2445_v21, 2  ;;  %vm906_vm8 = vcmp.gt.s32.totalorder %v905_v31, 0 }
 0x131   : > { %v4516_v14 = vpop.eup %4515  ;;  %v662_v20 = vor.u32 4788187, %v661_v19  ;;  %v5194_v35 = vadd.f32 %v4299_v56, %v4882_v33  ;;  %v676_v53 = vadd.s32 3, %v672_v6  ;;  %v907_v42 = vsel %vm906_vm8, %v905_v31, 0 }
 0x132   : > { %v4518_v32 = vpop.eup %4517  ;;  %v2451_v38 = vxor.u32 2147483648, %v4516_v14  ;;  %v2308_v40 = vadd.s32 536870912, %v2307_v36  ;;  %v665_v59 = vcvt.s32.f32 %v658_v8  ;;  %v909_v55 = vand.u32 31, %v907_v42 }
 0x133   : > { %v2448_v12 = vxor.u32 2147483648, %v4518_v32  ;;  %v663_v43 = vand.u32 2147483647, %v662_v20  ;;  %vm2447_vm9 = vcmp.eq.s32.totalorder %v2445_v21, 0  ;;  %v902_v47 = vand.u32 8388607, %v895_v34 }
 0x134   : > { %v2452_v44 = vsel %vm2450_vm7, %v2451_v38, %v4518_v32  ;;  %v5196_v46 = vshrl.u32 %v2308_v40, 30  ;;  %vm2446_vm10 = vcmp.lt.s32.totalorder %v2445_v21, 2  ;;  %v910_v49 = vsub.s32 32, %v909_v55 }
 0x135   : > { %v2449_v29 = vsel %vm2447_vm9, %v4516_v14, %v2448_v12  ;;  %v666_v48 = vmul.f32 %v665_v59, %v663_v43  ;;  %vm2443_vm12 = vweird.f32 %v4888_v37  ;;  %v5202_v57 = vand.u32 3, %v676_v53 }
 0x136   : > { %v2453_v51 = vsel %vm2446_vm10, %v2449_v29, %v2452_v44  ;;  %v2310_v58 = vshll.u32 %v5196_v46, 30  ;;  %v913_v60 = vshrl.u32 %v4723_v9, %v910_v49  ;;  %v903_v17 = vor.u32 8388608, %v902_v47 }
 0x137   : > { %v2454_v3 = vsel %vm2443_vm12, nan, %v2453_v51  ;;  %v667_v62 = vxor.u32 2147483648, %v666_v48  ;;  %v916_v10 = vshrl.u32 %v4724_v11, %v910_v49  ;;  %v2562_v41 = vand.u32 2139095040, %v5194_v35 }
 0x138   : > { %3928 = vst [vmem:[%s5188_s10 + $0x88] sm:$0xff] %v2454_v3  ;;  %v5206_v4 = vsub.s32 %v2307_v36, %v2310_v58  ;;  %v908_v16 = vshrl.u32 %v907_v42, 5  ;;  %v912_v24 = vshll.u32 %v4722_v5, %v909_v55  ;;  %v919_v18 = vshrl.u32 %v4725_v13, %v910_v49 }
 0x139   : > { %v668_v37 = vsel %vm585_vm11, %v667_v62, %v666_v48  ;;  %v915_v7 = vshll.u32 %v4723_v9, %v909_v55  ;;  %v918_v23 = vshll.u32 %v4724_v11, %v909_v55  ;;  %v921_v39 = vshll.u32 %v4725_v13, %v909_v55 }
 0x13a   : > { %v671_v0 = vsel %vm5138_vm2, %v4897_v45, %v668_v37  ;;  %v2313_v21 = vsub.s32 0, %v5206_v4  ;;  %v914_v25 = vor.u32 %v913_v60, %v912_v24  ;;  %v922_v26 = vshrl.u32 %v4726_v15, %v910_v49 }
 0x13b   : > { %4519 = vcosq.f32 %v671_v0  ;;  %v917_v28 = vor.u32 %v916_v10, %v915_v7  ;;  %v920_v6 = vor.u32 %v919_v18, %v918_v23  ;;  %v924_v52 = vshll.u32 %v4726_v15, %v909_v55 }
 0x13c   : > { %4521 = vsinq.f32 %v671_v0  ;;  %v4166_v61 = vmin.u32 %v2313_v21, %v5206_v4  ;;  %v923_v30 = vor.u32 %v922_v26, %v921_v39  ;;  %v925_v56 = vshrl.u32 %v4727_v22, %v910_v49 }
 0x13d   : > { %v943_v8 = vshll.u32 %v903_v17, 8  ;;  %v911_v27 = vshrl.u32 %v4722_v5, %v910_v49  ;;  %vm927_vm11 = vcmp.lt.s32.totalorder %v908_v16, 1  ;;  %v2563_v31 = vshrl.u32 %v2562_v41, 23 }
 0x13e   : > { %v2315_v19 = vclz %v4166_v61  ;;  %vm2249_vm13 = vcmp.lt.s32.totalorder %v4904_v63, 0  ;;  %v926_v36 = vor.u32 %v925_v56, %v924_v52  ;;  %vm928_vm14 = vcmp.lt.s32.totalorder %v908_v16, 2 }
 0x13f   : > { %vm929_vm15 = vcmp.lt.s32.totalorder %v908_v16, 3  ;;  %vm930_vm0 = vcmp.lt.s32.totalorder %v908_v16, 4  ;;  %v935_v32 = vsel %vm927_vm11, %v914_v25, %v917_v28  ;;  %v931_v53 = vsel %vm927_vm11, %v911_v27, %v914_v25 }
 0x140   : > { %v4167_v14 = vadd.s32 4294967294, %v2315_v19  ;;  %v932_v20 = vsel %vm930_vm0, %v920_v6, 2102212464  ;;  %v936_v38 = vsel %vm930_vm0, %v923_v30, 920167782  ;;  %v939_v42 = vsel %vm927_vm11, %v917_v28, %v920_v6 }
 0x141   : > { %v937_v40 = vsel %vm929_vm15, %v920_v6, %v936_v38  ;;  %v940_v12 = vsel %vm930_vm0, %v926_v36, 1326507024  ;;  %vm5229_vm1 = vcmp.le.f32.partialorder %v2247_v2, 0.7853982  ;;  %v933_v59 = vsel %vm929_vm15, %v917_v28, %v932_v20 }
 0x142   : > { %vm4168_vm2 = vcmp.lt.s32.totalorder %v4167_v14, 0  ;;  %v938_v55 = vsel %vm928_vm14, %v935_v32, %v937_v40  ;;  %v941_v44 = vsel %vm929_vm15, %v923_v30, %v940_v12  ;;  %v2303_v51 = vadd.s32 %v5158_v1, %v5168_v54 }
 0x143   : > { %v2318_v47 = vsel %vm4168_vm2, 0, %v4167_v14  ;;  %v942_v29 = vsel %vm928_vm14, %v939_v42, %v941_v44  ;;  %v5235_v48 = vmul.u32.u64.low %v943_v8, %v938_v55  ;;  %v5236_v49 = vmul.u32.u64.high %v943_v8, %v938_v55, %v5235_v48 }
 0x144   : > { %v2319_v58 = vsub.s32 32, %v2318_v47  ;;  %v2323_v2 = vsub.s32 4294967266, %v2318_v47  ;;  %v2333_v3 = vsub.s32 4, %v5196_v46  ;;  %v2559_v17 = vand.u32 2147483647, %v5194_v35 }
 0x145   : > { %v5242_v62 = vmul.u32.u64.low %v943_v8, %v942_v29  ;;  %v5243_v60 = vmul.u32.u64.high %v943_v8, %v942_v29, %v5242_v62  ;;  %v4177_v10 = vadd.s32 4294967169, %v2563_v31  ;;  %v2320_v41 = vshll.u32 %v5206_v4, %v2318_v47  ;;  %v434_v31 = vpop.f32.mrf.mxu0 }
 0x146   : > { %v2321_v37 = vshrl.u32 %v2303_v51, %v2319_v58  ;;  %v2324_v24 = vadd.s32 127, %v2323_v2  ;;  %v934_v18 = vsel %vm928_vm14, %v931_v53, %v933_v59  ;;  %vm678_vm3 = vcmp.lt.s32.totalorder %v5202_v57, 2 }
 0x147   : > { %vm679_vm4 = vcmp.eq.s32.totalorder %v5202_v57, 0  ;;  %v953_v1 = vadd.s32 1, %v5236_v49  ;;  %v2569_v54 = vadd.s32 1, %v4177_v10  ;;  %vm682_vm5 = vcmp.eq.s32.totalorder %v5202_v57, 2 }
 0x148   : > { %v4520_v0 = vpop.eup %4519  ;;  %v2322_v21 = vor.u32 %v2321_v37, %v2320_v41  ;;  %v2325_v7 = vshll.u32 %v2324_v24, 23  ;;  %v2334_v4 = vsel %vm2249_vm13, %v2333_v3, %v5196_v46  ;;  %v950_v16 = vmul.u32 %v943_v8, %v934_v18 }
 0x149   : > { %v4522_v23 = vpop.eup %4521  ;;  %v683_v25 = vxor.u32 2147483648, %v4520_v0  ;;  %vm952_vm6 = vc.u32 %v5243_v60, %v5235_v48  ;;  %vm2570_vm7 = vcmp.gt.s32.totalorder %v2569_v54, 0  ;;  %v2566_v28 = vand.u32 8388607, %v2559_v17 }
 0x14a   : > { %v680_v39 = vxor.u32 2147483648, %v4522_v23  ;;  %v2326_v26 = vor.u32 4788187, %v2325_v7  ;;  %v954_v61 = vsel %vm952_vm6, %v953_v1, %v5236_v49  ;;  %v2336_v30 = vsel %vm5229_vm1, 0, %v2334_v4 }
 0x14b   : > { %v684_v6 = vsel %vm682_vm5, %v683_v25, %v4522_v23  ;;  %v955_v46 = vadd.s32 %v954_v61, %v950_v16  ;;  %v2571_v52 = vsel %vm2570_vm7, %v2569_v54, 0  ;;  %v2329_v19 = vcvt.s32.f32 %v2322_v21 }
 0x14c   : > { %v681_v56 = vsel %vm679_vm4, %v4520_v0, %v680_v39  ;;  %v2327_v8 = vand.u32 2147483647, %v2326_v26  ;;  %v2573_v27 = vand.u32 31, %v2571_v52  ;;  %vm675_vm8 = vweird.f32 %v4897_v45 }
 0x14d   : > { %v685_v36 = vsel %vm678_vm3, %v681_v56, %v684_v6  ;;  %v956_v14 = vadd.s32 536870912, %v955_v46  ;;  %v2340_v38 = vadd.s32 3, %v2336_v30  ;;  %v2567_v42 = vor.u32 8388608, %v2566_v28 }
 0x14e   : > { %v686_v20 = vsel %vm675_vm8, nan, %v685_v36  ;;  %v2330_v32 = vmul.f32 %v2329_v19, %v2327_v8  ;;  %v2574_v53 = vsub.s32 32, %v2573_v27  ;;  %v2576_v12 = vshll.u32 %v4722_v5, %v2573_v27 }
 0x14f   : > { %3911 = vst [vmem:[%s5188_s10] sm:$0xff] %v686_v20  ;;  %v5268_v40 = vshrl.u32 %v956_v14, 30  ;;  %v5272_v59 = vadd.f32 %v4882_v33, %v434_v31  ;;  %v2579_v57 = vshll.u32 %v4723_v9, %v2573_v27  ;;  %v2582_v29 = vshll.u32 %v4724_v11, %v2573_v27 }
 0x150   : > { %v2331_v55 = vxor.u32 2147483648, %v2330_v32  ;;  %v2577_v45 = vshrl.u32 %v4723_v9, %v2574_v53  ;;  %v2580_v44 = vshrl.u32 %v4724_v11, %v2574_v53  ;;  %v2583_v49 = vshrl.u32 %v4725_v13, %v2574_v53 }
 0x151   : > { %v958_v47 = vshll.u32 %v5268_v40, 30  ;;  %v2586_v51 = vshrl.u32 %v4726_v15, %v2574_v53  ;;  %v2572_v33 = vshrl.u32 %v2571_v52, 5  ;;  %v2585_v3 = vshll.u32 %v4725_v13, %v2573_v27 }
 0x152   : > { %v2332_v58 = vsel %vm2249_vm13, %v2331_v55, %v2330_v32  ;;  %v2578_v2 = vor.u32 %v2577_v45, %v2576_v12  ;;  %v2581_v41 = vor.u32 %v2580_v44, %v2579_v57  ;;  %v2584_v37 = vor.u32 %v2583_v49, %v2582_v29 }
 0x153   : > { %v2335_v62 = vsel %vm5229_vm1, %v4904_v63, %v2332_v58  ;;  %v5287_v10 = vsub.s32 %v955_v46, %v958_v47  ;;  %v2587_v24 = vor.u32 %v2586_v51, %v2585_v3  ;;  %v2588_v18 = vshll.u32 %v4726_v15, %v2573_v27 }
 0x154   : > { %4523 = vcosq.f32 %v2335_v62  ;;  %v2589_v1 = vshrl.u32 %v4727_v22, %v2574_v53  ;;  %v5291_v54 = vand.u32 3, %v2340_v38  ;;  %vm897_vm9 = vcmp.lt.s32.totalorder %v5088_v50, 0 }
 0x155   : > { %4525 = vsinq.f32 %v2335_v62  ;;  %v961_v0 = vsub.s32 0, %v5287_v10  ;;  %vm2594_vm10 = vcmp.lt.s32.totalorder %v2572_v33, 4  ;;  %v2607_v43 = vshll.u32 %v2567_v42, 8 }
 0x156   : > { %v2590_v21 = vor.u32 %v2589_v1, %v2588_v18  ;;  %v794_v7 = vand.u32 2139095040, %v5272_v59  ;;  %v2575_v23 = vshrl.u32 %v4722_v5, %v2574_v53  ;;  %vm2591_vm12 = vcmp.lt.s32.totalorder %v2572_v33, 1 }
 0x157   : > { %v4114_v4 = vmin.u32 %v961_v0, %v5287_v10  ;;  %v2596_v25 = vsel %vm2594_vm10, %v2584_v37, 2102212464  ;;  %vm2592_vm11 = vcmp.lt.s32.totalorder %v2572_v33, 2  ;;  %v2599_v16 = vsel %vm2591_vm12, %v2578_v2, %v2581_v41 }
 0x158   : > { %v2600_v39 = vsel %vm2594_vm10, %v2587_v24, 920167782  ;;  %v791_v26 = vand.u32 2147483647, %v5272_v59  ;;  %vm2593_vm13 = vcmp.lt.s32.totalorder %v2572_v33, 3  ;;  %v2595_v28 = vsel %vm2591_vm12, %v2575_v23, %v2578_v2 }
 0x159   : > { %v963_v61 = vclz %v4114_v4  ;;  %v2603_v6 = vsel %vm2591_vm12, %v2581_v41, %v2584_v37  ;;  %v2597_v30 = vsel %vm2593_vm13, %v2581_v41, %v2596_v25  ;;  %v2601_v46 = vsel %vm2593_vm13, %v2584_v37, %v2600_v39 }
 0x15a   : > { %v2604_v52 = vsel %vm2594_vm10, %v2590_v21, 1326507024  ;;  %v795_v56 = vshrl.u32 %v794_v7, 23  ;;  %v981_v19 = vsub.s32 4, %v5268_v40  ;;  %v2602_v27 = vsel %vm2592_vm11, %v2599_v16, %v2601_v46 }
 0x15b   : > { %v4115_v8 = vadd.s32 4294967294, %v963_v61  ;;  %v2605_v31 = vsel %vm2593_vm13, %v2587_v24, %v2604_v52  ;;  %v5305_v14 = vmul.u32.u64.low %v2607_v43, %v2602_v27  ;;  %v5306_v20 = vmul.u32.u64.high %v2607_v43, %v2602_v27, %v5305_v14 }
 0x15c   : > { %v2606_v36 = vsel %vm2592_vm11, %v2603_v6, %v2605_v31  ;;  %v4109_v32 = vadd.s32 4294967169, %v795_v56  ;;  %v2598_v38 = vsel %vm2592_vm11, %v2595_v28, %v2597_v30  ;;  %vm2339_vm15 = vweird.f32 %v4904_v63 }
 0x15d   : > { %vm4116_vm14 = vcmp.lt.s32.totalorder %v4115_v8, 0  ;;  %v5310_v53 = vmul.u32.u64.low %v2607_v43, %v2606_v36  ;;  %v5311_v42 = vmul.u32.u64.high %v2607_v43, %v2606_v36, %v5310_v53  ;;  %vm2346_vm0 = vcmp.eq.s32.totalorder %v5291_v54, 2 }
 0x15e   : > { %vm5317_vm1 = vcmp.le.f32.partialorder %v895_v34, 0.7853982  ;;  %v966_v55 = vsel %vm4116_vm14, 0, %v4115_v8  ;;  %v801_v45 = vadd.s32 1, %v4109_v32  ;;  %v951_v57 = vadd.s32 %v5235_v48, %v5243_v60  ;;  %v514_v48 = vpop.f32.mrf.mxu1 }
 0x15f   : > { %v967_v44 = vsub.s32 32, %v966_v55  ;;  %v971_v47 = vsub.s32 4294967266, %v966_v55  ;;  %v982_v29 = vsel %vm897_vm9, %v981_v19, %v5268_v40  ;;  %v2614_v49 = vmul.u32 %v2607_v43, %v2598_v38  ;;  %v5341_v43 = vld [vmem:[%s7328_s2] ss:$0 sm:$0xff] }
 0x160   : > { %v2617_v51 = vadd.s32 1, %v5306_v20  ;;  %v798_v34 = vand.u32 8388607, %v791_v26  ;;  %vm802_vm2 = vcmp.gt.s32.totalorder %v801_v45, 0  ;;  %v968_v33 = vshll.u32 %v5287_v10, %v966_v55 }
 0x161   : > { %v4524_v58 = vpop.eup %4523  ;;  %v969_v2 = vshrl.u32 %v951_v57, %v967_v44  ;;  %v972_v3 = vadd.s32 127, %v971_v47  ;;  %vm2616_vm3 = vc.u32 %v5311_v42, %v5305_v14  ;;  %v984_v40 = vsel %vm5317_vm1, 0, %v982_v29 }
 0x162   : > { %v4526_v60 = vpop.eup %4525  ;;  %v2347_v62 = vxor.u32 2147483648, %v4524_v58  ;;  %v2618_v41 = vsel %vm2616_vm3, %v2617_v51, %v5306_v20  ;;  %v803_v37 = vsel %vm802_vm2, %v801_v45, 0  ;;  %vm2343_vm4 = vcmp.eq.s32.totalorder %v5291_v54, 0 }
 0x163   : > { %v2344_v24 = vxor.u32 2147483648, %v4526_v60  ;;  %v970_v18 = vor.u32 %v969_v2, %v968_v33  ;;  %v973_v1 = vshll.u32 %v972_v3, 23  ;;  %v2619_v0 = vadd.s32 %v2618_v41, %v2614_v49 }
 0x164   : > { %v2348_v10 = vsel %vm2346_vm0, %v2347_v62, %v4526_v60  ;;  %v805_v21 = vand.u32 31, %v803_v37  ;;  %v5344_v7 = vadd.f32 %v5341_v43, %v514_v48  ;;  %vm2342_vm5 = vcmp.lt.s32.totalorder %v5291_v54, 2 }
 0x165   : > { %v2345_v4 = vsel %vm2343_vm4, %v4524_v58, %v2344_v24  ;;  %v974_v23 = vor.u32 4788187, %v973_v1  ;;  %v2620_v25 = vadd.s32 536870912, %v2619_v0  ;;  %v5347_v39 = vadd.s32 3, %v984_v40 }
 0x166   : > { %v2349_v16 = vsel %vm2342_vm5, %v2345_v4, %v2348_v10  ;;  %v799_v61 = vor.u32 8388608, %v798_v34  ;;  %v806_v28 = vsub.s32 32, %v805_v21  ;;  %v977_v46 = vcvt.s32.f32 %v970_v18 }
 0x167   : > { %v2350_v6 = vsel %vm2339_vm15, nan, %v2349_v16  ;;  %v975_v30 = vand.u32 2147483647, %v974_v23  ;;  %v5351_v52 = vshrl.u32 %v2620_v25, 30  ;;  %v2458_v19 = vand.u32 2139095040, %v5344_v7 }
 0x168   : > { %3927 = vst [vmem:[%s5188_s10 + $0x80] sm:$0xff] %v2350_v6  ;;  %v809_v56 = vshrl.u32 %v4723_v9, %v806_v28  ;;  %v812_v54 = vshrl.u32 %v4724_v11, %v806_v28  ;;  %v815_v8 = vshrl.u32 %v4725_v13, %v806_v28  ;;  %v808_v36 = vshll.u32 %v4722_v5, %v805_v21 }
 0x169   : > { %v978_v27 = vmul.f32 %v977_v46, %v975_v30  ;;  %v2622_v31 = vshll.u32 %v5351_v52, 30  ;;  %v811_v63 = vshll.u32 %v4723_v9, %v805_v21  ;;  %v804_v20 = vshrl.u32 %v803_v37, 5 }
 0x16a   : > { %v814_v32 = vshll.u32 %v4724_v11, %v805_v21  ;;  %v817_v38 = vshll.u32 %v4725_v13, %v805_v21  ;;  %v818_v53 = vshrl.u32 %v4726_v15, %v806_v28  ;;  %v810_v57 = vor.u32 %v809_v56, %v808_v36 }
 0x16b   : > { %v979_v55 = vxor.u32 2147483648, %v978_v27  ;;  %v5364_v45 = vsub.s32 %v2619_v0, %v2622_v31  ;;  %v813_v44 = vor.u32 %v812_v54, %v811_v63  ;;  %v820_v49 = vshll.u32 %v4726_v15, %v805_v21 }
 0x16c   : > { %v816_v47 = vor.u32 %v815_v8, %v814_v32  ;;  %v819_v29 = vor.u32 %v818_v53, %v817_v38  ;;  %v821_v51 = vshrl.u32 %v4727_v22, %v806_v28  ;;  %v839_v33 = vshll.u32 %v799_v61, 8 }
 0x16d   : > { %v980_v34 = vsel %vm897_vm9, %v979_v55, %v978_v27  ;;  %v2625_v58 = vsub.s32 0, %v5364_v45  ;;  %v2455_v2 = vand.u32 2147483647, %v5344_v7  ;;  %v807_v48 = vshrl.u32 %v4722_v5, %v806_v28 }
 0x16e   : > { %v983_v3 = vsel %vm5317_vm1, %v5088_v50, %v980_v34  ;;  %v822_v60 = vor.u32 %v821_v51, %v820_v49  ;;  %v2459_v62 = vshrl.u32 %v2458_v19, 23  ;;  %vm823_vm6 = vcmp.lt.s32.totalorder %v804_v20, 1 }
 0x16f   : > { %4527 = vcosq.f32 %v983_v3  ;;  %v4178_v40 = vmin.u32 %v2625_v58, %v5364_v45  ;;  %vm826_vm7 = vcmp.lt.s32.totalorder %v804_v20, 4  ;;  %v831_v37 = vsel %vm823_vm6, %v810_v57, %v813_v44 }
 0x170   : > { %4529 = vsinq.f32 %v983_v3  ;;  %v828_v41 = vsel %vm826_vm7, %v816_v47, 2102212464  ;;  %v832_v24 = vsel %vm826_vm7, %v819_v29, 920167782  ;;  %vm824_vm8 = vcmp.lt.s32.totalorder %v804_v20, 2 }
 0x171   : > { %v2627_v18 = vclz %v4178_v40  ;;  %vm825_vm9 = vcmp.lt.s32.totalorder %v804_v20, 3  ;;  %v827_v1 = vsel %vm823_vm6, %v807_v48, %v810_v57  ;;  %v835_v10 = vsel %vm823_vm6, %v813_v44, %v816_v47  ;;  %v4278_v48 = vpop.f32.mrf.mxu0 }
 0x172   : > { %v829_v0 = vsel %vm825_vm9, %v813_v44, %v828_v41  ;;  %v833_v12 = vsel %vm825_vm9, %v816_v47, %v832_v24  ;;  %v836_v21 = vsel %vm826_vm7, %v822_v60, 1326507024  ;;  %v2645_v23 = vsub.s32 4, %v5351_v52 }
 0x173   : > { %v4179_v4 = vadd.s32 4294967294, %v2627_v18  ;;  %v834_v25 = vsel %vm824_vm8, %v831_v37, %v833_v12  ;;  %v837_v16 = vsel %vm825_vm9, %v819_v29, %v836_v21  ;;  %v830_v61 = vsel %vm824_vm8, %v827_v1, %v829_v0 }
 0x174   : > { %v838_v28 = vsel %vm824_vm8, %v835_v10, %v837_v16  ;;  %v5378_v6 = vmul.u32.u64.low %v839_v33, %v834_v25  ;;  %v5379_v30 = vmul.u32.u64.high %v839_v33, %v834_v25, %v5378_v6  ;;  %v4173_v54 = vadd.s32 4294967169, %v2459_v62 }
 0x175   : > { %vm4180_vm10 = vcmp.lt.s32.totalorder %v4179_v4, 0  ;;  %v5381_v46 = vmul.u32.u64.low %v839_v33, %v838_v28  ;;  %v5382_v56 = vmul.u32.u64.high %v839_v33, %v838_v28, %v5381_v46  ;;  %vm5386_vm12 = vcmp.le.f32.partialorder %v2559_v17, 0.7853982 }
 0x176   : > { %vm2561_vm11 = vcmp.lt.s32.totalorder %v5194_v35, 0  ;;  %v2615_v19 = vadd.s32 %v5305_v14, %v5311_v42  ;;  %v2630_v27 = vsel %vm4180_vm10, 0, %v4179_v4  ;;  %v2465_v20 = vadd.s32 1, %v4173_v54 }
 0x177   : > { %v2631_v31 = vsub.s32 32, %v2630_v27  ;;  %v2635_v36 = vsub.s32 4294967266, %v2630_v27  ;;  %v2646_v63 = vsel %vm2561_vm11, %v2645_v23, %v5351_v52  ;;  %v989_v32 = vand.u32 3, %v5347_v39 }
 0x178   : > { %v846_v38 = vmul.u32 %v839_v33, %v830_v61  ;;  %v849_v17 = vadd.s32 1, %v5379_v30  ;;  %v2462_v53 = vand.u32 8388607, %v2455_v2  ;;  %v2632_v55 = vshll.u32 %v5364_v45, %v2630_v27 }
 0x179   : > { %v2633_v57 = vshrl.u32 %v2615_v19, %v2631_v31  ;;  %v2636_v14 = vadd.s32 127, %v2635_v36  ;;  %vm848_vm13 = vc.u32 %v5382_v56, %v5378_v6  ;;  %v2648_v42 = vsel %vm5386_vm12, 0, %v2646_v63 }
 0x17a   : > { %v850_v52 = vsel %vm848_vm13, %v849_v17, %v5379_v30  ;;  %vm2466_vm14 = vcmp.gt.s32.totalorder %v2465_v20, 0  ;;  %vm987_vm15 = vweird.f32 %v5088_v50  ;;  %vm990_vm0 = vcmp.lt.s32.totalorder %v989_v32, 2 }
 0x17b   : > { %v2634_v44 = vor.u32 %v2633_v57, %v2632_v55  ;;  %v2637_v39 = vshll.u32 %v2636_v14, 23  ;;  %v851_v47 = vadd.s32 %v850_v52, %v846_v38  ;;  %v2467_v29 = vsel %vm2466_vm14, %v2465_v20, 0 }
 0x17c   : > { %v4528_v49 = vpop.eup %4527  ;;  %vm991_vm1 = vcmp.eq.s32.totalorder %v989_v32, 0  ;;  %v2469_v45 = vand.u32 31, %v2467_v29  ;;  %v2463_v3 = vor.u32 8388608, %v2462_v53  ;;  %vm994_vm2 = vcmp.eq.s32.totalorder %v989_v32, 2 }
 0x17d   : > { %v4530_v51 = vpop.eup %4529  ;;  %v995_v34 = vxor.u32 2147483648, %v4528_v49  ;;  %v2638_v58 = vor.u32 4788187, %v2637_v39  ;;  %v852_v33 = vadd.s32 536870912, %v851_v47  ;;  %v5406_v62 = vadd.s32 3, %v2648_v42 }
 0x17e   : > { %v992_v60 = vxor.u32 2147483648, %v4530_v51  ;;  %v2470_v40 = vsub.s32 32, %v2469_v45  ;;  %v2641_v24 = vcvt.s32.f32 %v2634_v44  ;;  %v5410_v0 = vadd.s32 %v5378_v6, %v5382_v56 }
 0x17f   : > { %v996_v41 = vsel %vm994_vm2, %v995_v34, %v4530_v51  ;;  %v2639_v37 = vand.u32 2147483647, %v2638_v58  ;;  %v853_v18 = vshrl.u32 %v852_v33, 30  ;;  %v5414_v10 = vadd.f32 %v5341_v43, %v4278_v48 }
 0x180   : > { %v993_v1 = vsel %vm991_vm1, %v4528_v49, %v992_v60  ;;  %v2473_v12 = vshrl.u32 %v4723_v9, %v2470_v40  ;;  %v5417_v25 = vshll.u32 %v2463_v3, 8  ;;  %v2472_v61 = vshll.u32 %v4722_v5, %v2469_v45 }
 0x181   : > { %v997_v21 = vsel %vm990_vm0, %v993_v1, %v996_v41  ;;  %v2642_v4 = vmul.f32 %v2641_v24, %v2639_v37  ;;  %v854_v23 = vshll.u32 %v853_v18, 30  ;;  %v2476_v28 = vshrl.u32 %v4724_v11, %v2470_v40 }
 0x182   : > { %v998_v16 = vsel %vm987_vm15, nan, %v997_v21  ;;  %v2479_v6 = vshrl.u32 %v4725_v13, %v2470_v40  ;;  %v2468_v56 = vshrl.u32 %v2467_v29, 5  ;;  %v2475_v54 = vshll.u32 %v4723_v9, %v2469_v45 }
 0x183   : > { %3914 = vst [vmem:[%s5188_s10 + $0x18] sm:$0xff] %v998_v16  ;;  %v2643_v30 = vxor.u32 2147483648, %v2642_v4  ;;  %v5425_v46 = vsub.s32 %v851_v47, %v854_v23  ;;  %v2474_v19 = vor.u32 %v2473_v12, %v2472_v61  ;;  %v2478_v27 = vshll.u32 %v4724_v11, %v2469_v45 }
 0x184   : > { %v2481_v31 = vshll.u32 %v4725_v13, %v2469_v45  ;;  %v2482_v50 = vshrl.u32 %v4726_v15, %v2470_v40  ;;  %vm793_vm3 = vcmp.lt.s32.totalorder %v5272_v59, 0  ;;  %v2484_v20 = vshll.u32 %v4726_v15, %v2469_v45 }
 0x185   : > { %v2644_v36 = vsel %vm2561_vm11, %v2643_v30, %v2642_v4  ;;  %v857_v63 = vsub.s32 0, %v5425_v46  ;;  %v2485_v32 = vshrl.u32 %v4727_v22, %v2470_v40  ;;  %v2477_v17 = vor.u32 %v2476_v28, %v2475_v54 }
 0x186   : > { %v2647_v38 = vsel %vm5386_vm12, %v5194_v35, %v2644_v36  ;;  %v2480_v53 = vor.u32 %v2479_v6, %v2478_v27  ;;  %v2483_v55 = vor.u32 %v2482_v50, %v2481_v31  ;;  %v1106_v42 = vand.u32 2139095040, %v5414_v10 }
 0x187   : > { %4531 = vcosq.f32 %v2647_v38  ;;  %v4110_v57 = vmin.u32 %v857_v63, %v5425_v46  ;;  %v2486_v14 = vor.u32 %v2485_v32, %v2484_v20  ;;  %v877_v52 = vsub.s32 4, %v853_v18 }
 0x188   : > { %4533 = vsinq.f32 %v2647_v38  ;;  %v2471_v44 = vshrl.u32 %v4722_v5, %v2470_v40  ;;  %vm2487_vm4 = vcmp.lt.s32.totalorder %v2468_v56, 1  ;;  %vm2488_vm5 = vcmp.lt.s32.totalorder %v2468_v56, 2 }
 0x189   : > { %v859_v39 = vclz %v4110_v57  ;;  %vm2489_vm6 = vcmp.lt.s32.totalorder %v2468_v56, 3  ;;  %vm2490_vm7 = vcmp.lt.s32.totalorder %v2468_v56, 4  ;;  %v2495_v47 = vsel %vm2487_vm4, %v2474_v19, %v2477_v17 }
 0x18a   : > { %v2492_v8 = vsel %vm2490_vm7, %v2480_v53, 2102212464  ;;  %v2496_v29 = vsel %vm2490_vm7, %v2483_v55, 920167782  ;;  %v2499_v49 = vsel %vm2487_vm4, %v2477_v17, %v2480_v53  ;;  %v2491_v51 = vsel %vm2487_vm4, %v2471_v44, %v2474_v19  ;;  %v4302_v44 = vpop.f32.mrf.mxu1 }
 0x18b   : > { %v4111_v45 = vadd.s32 4294967294, %v859_v39  ;;  %v2497_v34 = vsel %vm2489_vm6, %v2480_v53, %v2496_v29  ;;  %v2500_v58 = vsel %vm2490_vm7, %v2486_v14, 1326507024  ;;  %v2493_v33 = vsel %vm2489_vm6, %v2477_v17, %v2492_v8 }
 0x18c   : > { %v2498_v3 = vsel %vm2488_vm5, %v2495_v47, %v2497_v34  ;;  %v2501_v48 = vsel %vm2489_vm6, %v2483_v55, %v2500_v58  ;;  %v1107_v60 = vshrl.u32 %v1106_v42, 23  ;;  %v878_v1 = vsel %vm793_vm3, %v877_v52, %v853_v18 }
 0x18d   : > { %vm4112_vm8 = vcmp.lt.s32.totalorder %v4111_v45, 0  ;;  %v2502_v40 = vsel %vm2488_vm5, %v2499_v49, %v2501_v48  ;;  %v5446_v41 = vmul.u32.u64.low %v5417_v25, %v2498_v3  ;;  %v5447_v37 = vmul.u32.u64.high %v5417_v25, %v2498_v3, %v5446_v41 }
 0x18e   : > { %v862_v24 = vsel %vm4112_vm8, 0, %v4111_v45  ;;  %v5453_v12 = vmul.u32.u64.low %v5417_v25, %v2502_v40  ;;  %v5454_v21 = vmul.u32.u64.high %v5417_v25, %v2502_v40, %v5453_v12  ;;  %v2494_v16 = vsel %vm2488_vm5, %v2491_v51, %v2493_v33 }
 0x18f   : > { %v863_v4 = vsub.s32 32, %v862_v24  ;;  %v867_v23 = vsub.s32 4294967266, %v862_v24  ;;  %v4121_v61 = vadd.s32 4294967169, %v1107_v60  ;;  %vm5459_vm9 = vcmp.le.f32.partialorder %v791_v26, 0.7853982 }
 0x190   : > { %v864_v6 = vshll.u32 %v5425_v46, %v862_v24  ;;  %v1103_v30 = vand.u32 2147483647, %v5414_v10  ;;  %v2513_v19 = vadd.s32 1, %v5447_v37  ;;  %v2653_v56 = vand.u32 3, %v5406_v62 }
 0x191   : > { %v865_v18 = vshrl.u32 %v5410_v0, %v863_v4  ;;  %v868_v54 = vadd.s32 127, %v867_v23  ;;  %v1113_v27 = vadd.s32 1, %v4121_v61  ;;  %v880_v31 = vsel %vm5459_vm9, 0, %v878_v1 }
 0x192   : > { %v2510_v26 = vmul.u32 %v5417_v25, %v2494_v16  ;;  %vm2512_vm10 = vc.u32 %v5454_v21, %v5446_v41  ;;  %vm2651_vm11 = vweird.f32 %v5194_v35  ;;  %v884_v17 = vadd.s32 3, %v880_v31 }
 0x193   : > { %v866_v50 = vor.u32 %v865_v18, %v864_v6  ;;  %v869_v46 = vshll.u32 %v868_v54, 23  ;;  %v2514_v36 = vsel %vm2512_vm10, %v2513_v19, %v5447_v37  ;;  %vm1114_vm12 = vcmp.gt.s32.totalorder %v1113_v27, 0 }
 0x194   : > { %v4532_v0 = vpop.eup %4531  ;;  %v2515_v63 = vadd.s32 %v2514_v36, %v2510_v26  ;;  %v1115_v20 = vsel %vm1114_vm12, %v1113_v27, 0  ;;  %v1110_v25 = vand.u32 8388607, %v1103_v30  ;;  %vm2658_vm13 = vcmp.eq.s32.totalorder %v2653_v56, 2 }
 0x195   : > { %v4534_v32 = vpop.eup %4533  ;;  %v2659_v62 = vxor.u32 2147483648, %v4532_v0  ;;  %v870_v38 = vor.u32 4788187, %v869_v46  ;;  %v1117_v57 = vand.u32 31, %v1115_v20  ;;  %vm2655_vm14 = vcmp.eq.s32.totalorder %v2653_v56, 0 }
 0x196   : > { %v2656_v53 = vxor.u32 2147483648, %v4534_v32  ;;  %v2516_v55 = vadd.s32 536870912, %v2515_v63  ;;  %v873_v52 = vcvt.s32.f32 %v866_v50  ;;  %vm2654_vm15 = vcmp.lt.s32.totalorder %v2653_v56, 2 }
 0x197   : > { %v2660_v14 = vsel %vm2658_vm13, %v2659_v62, %v4534_v32  ;;  %v871_v42 = vand.u32 2147483647, %v870_v38  ;;  %v1118_v47 = vsub.s32 32, %v1117_v57  ;;  %v5479_v45 = vand.u32 3, %v884_v17 }
 0x198   : > { %v2657_v39 = vsel %vm2655_vm14, %v4532_v0, %v2656_v53  ;;  %v5477_v8 = vshrl.u32 %v2516_v55, 30  ;;  %v1111_v51 = vor.u32 8388608, %v1110_v25  ;;  %v1120_v33 = vshll.u32 %v4722_v5, %v1117_v57 }
 0x199   : > { %v2661_v29 = vsel %vm2654_vm15, %v2657_v39, %v2660_v14  ;;  %v874_v49 = vmul.f32 %v873_v52, %v871_v42  ;;  %v5486_v3 = vadd.f32 %v5341_v43, %v4302_v44  ;;  %v1121_v60 = vshrl.u32 %v4723_v9, %v1118_v47 }
 0x19a   : > { %v2662_v34 = vsel %vm2651_vm11, nan, %v2661_v29  ;;  %v2518_v58 = vshll.u32 %v5477_v8, 30  ;;  %v1124_v40 = vshrl.u32 %v4724_v11, %v1118_v47  ;;  %v1127_v37 = vshrl.u32 %v4725_v13, %v1118_v47 }
 0x19b   : > { %3930 = vst [vmem:[%s5188_s10 + $0x98] sm:$0xff] %v2662_v34  ;;  %v875_v48 = vxor.u32 2147483648, %v874_v49  ;;  %v1123_v35 = vshll.u32 %v4723_v9, %v1117_v57  ;;  %v1126_v1 = vshll.u32 %v4724_v11, %v1117_v57  ;;  %v1130_v12 = vshrl.u32 %v4726_v15, %v1118_v47 }
 0x19c   : > { %v5492_v24 = vsub.s32 %v2515_v63, %v2518_v58  ;;  %v1116_v23 = vshrl.u32 %v1115_v20, 5  ;;  %v1122_v16 = vor.u32 %v1121_v60, %v1120_v33  ;;  %v1129_v61 = vshll.u32 %v4725_v13, %v1117_v57 }
 0x19d   : > { %v876_v4 = vsel %vm793_vm3, %v875_v48, %v874_v49  ;;  %v1125_v54 = vor.u32 %v1124_v40, %v1123_v35  ;;  %v1128_v19 = vor.u32 %v1127_v37, %v1126_v1  ;;  %v1132_v56 = vshll.u32 %v4726_v15, %v1117_v57 }
 0x19e   : > { %v879_v6 = vsel %vm5459_vm9, %v5272_v59, %v876_v4  ;;  %v2521_v18 = vsub.s32 0, %v5492_v24  ;;  %v1131_v27 = vor.u32 %v1130_v12, %v1129_v61  ;;  %v1133_v31 = vshrl.u32 %v4727_v22, %v1118_v47 }
 0x19f   : > { %4535 = vcosq.f32 %v879_v6  ;;  %v1151_v50 = vshll.u32 %v1111_v51, 8  ;;  %v2770_v46 = vand.u32 2139095040, %v5486_v3  ;;  %v1119_v36 = vshrl.u32 %v4722_v5, %v1118_v47 }
 0x1a0   : > { %4537 = vsinq.f32 %v879_v6  ;;  %v4174_v26 = vmin.u32 %v2521_v18, %v5492_v24  ;;  %v1134_v28 = vor.u32 %v1133_v31, %v1132_v56  ;;  %vm1135_vm0 = vcmp.lt.s32.totalorder %v1116_v23, 1 }
 0x1a1   : > { %vm1136_vm1 = vcmp.lt.s32.totalorder %v1116_v23, 2  ;;  %vm1137_vm2 = vcmp.lt.s32.totalorder %v1116_v23, 3  ;;  %vm1138_vm3 = vcmp.lt.s32.totalorder %v1116_v23, 4  ;;  %v1143_v63 = vsel %vm1135_vm0, %v1122_v16, %v1125_v54 }
 0x1a2   : > { %v2523_v0 = vclz %v4174_v26  ;;  %v1140_v20 = vsel %vm1138_vm3, %v1128_v19, 2102212464  ;;  %v1144_v32 = vsel %vm1138_vm3, %v1131_v27, 920167782  ;;  %v1147_v62 = vsel %vm1135_vm0, %v1125_v54, %v1128_v19 }
 0x1a3   : > { %v1148_v38 = vsel %vm1138_vm3, %v1134_v28, 1326507024  ;;  %v2541_v25 = vsub.s32 4, %v5477_v8  ;;  %v1145_v53 = vsel %vm1137_vm2, %v1128_v19, %v1144_v32  ;;  %v1139_v57 = vsel %vm1135_vm0, %v1119_v36, %v1122_v16 }
 0x1a4   : > { %v4175_v17 = vadd.s32 4294967294, %v2523_v0  ;;  %v1149_v55 = vsel %vm1137_vm2, %v1131_v27, %v1148_v38  ;;  %v1146_v14 = vsel %vm1136_vm1, %v1143_v63, %v1145_v53  ;;  %v2771_v52 = vshrl.u32 %v2770_v46, 23 }
 0x1a5   : > { %v1150_v42 = vsel %vm1136_vm1, %v1147_v62, %v1149_v55  ;;  %v1141_v44 = vsel %vm1137_vm2, %v1125_v54, %v1140_v20  ;;  %v5518_v49 = vmul.u32.u64.low %v1151_v50, %v1146_v14  ;;  %v5519_v51 = vmul.u32.u64.high %v1151_v50, %v1146_v14, %v5518_v49 }
 0x1a6   : > { %vm4176_vm4 = vcmp.lt.s32.totalorder %v4175_v17, 0  ;;  %v5515_v39 = vmul.u32.u64.low %v1151_v50, %v1150_v42  ;;  %v5516_v47 = vmul.u32.u64.high %v1151_v50, %v1150_v42, %v5515_v39  ;;  %v4185_v34 = vadd.s32 4294967169, %v2771_v52 }
 0x1a7   : > { %v2526_v29 = vsel %vm4176_vm4, 0, %v4175_v17  ;;  %vm5524_vm5 = vcmp.le.f32.partialorder %v2455_v2, 0.7853982  ;;  %v2511_v33 = vadd.s32 %v5446_v41, %v5454_v21  ;;  %vm883_vm6 = vweird.f32 %v5272_v59 }
 0x1a8   : > { %v2527_v48 = vsub.s32 32, %v2526_v29  ;;  %v2531_v60 = vsub.s32 4294967266, %v2526_v29  ;;  %vm886_vm7 = vcmp.lt.s32.totalorder %v5479_v45, 2  ;;  %vm2457_vm8 = vcmp.lt.s32.totalorder %v5344_v7, 0 }
 0x1a9   : > { %v1142_v40 = vsel %vm1136_vm1, %v1139_v57, %v1141_v44  ;;  %v2777_v37 = vadd.s32 1, %v4185_v34  ;;  %v2528_v35 = vshll.u32 %v5492_v24, %v2526_v29  ;;  %vm1160_vm9 = vc.u32 %v5516_v47, %v5518_v49  ;;  %v444_v24 = vpop.f32.mrf.mxu0 }
 0x1aa   : > { %v2529_v2 = vshrl.u32 %v2511_v33, %v2527_v48  ;;  %v2532_v1 = vadd.s32 127, %v2531_v60  ;;  %vm887_vm10 = vcmp.eq.s32.totalorder %v5479_v45, 0  ;;  %v2542_v41 = vsel %vm2457_vm8, %v2541_v25, %v5477_v8 }
 0x1ab   : > { %v1161_v21 = vadd.s32 1, %v5519_v51  ;;  %vm2778_vm12 = vcmp.gt.s32.totalorder %v2777_v37, 0  ;;  %v1158_v16 = vmul.u32 %v1151_v50, %v1142_v40  ;;  %v2767_v19 = vand.u32 2147483647, %v5486_v3 }
 0x1ac   : > { %v4536_v12 = vpop.eup %4535  ;;  %v2530_v4 = vor.u32 %v2529_v2, %v2528_v35  ;;  %v2533_v23 = vshll.u32 %v2532_v1, 23  ;;  %v2779_v61 = vsel %vm2778_vm12, %v2777_v37, 0  ;;  %vm890_vm11 = vcmp.eq.s32.totalorder %v5479_v45, 2 }
 0x1ad   : > { %v4538_v6 = vpop.eup %4537  ;;  %v891_v18 = vxor.u32 2147483648, %v4536_v12  ;;  %v1162_v54 = vsel %vm1160_vm9, %v1161_v21, %v5519_v51  ;;  %v2781_v27 = vand.u32 31, %v2779_v61  ;;  %v2544_v46 = vsel %vm5524_vm5, 0, %v2542_v41 }
 0x1ae   : > { %v888_v56 = vxor.u32 2147483648, %v4538_v6  ;;  %v2534_v8 = vor.u32 4788187, %v2533_v23  ;;  %v1163_v31 = vadd.s32 %v1162_v54, %v1158_v16  ;;  %v5548_v36 = vadd.f32 %v5341_v43, %v444_v24 }
 0x1af   : > { %v892_v26 = vsel %vm890_vm11, %v891_v18, %v4538_v6  ;;  %v2782_v50 = vsub.s32 32, %v2781_v27  ;;  %v2537_v63 = vcvt.s32.f32 %v2530_v4  ;;  %v2774_v62 = vand.u32 8388607, %v2767_v19 }
 0x1b0   : > { %v889_v28 = vsel %vm887_vm10, %v4536_v12, %v888_v56  ;;  %v2535_v0 = vand.u32 2147483647, %v2534_v8  ;;  %v1164_v20 = vadd.s32 536870912, %v1163_v31  ;;  %v2780_v14 = vshrl.u32 %v2779_v61, 5 }
 0x1b1   : > { %v893_v32 = vsel %vm886_vm7, %v889_v28, %v892_v26  ;;  %v2785_v38 = vshrl.u32 %v4723_v9, %v2782_v50  ;;  %v2788_v17 = vshrl.u32 %v4724_v11, %v2782_v50  ;;  %v2791_v57 = vshrl.u32 %v4725_v13, %v2782_v50 }
 0x1b2   : > { %v894_v25 = vsel %vm883_vm6, nan, %v893_v32  ;;  %v2538_v53 = vmul.f32 %v2537_v63, %v2535_v0  ;;  %v1165_v55 = vshrl.u32 %v1164_v20, 30  ;;  %v2784_v42 = vshll.u32 %v4722_v5, %v2781_v27 }
 0x1b3   : > { %3913 = vst [vmem:[%s5188_s10 + $0x10] sm:$0xff] %v894_v25  ;;  %v2790_v45 = vshll.u32 %v4724_v11, %v2781_v27  ;;  %v2794_v52 = vshrl.u32 %v4726_v15, %v2782_v50  ;;  %v2787_v29 = vshll.u32 %v4723_v9, %v2781_v27  ;;  %v2793_v51 = vshll.u32 %v4725_v13, %v2781_v27 }
 0x1b4   : > { %v2539_v44 = vxor.u32 2147483648, %v2538_v53  ;;  %v1166_v39 = vshll.u32 %v1165_v55, 30  ;;  %v2786_v59 = vor.u32 %v2785_v38, %v2784_v42  ;;  %v2796_v33 = vshll.u32 %v4726_v15, %v2781_v27 }
 0x1b5   : > { %v2792_v34 = vor.u32 %v2791_v57, %v2790_v45  ;;  %v2797_v48 = vshrl.u32 %v4727_v22, %v2782_v50  ;;  %v2789_v37 = vor.u32 %v2788_v17, %v2787_v29  ;;  %v2795_v35 = vor.u32 %v2794_v52, %v2793_v51 }
 0x1b6   : > { %v2540_v60 = vsel %vm2457_vm8, %v2539_v44, %v2538_v53  ;;  %v5571_v40 = vsub.s32 %v1163_v31, %v1166_v39  ;;  %v2548_v1 = vadd.s32 3, %v2544_v46  ;;  %v2775_v41 = vor.u32 8388608, %v2774_v62 }
 0x1b7   : > { %v2543_v2 = vsel %vm5524_vm5, %v5344_v7, %v2540_v60  ;;  %v2798_v21 = vor.u32 %v2797_v48, %v2796_v33  ;;  %vm2802_vm13 = vcmp.lt.s32.totalorder %v2780_v14, 4  ;;  %v1002_v4 = vand.u32 2139095040, %v5548_v36 }
 0x1b8   : > { %4539 = vcosq.f32 %v2543_v2  ;;  %v1169_v12 = vsub.s32 0, %v5571_v40  ;;  %v2783_v23 = vshrl.u32 %v4722_v5, %v2782_v50  ;;  %vm2799_vm14 = vcmp.lt.s32.totalorder %v2780_v14, 1 }
 0x1b9   : > { %4541 = vsinq.f32 %v2543_v2  ;;  %v2804_v16 = vsel %vm2802_vm13, %v2792_v34, 2102212464  ;;  %vm2801_vm15 = vcmp.lt.s32.totalorder %v2780_v14, 3  ;;  %v2807_v24 = vsel %vm2799_vm14, %v2786_v59, %v2789_v37 }
 0x1ba   : > { %v4122_v61 = vmin.u32 %v1169_v12, %v5571_v40  ;;  %v2808_v58 = vsel %vm2802_vm13, %v2795_v35, 920167782  ;;  %v1189_v6 = vsub.s32 4, %v1165_v55  ;;  %v2811_v54 = vsel %vm2799_vm14, %v2789_v37, %v2792_v34 }
 0x1bb   : > { %v2809_v18 = vsel %vm2801_vm15, %v2792_v34, %v2808_v58  ;;  %v2812_v27 = vsel %vm2802_vm13, %v2798_v21, 1326507024  ;;  %vm2800_vm0 = vcmp.lt.s32.totalorder %v2780_v14, 2  ;;  %v2803_v8 = vsel %vm2799_vm14, %v2783_v23, %v2786_v59 }
 0x1bc   : > { %v1171_v56 = vclz %v4122_v61  ;;  %v2805_v31 = vsel %vm2801_vm15, %v2789_v37, %v2804_v16  ;;  %v2810_v26 = vsel %vm2800_vm0, %v2807_v24, %v2809_v18  ;;  %v2813_v46 = vsel %vm2801_vm15, %v2795_v35, %v2812_v27  ;;  %v524_v27 = vpop.f32.mrf.mxu1 }
 0x1bd   : > { %v2815_v28 = vshll.u32 %v2775_v41, 8  ;;  %v1003_v0 = vshrl.u32 %v1002_v4, 23  ;;  %vm1105_vm1 = vcmp.lt.s32.totalorder %v5414_v10, 0  ;;  %v2814_v63 = vsel %vm2800_vm0, %v2811_v54, %v2813_v46 }
 0x1be   : > { %v4123_v50 = vadd.s32 4294967294, %v1171_v56  ;;  %v1190_v17 = vsel %vm1105_vm1, %v1189_v6, %v1165_v55  ;;  %v2806_v25 = vsel %vm2800_vm0, %v2803_v8, %v2805_v31  ;;  %v2549_v57 = vand.u32 3, %v2548_v1 }
 0x1bf   : > { %v5581_v20 = vmul.u32.u64.low %v2815_v28, %v2814_v63  ;;  %v5582_v32 = vmul.u32.u64.high %v2815_v28, %v2814_v63, %v5581_v20  ;;  %v5584_v62 = vmul.u32.u64.low %v2815_v28, %v2810_v26  ;;  %v5585_v38 = vmul.u32.u64.high %v2815_v28, %v2810_v26, %v5584_v62 }
 0x1c0   : > { %vm4124_vm2 = vcmp.lt.s32.totalorder %v4123_v50, 0  ;;  %v4117_v53 = vadd.s32 4294967169, %v1003_v0  ;;  %vm5592_vm3 = vcmp.le.f32.partialorder %v1103_v30, 0.7853982  ;;  %v999_v45 = vand.u32 2147483647, %v5548_v36 }
 0x1c1   : > { %v1174_v42 = vsel %vm4124_vm2, 0, %v4123_v50  ;;  %v1159_v52 = vadd.s32 %v5518_v49, %v5516_v47  ;;  %v1192_v55 = vsel %vm5592_vm3, 0, %v1190_v17  ;;  %v2822_v51 = vmul.u32 %v2815_v28, %v2806_v25 }
 0x1c2   : > { %v1175_v44 = vsub.s32 32, %v1174_v42  ;;  %v1179_v39 = vsub.s32 4294967266, %v1174_v42  ;;  %v1009_v29 = vadd.s32 1, %v4117_v53  ;;  %vm2824_vm4 = vc.u32 %v5582_v32, %v5584_v62 }
 0x1c3   : > { %v2825_v30 = vadd.s32 1, %v5585_v38  ;;  %v1176_v59 = vshll.u32 %v5571_v40, %v1174_v42  ;;  %vm2554_vm6 = vcmp.eq.s32.totalorder %v2549_v57, 2  ;;  %v1196_v21 = vadd.s32 3, %v1192_v55 }
 0x1c4   : > { %v1177_v34 = vshrl.u32 %v1159_v52, %v1175_v44  ;;  %v1180_v33 = vadd.s32 127, %v1179_v39  ;;  %vm1010_vm5 = vcmp.gt.s32.totalorder %v1009_v29, 0  ;;  %v1006_v12 = vand.u32 8388607, %v999_v45 }
 0x1c5   : > { %v4540_v48 = vpop.eup %4539  ;;  %v2826_v47 = vsel %vm2824_vm4, %v2825_v30, %v5585_v38  ;;  %v1011_v49 = vsel %vm1010_vm5, %v1009_v29, 0  ;;  %vm2551_vm7 = vcmp.eq.s32.totalorder %v2549_v57, 0  ;;  %vm2547_vm8 = vweird.f32 %v5344_v7 }
 0x1c6   : > { %v4542_v60 = vpop.eup %4541  ;;  %v2555_v37 = vxor.u32 2147483648, %v4540_v48  ;;  %v1178_v35 = vor.u32 %v1177_v34, %v1176_v59  ;;  %v1181_v2 = vshll.u32 %v1180_v33, 23  ;;  %v2827_v1 = vadd.s32 %v2826_v47, %v2822_v51 }
 0x1c7   : > { %v2552_v41 = vxor.u32 2147483648, %v4542_v60  ;;  %v1013_v4 = vand.u32 31, %v1011_v49  ;;  %vm2550_vm9 = vcmp.lt.s32.totalorder %v2549_v57, 2  ;;  %v5611_v8 = vand.u32 3, %v1196_v21 }
 0x1c8   : > { %v2556_v40 = vsel %vm2554_vm6, %v2555_v37, %v4542_v60  ;;  %v1182_v23 = vor.u32 4788187, %v1181_v2  ;;  %v2828_v16 = vadd.s32 536870912, %v2827_v1  ;;  %v1185_v18 = vcvt.s32.f32 %v1178_v35 }
 0x1c9   : > { %v2553_v61 = vsel %vm2551_vm7, %v4540_v48, %v2552_v41  ;;  %v1014_v24 = vsub.s32 32, %v1013_v4  ;;  %v1007_v31 = vor.u32 8388608, %v1006_v12  ;;  %v1012_v0 = vshrl.u32 %v1011_v49, 5 }
 0x1ca   : > { %v2557_v58 = vsel %vm2550_vm9, %v2553_v61, %v2556_v40  ;;  %v1183_v6 = vand.u32 2147483647, %v1182_v23  ;;  %v5609_v54 = vshrl.u32 %v2828_v16, 30  ;;  %v5620_v20 = vadd.f32 %v5341_v43, %v524_v27 }
 0x1cb   : > { %v2558_v56 = vsel %vm2547_vm8, nan, %v2557_v58  ;;  %v1017_v28 = vshrl.u32 %v4723_v9, %v1014_v24  ;;  %v1020_v7 = vshrl.u32 %v4724_v11, %v1014_v24  ;;  %v1023_v50 = vshrl.u32 %v4725_v13, %v1014_v24 }
 0x1cc   : > { %3929 = vst [vmem:[%s5188_s10 + $0x90] sm:$0xff] %v2558_v56  ;;  %v1186_v26 = vmul.f32 %v1185_v18, %v1183_v6  ;;  %v2830_v46 = vshll.u32 %v5609_v54, 30  ;;  %v1026_v63 = vshrl.u32 %v4726_v15, %v1014_v24  ;;  %v1016_v25 = vshll.u32 %v4722_v5, %v1013_v4 }
 0x1cd   : > { %v1019_v53 = vshll.u32 %v4723_v9, %v1013_v4  ;;  %v1022_v57 = vshll.u32 %v4724_v11, %v1013_v4  ;;  %v1025_v42 = vshll.u32 %v4725_v13, %v1013_v4  ;;  %v1028_v52 = vshll.u32 %v4726_v15, %v1013_v4 }
 0x1ce   : > { %v1187_v38 = vxor.u32 2147483648, %v1186_v26  ;;  %v5622_v17 = vsub.s32 %v2827_v1, %v2830_v46  ;;  %v1029_v44 = vshrl.u32 %v4727_v22, %v1014_v24  ;;  %v1018_v29 = vor.u32 %v1017_v28, %v1016_v25 }
 0x1cf   : > { %v1021_v55 = vor.u32 %v1020_v7, %v1019_v53  ;;  %vm2769_vm10 = vcmp.lt.s32.totalorder %v5486_v3, 0  ;;  %v1024_v30 = vor.u32 %v1023_v50, %v1022_v57  ;;  %v1027_v59 = vor.u32 %v1026_v63, %v1025_v42 }
 0x1d0   : > { %v1188_v39 = vsel %vm1105_vm1, %v1187_v38, %v1186_v26  ;;  %v2833_v43 = vsub.s32 0, %v5622_v17  ;;  %v1030_v34 = vor.u32 %v1029_v44, %v1028_v52  ;;  %v1047_v48 = vshll.u32 %v1007_v31, 8 }
 0x1d1   : > { %v1191_v51 = vsel %vm5592_vm3, %v5414_v10, %v1188_v39  ;;  %v2666_v47 = vand.u32 2139095040, %v5620_v20  ;;  %v2853_v49 = vsub.s32 4, %v5609_v54  ;;  %v1015_v60 = vshrl.u32 %v4722_v5, %v1014_v24 }
 0x1d2   : > { %4543 = vcosq.f32 %v1191_v51  ;;  %v4186_v33 = vmin.u32 %v2833_v43, %v5622_v17  ;;  %vm1031_vm12 = vcmp.lt.s32.totalorder %v1012_v0, 1  ;;  %vm1033_vm11 = vcmp.lt.s32.totalorder %v1012_v0, 3 }
 0x1d3   : > { %4545 = vsinq.f32 %v1191_v51  ;;  %vm1034_vm13 = vcmp.lt.s32.totalorder %v1012_v0, 4  ;;  %v1039_v14 = vsel %vm1031_vm12, %v1018_v29, %v1021_v55  ;;  %v1043_v1 = vsel %vm1031_vm12, %v1021_v55, %v1024_v30 }
 0x1d4   : > { %v2835_v37 = vclz %v4186_v33  ;;  %v1036_v35 = vsel %vm1034_vm13, %v1024_v30, 2102212464  ;;  %v1040_v2 = vsel %vm1034_vm13, %v1027_v59, 920167782  ;;  %v1044_v41 = vsel %vm1034_vm13, %v1030_v34, 1326507024 }
 0x1d5   : > { %vm1032_vm14 = vcmp.lt.s32.totalorder %v1012_v0, 2  ;;  %v1041_v12 = vsel %vm1033_vm11, %v1024_v30, %v1040_v2  ;;  %v1045_v4 = vsel %vm1033_vm11, %v1027_v59, %v1044_v41  ;;  %v1035_v40 = vsel %vm1031_vm12, %v1015_v60, %v1018_v29  ;;  %v4281_v0 = vpop.f32.mrf.mxu0  ;;  %v5680_v59 = vld [vmem:[%s7328_s2] ss:$0 sm:$0xff] }
 0x1d6   : > { %v4187_v21 = vadd.s32 4294967294, %v2835_v37  ;;  %v1042_v23 = vsel %vm1032_vm14, %v1039_v14, %v1041_v12  ;;  %v1046_v16 = vsel %vm1032_vm14, %v1043_v1, %v1045_v4  ;;  %v2667_v61 = vshrl.u32 %v2666_v47, 23 }
 0x1d7   : > { %v1037_v24 = vsel %vm1033_vm11, %v1021_v55, %v1036_v35  ;;  %v5646_v58 = vmul.u32.u64.low %v1047_v48, %v1046_v16  ;;  %v5647_v6 = vmul.u32.u64.high %v1047_v48, %v1046_v16, %v5646_v58  ;;  %v2823_v26 = vadd.s32 %v5584_v62, %v5582_v32 }
 0x1d8   : > { %vm4188_vm15 = vcmp.lt.s32.totalorder %v4187_v21, 0  ;;  %v5649_v27 = vmul.u32.u64.low %v1047_v48, %v1042_v23  ;;  %v5650_v56 = vmul.u32.u64.high %v1047_v48, %v1042_v23, %v5649_v27  ;;  %v4181_v31 = vadd.s32 4294967169, %v2667_v61 }
 0x1d9   : > { %v2838_v18 = vsel %vm4188_vm15, 0, %v4187_v21  ;;  %v2854_v7 = vsel %vm2769_vm10, %v2853_v49, %v5609_v54  ;;  %vm1198_vm0 = vcmp.lt.s32.totalorder %v5611_v8, 2  ;;  %vm5661_vm1 = vcmp.le.f32.partialorder %v2767_v19, 0.7853982 }
 0x1da   : > { %v2839_v46 = vsub.s32 32, %v2838_v18  ;;  %v2843_v28 = vsub.s32 4294967266, %v2838_v18  ;;  %v1038_v63 = vsel %vm1032_vm14, %v1035_v40, %v1037_v24  ;;  %v2673_v38 = vadd.s32 1, %v4181_v31 }
 0x1db   : > { %vm1195_vm2 = vweird.f32 %v5414_v10  ;;  %v2840_v32 = vshll.u32 %v5622_v17, %v2838_v18  ;;  %vm1056_vm3 = vc.u32 %v5647_v6, %v5649_v27  ;;  %v2856_v54 = vsel %vm5661_vm1, 0, %v2854_v7 }
 0x1dc   : > { %v2841_v62 = vshrl.u32 %v2823_v26, %v2839_v46  ;;  %v2844_v25 = vadd.s32 127, %v2843_v28  ;;  %v1057_v19 = vadd.s32 1, %v5650_v56  ;;  %v2663_v53 = vand.u32 2147483647, %v5620_v20 }
 0x1dd   : > { %vm2674_vm4 = vcmp.gt.s32.totalorder %v2673_v38, 0  ;;  %v1054_v52 = vmul.u32 %v1047_v48, %v1038_v63  ;;  %vm1199_vm5 = vcmp.eq.s32.totalorder %v5611_v8, 0  ;;  %vm1202_vm6 = vcmp.eq.s32.totalorder %v5611_v8, 2 }
 0x1de   : > { %v2842_v57 = vor.u32 %v2841_v62, %v2840_v32  ;;  %v2845_v42 = vshll.u32 %v2844_v25, 23  ;;  %v2675_v44 = vsel %vm2674_vm4, %v2673_v38, 0  ;;  %v1058_v17 = vsel %vm1056_vm3, %v1057_v19, %v5650_v56 }
 0x1df   : > { %v4544_v39 = vpop.eup %4543  ;;  %v2677_v43 = vand.u32 31, %v2675_v44  ;;  %v1059_v30 = vadd.s32 %v1058_v17, %v1054_v52  ;;  %v5683_v34 = vadd.f32 %v5680_v59, %v4281_v0  ;;  %v5685_v48 = vadd.s32 3, %v2856_v54 }
 0x1e0   : > { %v4546_v29 = vpop.eup %4545  ;;  %v1203_v55 = vxor.u32 2147483648, %v4544_v39  ;;  %v2846_v51 = vor.u32 4788187, %v2845_v42  ;;  %v2670_v47 = vand.u32 8388607, %v2663_v53  ;;  %v2849_v14 = vcvt.s32.f32 %v2842_v57 }
 0x1e1   : > { %v1200_v33 = vxor.u32 2147483648, %v4546_v29  ;;  %v2678_v49 = vsub.s32 32, %v2677_v43  ;;  %v1060_v35 = vadd.s32 536870912, %v1059_v30  ;;  %v2680_v1 = vshll.u32 %v4722_v5, %v2677_v43 }
 0x1e2   : > { %v1204_v60 = vsel %vm1202_vm6, %v1203_v55, %v4546_v29  ;;  %v2847_v37 = vand.u32 2147483647, %v2846_v51  ;;  %v2671_v61 = vor.u32 8388608, %v2670_v47  ;;  %v2676_v24 = vshrl.u32 %v2675_v44, 5 }
 0x1e3   : > { %v1201_v2 = vsel %vm1199_vm5, %v4544_v39, %v1200_v33  ;;  %v2681_v41 = vshrl.u32 %v4723_v9, %v2678_v49  ;;  %v2684_v21 = vshrl.u32 %v4724_v11, %v2678_v49  ;;  %v5696_v40 = vshrl.u32 %v1060_v35, 30 }
 0x1e4   : > { %v1205_v12 = vsel %vm1198_vm0, %v1201_v2, %v1204_v60  ;;  %v2850_v4 = vmul.f32 %v2849_v14, %v2847_v37  ;;  %v2687_v23 = vshrl.u32 %v4725_v13, %v2678_v49  ;;  %v2683_v58 = vshll.u32 %v4723_v9, %v2677_v43  ;;  %v4305_v14 = vpop.f32.mrf.mxu1 }
 0x1e5   : > { %v1206_v16 = vsel %vm1195_vm2, nan, %v1205_v12  ;;  %v1062_v56 = vshll.u32 %v5696_v40, 30  ;;  %v2682_v31 = vor.u32 %v2681_v41, %v2680_v1  ;;  %v2686_v8 = vshll.u32 %v4724_v11, %v2677_v43 }
 0x1e6   : > { %3916 = vst [vmem:[%s5188_s10 + $0x28] sm:$0xff] %v1206_v16  ;;  %v2851_v18 = vxor.u32 2147483648, %v2850_v4  ;;  %v2689_v26 = vshll.u32 %v4725_v13, %v2677_v43  ;;  %v2690_v46 = vshrl.u32 %v4726_v15, %v2678_v49  ;;  %v2692_v28 = vshll.u32 %v4726_v15, %v2677_v43 }
 0x1e7   : > { %v2693_v10 = vshrl.u32 %v4727_v22, %v2678_v49  ;;  %v5711_v63 = vsub.s32 %v1059_v30, %v1062_v56  ;;  %v2685_v38 = vor.u32 %v2684_v21, %v2683_v58  ;;  %v2688_v32 = vor.u32 %v2687_v23, %v2686_v8 }
 0x1e8   : > { %v2852_v7 = vsel %vm2769_vm10, %v2851_v18, %v2850_v4  ;;  %v2691_v25 = vor.u32 %v2690_v46, %v2689_v26  ;;  %v1311_v19 = vand.u32 2147483647, %v5683_v34  ;;  %v2679_v57 = vshrl.u32 %v4722_v5, %v2678_v49 }
 0x1e9   : > { %v2855_v62 = vsel %vm5661_vm1, %v5486_v3, %v2852_v7  ;;  %v2694_v54 = vor.u32 %v2693_v10, %v2692_v28  ;;  %v1065_v0 = vsub.s32 0, %v5711_v63  ;;  %v1314_v42 = vand.u32 2139095040, %v5683_v34 }
 0x1ea   : > { %4547 = vcosq.f32 %v2855_v62  ;;  %vm1001_vm7 = vcmp.lt.s32.totalorder %v5548_v36, 0  ;;  %vm2695_vm8 = vcmp.lt.s32.totalorder %v2676_v24, 1  ;;  %vm2697_vm9 = vcmp.lt.s32.totalorder %v2676_v24, 3 }
 0x1eb   : > { %4549 = vsinq.f32 %v2855_v62  ;;  %vm2698_vm10 = vcmp.lt.s32.totalorder %v2676_v24, 4  ;;  %v4118_v50 = vmin.u32 %v1065_v0, %v5711_v63  ;;  %v2703_v44 = vsel %vm2695_vm8, %v2682_v31, %v2685_v38 }
 0x1ec   : > { %v2700_v52 = vsel %vm2698_vm10, %v2688_v32, 2102212464  ;;  %v2704_v39 = vsel %vm2698_vm10, %v2691_v25, 920167782  ;;  %v2707_v43 = vsel %vm2695_vm8, %v2685_v38, %v2688_v32  ;;  %v2708_v29 = vsel %vm2698_vm10, %v2694_v54, 1326507024 }
 0x1ed   : > { %v2705_v17 = vsel %vm2697_vm9, %v2688_v32, %v2704_v39  ;;  %v2711_v55 = vshll.u32 %v2671_v61, 8  ;;  %v1067_v51 = vclz %v4118_v50  ;;  %v1085_v30 = vsub.s32 4, %v5696_v40 }
 0x1ee   : > { %vm2696_vm12 = vcmp.lt.s32.totalorder %v2676_v24, 2  ;;  %v2699_v33 = vsel %vm2695_vm8, %v2679_v57, %v2682_v31  ;;  %v2701_v47 = vsel %vm2697_vm9, %v2685_v38, %v2700_v52  ;;  %v2709_v60 = vsel %vm2697_vm9, %v2691_v25, %v2708_v29 }
 0x1ef   : > { %v2706_v49 = vsel %vm2696_vm12, %v2703_v44, %v2705_v17  ;;  %v1315_v37 = vshrl.u32 %v1314_v42, 23  ;;  %v4119_v35 = vadd.s32 4294967294, %v1067_v51  ;;  %v2710_v2 = vsel %vm2696_vm12, %v2707_v43, %v2709_v60 }
 0x1f0   : > { %v5726_v1 = vmul.u32.u64.low %v2711_v55, %v2706_v49  ;;  %v5727_v41 = vmul.u32.u64.high %v2711_v55, %v2706_v49, %v5726_v1  ;;  %vm5731_vm11 = vcmp.le.f32.partialorder %v999_v45, 0.7853982  ;;  %v2861_v16 = vand.u32 3, %v5685_v48 }
 0x1f1   : > { %v5735_v12 = vmul.u32.u64.low %v2711_v55, %v2710_v2  ;;  %v5736_v4 = vmul.u32.u64.high %v2711_v55, %v2710_v2, %v5735_v12  ;;  %v4129_v23 = vadd.s32 4294967169, %v1315_v37  ;;  %vm4120_vm13 = vcmp.lt.s32.totalorder %v4119_v35, 0 }
 0x1f2   : > { %v2702_v61 = vsel %vm2696_vm12, %v2699_v33, %v2701_v47  ;;  %v5740_v24 = vadd.f32 %v5680_v59, %v4305_v14  ;;  %v1055_v58 = vadd.s32 %v5649_v27, %v5647_v6  ;;  %v1070_v18 = vsel %vm4120_vm13, 0, %v4119_v35 }
 0x1f3   : > { %v5746_v45 = vand.u32 8388607, %v1311_v19  ;;  %v1321_v56 = vadd.s32 1, %v4129_v23  ;;  %vm2859_vm14 = vweird.f32 %v5486_v3  ;;  %v1071_v31 = vsub.s32 32, %v1070_v18 }
 0x1f4   : > { %v1075_v8 = vsub.s32 4294967266, %v1070_v18  ;;  %v1086_v48 = vsel %vm1001_vm7, %v1085_v30, %v5696_v40  ;;  %v2721_v26 = vadd.s32 1, %v5727_v41  ;;  %v1072_v46 = vshll.u32 %v5711_v63, %v1070_v18 }
 0x1f5   : > { %v2718_v28 = vmul.u32 %v2711_v55, %v2702_v61  ;;  %vm2720_vm15 = vc.u32 %v5736_v4, %v5726_v1  ;;  %vm1322_vm0 = vcmp.gt.s32.totalorder %v1321_v56, 0  ;;  %v1073_v6 = vshrl.u32 %v1055_v58, %v1071_v31 }
 0x1f6   : > { %v1076_v27 = vadd.s32 127, %v1075_v8  ;;  %v2722_v10 = vsel %vm2720_vm15, %v2721_v26, %v5727_v41  ;;  %v1323_v7 = vsel %vm1322_vm0, %v1321_v56, 0  ;;  %vm2862_vm1 = vcmp.lt.s32.totalorder %v2861_v16, 2 }
 0x1f7   : > { %v4548_v38 = vpop.eup %4547  ;;  %v1088_v32 = vsel %vm5731_vm11, 0, %v1086_v48  ;;  %v2723_v62 = vadd.s32 %v2722_v10, %v2718_v28  ;;  %v1325_v40 = vand.u32 31, %v1323_v7  ;;  %vm2863_vm2 = vcmp.eq.s32.totalorder %v2861_v16, 0 }
 0x1f8   : > { %v4550_v25 = vpop.eup %4549  ;;  %v2867_v54 = vxor.u32 2147483648, %v4548_v38  ;;  %v1074_v63 = vor.u32 %v1073_v6, %v1072_v46  ;;  %v1077_v0 = vshll.u32 %v1076_v27, 23  ;;  %vm2866_vm3 = vcmp.eq.s32.totalorder %v2861_v16, 2 }
 0x1f9   : > { %v2864_v57 = vxor.u32 2147483648, %v4550_v25  ;;  %v2724_v42 = vadd.s32 536870912, %v2723_v62  ;;  %v1326_v50 = vsub.s32 32, %v1325_v40  ;;  %v5758_v39 = vadd.s32 3, %v1088_v32 }
 0x1fa   : > { %v2868_v52 = vsel %vm2866_vm3, %v2867_v54, %v4550_v25  ;;  %v1078_v44 = vor.u32 4788187, %v1077_v0  ;;  %v1319_v17 = vor.u32 8388608, %v5746_v45  ;;  %v2975_v55 = vand.u32 2147483647, %v5740_v24 }
 0x1fb   : > { %v2865_v43 = vsel %vm2863_vm2, %v4548_v38, %v2864_v57  ;;  %v2725_v29 = vshrl.u32 %v2724_v42, 30  ;;  %v2978_v51 = vand.u32 2139095040, %v5740_v24  ;;  %v1081_v47 = vcvt.s32.f32 %v1074_v63 }
 0x1fc   : > { %v2869_v30 = vsel %vm2862_vm1, %v2865_v43, %v2868_v52  ;;  %v1079_v33 = vand.u32 2147483647, %v1078_v44  ;;  %v1329_v49 = vshrl.u32 %v4723_v9, %v1326_v50  ;;  %v5768_v37 = vadd.s32 %v5726_v1, %v5736_v4 }
 0x1fd   : > { %v2870_v60 = vsel %vm2859_vm14, nan, %v2869_v30  ;;  %v2726_v14 = vshll.u32 %v2725_v29, 30  ;;  %v1332_v35 = vshrl.u32 %v4724_v11, %v1326_v50  ;;  %v1324_v41 = vshrl.u32 %v1323_v7, 5 }
 0x1fe   : > { %3932 = vst [vmem:[%s5188_s10 + $0xa8] sm:$0xff] %v2870_v60  ;;  %v1082_v2 = vmul.f32 %v1081_v47, %v1079_v33  ;;  %v1328_v12 = vshll.u32 %v4722_v5, %v1325_v40  ;;  %v1335_v23 = vshrl.u32 %v4725_v13, %v1326_v50  ;;  %v1331_v61 = vshll.u32 %v4723_v9, %v1325_v40 }
 0x1ff   : > { %v5774_v16 = vsub.s32 %v2723_v62, %v2726_v14  ;;  %v1334_v3 = vshll.u32 %v4724_v11, %v1325_v40  ;;  %v1338_v58 = vshrl.u32 %v4726_v15, %v1326_v50  ;;  %v1337_v18 = vshll.u32 %v4725_v13, %v1325_v40 }
 0x200   : > { %v1083_v1 = vxor.u32 2147483648, %v1082_v2  ;;  %v1330_v4 = vor.u32 %v1329_v49, %v1328_v12  ;;  %v1341_v45 = vshrl.u32 %v4727_v22, %v1326_v50  ;;  %vm2665_vm4 = vcmp.lt.s32.totalorder %v5620_v20, 0 }
 0x201   : > { %v2729_v56 = vsub.s32 0, %v5774_v16  ;;  %v1333_v31 = vor.u32 %v1332_v35, %v1331_v61  ;;  %v1336_v8 = vor.u32 %v1335_v23, %v1334_v3  ;;  %v1340_v48 = vshll.u32 %v4726_v15, %v1325_v40 }
 0x202   : > { %v1084_v26 = vsel %vm1001_vm7, %v1083_v1, %v1082_v2  ;;  %v1339_v46 = vor.u32 %v1338_v58, %v1337_v18  ;;  %v1359_v28 = vshll.u32 %v1319_v17, 8  ;;  %v2979_v6 = vshrl.u32 %v2978_v51, 23 }
 0x203   : > { %v1087_v27 = vsel %vm5731_vm11, %v5548_v36, %v1084_v26  ;;  %v4182_v10 = vmin.u32 %v2729_v56, %v5774_v16  ;;  %v1327_v7 = vshrl.u32 %v4722_v5, %v1326_v50  ;;  %v1342_v38 = vor.u32 %v1341_v45, %v1340_v48 }
 0x204   : > { %4551 = vcosq.f32 %v1087_v27  ;;  %v2749_v32 = vsub.s32 4, %v2725_v29  ;;  %vm1343_vm5 = vcmp.lt.s32.totalorder %v1324_v41, 1  ;;  %vm1346_vm6 = vcmp.lt.s32.totalorder %v1324_v41, 4 }
 0x205   : > { %4553 = vsinq.f32 %v1087_v27  ;;  %v2731_v62 = vclz %v4182_v10  ;;  %v1348_v40 = vsel %vm1346_vm6, %v1336_v8, 2102212464  ;;  %v1351_v25 = vsel %vm1343_vm5, %v1330_v4, %v1333_v31 }
 0x206   : > { %vm1344_vm7 = vcmp.lt.s32.totalorder %v1324_v41, 2  ;;  %vm1345_vm8 = vcmp.lt.s32.totalorder %v1324_v41, 3  ;;  %v1352_v54 = vsel %vm1346_vm6, %v1339_v46, 920167782  ;;  %v1355_v63 = vsel %vm1343_vm5, %v1333_v31, %v1336_v8 }
 0x207   : > { %v4183_v0 = vadd.s32 4294967294, %v2731_v62  ;;  %v1347_v21 = vsel %vm1343_vm5, %v1327_v7, %v1330_v4  ;;  %v1353_v57 = vsel %vm1345_vm8, %v1336_v8, %v1352_v54  ;;  %v1356_v42 = vsel %vm1346_vm6, %v1342_v38, 1326507024 }
 0x208   : > { %v1349_v52 = vsel %vm1345_vm8, %v1333_v31, %v1348_v40  ;;  %v1354_v50 = vsel %vm1344_vm7, %v1351_v25, %v1353_v57  ;;  %v1357_v44 = vsel %vm1345_vm8, %v1339_v46, %v1356_v42  ;;  %v4193_v17 = vadd.s32 4294967169, %v2979_v6 }
 0x209   : > { %vm4184_vm9 = vcmp.lt.s32.totalorder %v4183_v0, 0  ;;  %v1358_v43 = vsel %vm1344_vm7, %v1355_v63, %v1357_v44  ;;  %v5793_v51 = vmul.u32.u64.low %v1359_v28, %v1354_v50  ;;  %v5794_v30 = vmul.u32.u64.high %v1359_v28, %v1354_v50, %v5793_v51 }
 0x20a   : > { %v2734_v33 = vsel %vm4184_vm9, 0, %v4183_v0  ;;  %v2750_v47 = vsel %vm2665_vm4, %v2749_v32, %v2725_v29  ;;  %v5799_v49 = vmul.u32.u64.low %v1359_v28, %v1358_v43  ;;  %v5800_v60 = vmul.u32.u64.high %v1359_v28, %v1358_v43, %v5799_v49 }
 0x20b   : > { %v2735_v14 = vsub.s32 32, %v2734_v33  ;;  %v2739_v35 = vsub.s32 4294967266, %v2734_v33  ;;  %v1350_v2 = vsel %vm1344_vm7, %v1347_v21, %v1349_v52  ;;  %v2985_v12 = vadd.s32 1, %v4193_v17 }
 0x20c   : > { %v1093_v23 = vand.u32 3, %v5758_v39  ;;  %vm5806_vm10 = vcmp.le.f32.partialorder %v2663_v53, 0.7853982  ;;  %v2736_v3 = vshll.u32 %v5774_v16, %v2734_v33  ;;  %v1369_v1 = vadd.s32 1, %v5794_v30  ;;  %v454_v33 = vpop.f32.mrf.mxu0 }
 0x20d   : > { %v2737_v29 = vshrl.u32 %v5768_v37, %v2735_v14  ;;  %v2740_v58 = vadd.s32 127, %v2739_v35  ;;  %vm2986_vm12 = vcmp.gt.s32.totalorder %v2985_v12, 0  ;;  %v2752_v41 = vsel %vm5806_vm10, 0, %v2750_v47 }
 0x20e   : > { %v1366_v4 = vmul.u32 %v1359_v28, %v1350_v2  ;;  %vm1368_vm11 = vc.u32 %v5800_v60, %v5793_v51  ;;  %v2987_v39 = vsel %vm2986_vm12, %v2985_v12, 0  ;;  %v2982_v16 = vand.u32 8388607, %v2975_v55 }
 0x20f   : > { %v2738_v53 = vor.u32 %v2737_v29, %v2736_v3  ;;  %v2741_v18 = vshll.u32 %v2740_v58, 23  ;;  %v1370_v45 = vsel %vm1368_vm11, %v1369_v1, %v5794_v30  ;;  %vm1091_vm13 = vweird.f32 %v5548_v36 }
 0x210   : > { %v1371_v37 = vadd.s32 %v1370_v45, %v1366_v4  ;;  %v2989_v56 = vand.u32 31, %v2987_v39  ;;  %vm1094_vm14 = vcmp.lt.s32.totalorder %v1093_v23, 2  ;;  %vm1095_vm15 = vcmp.eq.s32.totalorder %v1093_v23, 0 }
 0x211   : > { %v4552_v31 = vpop.eup %4551  ;;  %vm1098_vm0 = vcmp.eq.s32.totalorder %v1093_v23, 2  ;;  %v2742_v8 = vor.u32 4788187, %v2741_v18  ;;  %v5821_v46 = vadd.s32 3, %v2752_v41  ;;  %v2745_v7 = vcvt.s32.f32 %v2738_v53 }
 0x212   : > { %v4554_v48 = vpop.eup %4553  ;;  %v1099_v26 = vxor.u32 2147483648, %v4552_v31  ;;  %v1372_v28 = vadd.s32 536870912, %v1371_v37  ;;  %v2990_v6 = vsub.s32 32, %v2989_v56  ;;  %v2983_v38 = vor.u32 8388608, %v2982_v16 }
 0x213   : > { %v1096_v27 = vxor.u32 2147483648, %v4554_v48  ;;  %v2743_v10 = vand.u32 2147483647, %v2742_v8  ;;  %v2992_v40 = vshll.u32 %v4722_v5, %v2989_v56  ;;  %v2988_v52 = vshrl.u32 %v2987_v39, 5 }
 0x214   : > { %v1100_v32 = vsel %vm1098_vm0, %v1099_v26, %v4554_v48  ;;  %v1373_v62 = vshrl.u32 %v1372_v28, 30  ;;  %v2993_v25 = vshrl.u32 %v4723_v9, %v2990_v6  ;;  %v2996_v0 = vshrl.u32 %v4724_v11, %v2990_v6 }
 0x215   : > { %v1097_v54 = vsel %vm1095_vm15, %v4552_v31, %v1096_v27  ;;  %v2746_v63 = vmul.f32 %v2745_v7, %v2743_v10  ;;  %v2999_v21 = vshrl.u32 %v4725_v13, %v2990_v6  ;;  %v2995_v50 = vshll.u32 %v4723_v9, %v2989_v56  ;;  %v534_v7 = vpop.f32.mrf.mxu1 }
 0x216   : > { %v1101_v57 = vsel %vm1094_vm14, %v1097_v54, %v1100_v32  ;;  %v1374_v42 = vshll.u32 %v1373_v62, 30  ;;  %vm1313_vm1 = vcmp.lt.s32.totalorder %v5683_v34, 0  ;;  %v2994_v43 = vor.u32 %v2993_v25, %v2992_v40 }
 0x217   : > { %v1102_v44 = vsel %vm1091_vm13, nan, %v1101_v57  ;;  %v2747_v17 = vxor.u32 2147483648, %v2746_v63  ;;  %v2998_v30 = vshll.u32 %v4724_v11, %v2989_v56  ;;  %v2997_v49 = vor.u32 %v2996_v0, %v2995_v50 }
 0x218   : > { %3915 = vst [vmem:[%s5188_s10 + $0x20] sm:$0xff] %v1102_v44  ;;  %v5835_v47 = vsub.s32 %v1371_v37, %v1374_v42  ;;  %v3001_v14 = vshll.u32 %v4725_v13, %v2989_v56  ;;  %v3002_v35 = vshrl.u32 %v4726_v15, %v2990_v6  ;;  %v3004_v12 = vshll.u32 %v4726_v15, %v2989_v56 }
 0x219   : > { %v2748_v2 = vsel %vm2665_vm4, %v2747_v17, %v2746_v63  ;;  %v3000_v36 = vor.u32 %v2999_v21, %v2998_v30  ;;  %v3005_v23 = vshrl.u32 %v4727_v22, %v2990_v6  ;;  %v5848_v1 = vadd.f32 %v5680_v59, %v454_v33 }
 0x21a   : > { %v2751_v3 = vsel %vm5806_vm10, %v5620_v20, %v2748_v2  ;;  %v1377_v29 = vsub.s32 0, %v5835_v47  ;;  %v3003_v58 = vor.u32 %v3002_v35, %v3001_v14  ;;  %v2991_v41 = vshrl.u32 %v4722_v5, %v2990_v6 }
 0x21b   : > { %4555 = vcosq.f32 %v2751_v3  ;;  %v3006_v4 = vor.u32 %v3005_v23, %v3004_v12  ;;  %vm3007_vm2 = vcmp.lt.s32.totalorder %v2988_v52, 1  ;;  %v1397_v53 = vsub.s32 4, %v1373_v62 }
 0x21c   : > { %4557 = vsinq.f32 %v2751_v3  ;;  %v4130_v39 = vmin.u32 %v1377_v29, %v5835_v47  ;;  %vm3010_vm3 = vcmp.lt.s32.totalorder %v2988_v52, 4  ;;  %v3015_v45 = vsel %vm3007_vm2, %v2994_v43, %v2997_v49 }
 0x21d   : > { %v3012_v18 = vsel %vm3010_vm3, %v3000_v36, 2102212464  ;;  %v3016_v61 = vsel %vm3010_vm3, %v3003_v58, 920167782  ;;  %v3023_v16 = vshll.u32 %v2983_v38, 8  ;;  %vm3009_vm4 = vcmp.lt.s32.totalorder %v2988_v52, 3 }
 0x21e   : > { %v1379_v37 = vclz %v4130_v39  ;;  %v3011_v56 = vsel %vm3007_vm2, %v2991_v41, %v2994_v43  ;;  %v3019_v31 = vsel %vm3007_vm2, %v2997_v49, %v3000_v36  ;;  %vm3008_vm5 = vcmp.lt.s32.totalorder %v2988_v52, 2 }
 0x21f   : > { %v3013_v8 = vsel %vm3009_vm4, %v2997_v49, %v3012_v18  ;;  %v3017_v48 = vsel %vm3009_vm4, %v3000_v36, %v3016_v61  ;;  %v3020_v26 = vsel %vm3010_vm3, %v3006_v4, 1326507024  ;;  %v1398_v6 = vsel %vm1313_vm1, %v1397_v53, %v1373_v62 }
 0x220   : > { %v4131_v28 = vadd.s32 4294967294, %v1379_v37  ;;  %v3018_v27 = vsel %vm3008_vm5, %v3015_v45, %v3017_v48  ;;  %v3021_v10 = vsel %vm3009_vm4, %v3003_v58, %v3020_v26  ;;  %v3014_v32 = vsel %vm3008_vm5, %v3011_v56, %v3013_v8 }
 0x221   : > { %v3022_v40 = vsel %vm3008_vm5, %v3019_v31, %v3021_v10  ;;  %v5854_v25 = vmul.u32.u64.low %v3023_v16, %v3018_v27  ;;  %v5855_v54 = vmul.u32.u64.high %v3023_v16, %v3018_v27, %v5854_v25  ;;  %v1210_v0 = vand.u32 2139095040, %v5848_v1 }
 0x222   : > { %vm4132_vm6 = vcmp.lt.s32.totalorder %v4131_v28, 0  ;;  %v5858_v38 = vmul.u32.u64.low %v3023_v16, %v3022_v40  ;;  %v5859_v63 = vmul.u32.u64.high %v3023_v16, %v3022_v40, %v5858_v38  ;;  %v2757_v21 = vand.u32 3, %v5821_v46 }
 0x223   : > { %vm5865_vm7 = vcmp.le.f32.partialorder %v1311_v19, 0.7853982  ;;  %v1382_v57 = vsel %vm4132_vm6, 0, %v4131_v28  ;;  %v5870_v42 = vadd.f32 %v5680_v59, %v534_v7  ;;  %v1367_v52 = vadd.s32 %v5793_v51, %v5800_v60 }
 0x224   : > { %v1383_v50 = vsub.s32 32, %v1382_v57  ;;  %v1387_v44 = vsub.s32 4294967266, %v1382_v57  ;;  %v1211_v17 = vshrl.u32 %v1210_v0, 23  ;;  %v1400_v43 = vsel %vm5865_vm7, 0, %v1398_v6 }
 0x225   : > { %v3030_v46 = vmul.u32 %v3023_v16, %v3014_v32  ;;  %v3033_v30 = vadd.s32 1, %v5855_v54  ;;  %v1207_v19 = vand.u32 2147483647, %v5848_v1  ;;  %v1384_v33 = vshll.u32 %v5835_v47, %v1382_v57 }
 0x226   : > { %v1385_v49 = vshrl.u32 %v1367_v52, %v1383_v50  ;;  %v1388_v14 = vadd.s32 127, %v1387_v44  ;;  %vm3032_vm8 = vc.u32 %v5859_v63, %v5854_v25  ;;  %vm2758_vm9 = vcmp.lt.s32.totalorder %v2757_v21, 2 }
 0x227   : > { %v3034_v51 = vsel %vm3032_vm8, %v3033_v30, %v5855_v54  ;;  %v4125_v60 = vadd.s32 4294967169, %v1211_v17  ;;  %v2874_v35 = vand.u32 2139095040, %v5870_v42  ;;  %vm2759_vm10 = vcmp.eq.s32.totalorder %v2757_v21, 0 }
 0x228   : > { %v4556_v2 = vpop.eup %4555  ;;  %v1386_v36 = vor.u32 %v1385_v49, %v1384_v33  ;;  %v1389_v12 = vshll.u32 %v1388_v14, 23  ;;  %v3035_v23 = vadd.s32 %v3034_v51, %v3030_v46  ;;  %vm2762_vm12 = vcmp.eq.s32.totalorder %v2757_v21, 2 }
 0x229   : > { %v4558_v3 = vpop.eup %4557  ;;  %v2763_v29 = vxor.u32 2147483648, %v4556_v2  ;;  %v1404_v47 = vadd.s32 3, %v1400_v43  ;;  %v1217_v58 = vadd.s32 1, %v4125_v60  ;;  %v1214_v53 = vand.u32 8388607, %v1207_v19 }
 0x22a   : > { %v2760_v41 = vxor.u32 2147483648, %v4558_v3  ;;  %v1390_v4 = vor.u32 4788187, %v1389_v12  ;;  %v3036_v39 = vadd.s32 536870912, %v3035_v23  ;;  %v1393_v45 = vcvt.s32.f32 %v1386_v36 }
 0x22b   : > { %v2764_v18 = vsel %vm2762_vm12, %v2763_v29, %v4558_v3  ;;  %vm1218_vm11 = vcmp.gt.s32.totalorder %v1217_v58, 0  ;;  %v2875_v61 = vshrl.u32 %v2874_v35, 23  ;;  %vm2755_vm13 = vweird.f32 %v5620_v20 }
 0x22c   : > { %v2761_v16 = vsel %vm2759_vm10, %v4556_v2, %v2760_v41  ;;  %v1391_v37 = vand.u32 2147483647, %v1390_v4  ;;  %v3037_v56 = vshrl.u32 %v3036_v39, 30  ;;  %v1219_v31 = vsel %vm1218_vm11, %v1217_v58, 0 }
 0x22d   : > { %v2765_v8 = vsel %vm2758_vm9, %v2761_v16, %v2764_v18  ;;  %v1221_v48 = vand.u32 31, %v1219_v31  ;;  %v5888_v6 = vand.u32 3, %v1404_v47  ;;  %vm2977_vm14 = vcmp.lt.s32.totalorder %v5740_v24, 0 }
 0x22e   : > { %v2766_v26 = vsel %vm2755_vm13, nan, %v2765_v8  ;;  %v1394_v28 = vmul.f32 %v1393_v45, %v1391_v37  ;;  %v3038_v27 = vshll.u32 %v3037_v56, 30  ;;  %v1215_v10 = vor.u32 8388608, %v1214_v53 }
 0x22f   : > { %3931 = vst [vmem:[%s5188_s10 + $0xa0] sm:$0xff] %v2766_v26  ;;  %v1222_v7 = vsub.s32 32, %v1221_v48  ;;  %v2871_v32 = vand.u32 2147483647, %v5870_v42  ;;  %v4189_v40 = vadd.s32 4294967169, %v2875_v61  ;;  %v3061_v20 = vsub.s32 4, %v3037_v56 }
 0x230   : > { %v1395_v54 = vxor.u32 2147483648, %v1394_v28  ;;  %v5893_v38 = vsub.s32 %v3035_v23, %v3038_v27  ;;  %v1220_v0 = vshrl.u32 %v1219_v31, 5  ;;  %v1224_v21 = vshll.u32 %v4722_v5, %v1221_v48 }
 0x231   : > { %v1225_v57 = vshrl.u32 %v4723_v9, %v1222_v7  ;;  %v1227_v52 = vshll.u32 %v4723_v9, %v1221_v48  ;;  %v1228_v50 = vshrl.u32 %v4724_v11, %v1222_v7  ;;  %vm5903_vm15 = vcmp.le.f32.partialorder %v2975_v55, 0.7853982 }
 0x232   : > { %v1396_v44 = vsel %vm1313_vm1, %v1395_v54, %v1394_v28  ;;  %v3041_v43 = vsub.s32 0, %v5893_v38  ;;  %v1230_v46 = vshll.u32 %v4724_v11, %v1221_v48  ;;  %v1231_v30 = vshrl.u32 %v4725_v13, %v1222_v7 }
 0x233   : > { %v1399_v33 = vsel %vm5865_vm7, %v5683_v34, %v1396_v44  ;;  %v1226_v49 = vor.u32 %v1225_v57, %v1224_v21  ;;  %v1233_v14 = vshll.u32 %v4725_v13, %v1221_v48  ;;  %v1234_v51 = vshrl.u32 %v4726_v15, %v1222_v7 }
 0x234   : > { %4559 = vcosq.f32 %v1399_v33  ;;  %v4194_v55 = vmin.u32 %v3041_v43, %v5893_v38  ;;  %v1229_v60 = vor.u32 %v1228_v50, %v1227_v52  ;;  %v1232_v35 = vor.u32 %v1231_v30, %v1230_v46 }
 0x235   : > { %4561 = vsinq.f32 %v1399_v33  ;;  %v1235_v2 = vor.u32 %v1234_v51, %v1233_v14  ;;  %v1236_v36 = vshll.u32 %v4726_v15, %v1221_v48  ;;  %v1237_v12 = vshrl.u32 %v4727_v22, %v1222_v7 }
 0x236   : > { %v3031_v62 = vadd.s32 %v5854_v25, %v5859_v63  ;;  %v3043_v23 = vclz %v4194_v55  ;;  %v1255_v3 = vshll.u32 %v1215_v10, 8  ;;  %v2881_v29 = vadd.s32 1, %v4189_v40 }
 0x237   : > { %v3062_v47 = vsel %vm2977_vm14, %v3061_v20, %v3037_v56  ;;  %v1223_v58 = vshrl.u32 %v4722_v5, %v1222_v7  ;;  %v1238_v41 = vor.u32 %v1237_v12, %v1236_v36  ;;  %vm1239_vm0 = vcmp.lt.s32.totalorder %v1220_v0, 1 }
 0x238   : > { %v4195_v4 = vadd.s32 4294967294, %v3043_v23  ;;  %vm1241_vm1 = vcmp.lt.s32.totalorder %v1220_v0, 3  ;;  %vm1242_vm2 = vcmp.lt.s32.totalorder %v1220_v0, 4  ;;  %v1247_v39 = vsel %vm1239_vm0, %v1226_v49, %v1229_v60 }
 0x239   : > { %v1244_v53 = vsel %vm1242_vm2, %v1232_v35, 2102212464  ;;  %v1248_v18 = vsel %vm1242_vm2, %v1235_v2, 920167782  ;;  %v1251_v45 = vsel %vm1239_vm0, %v1229_v60, %v1232_v35  ;;  %v1252_v25 = vsel %vm1242_vm2, %v1238_v41, 1326507024 }
 0x23a   : > { %vm4196_vm3 = vcmp.lt.s32.totalorder %v4195_v4, 0  ;;  %vm1240_vm4 = vcmp.lt.s32.totalorder %v1220_v0, 2  ;;  %v1249_v63 = vsel %vm1241_vm1, %v1232_v35, %v1248_v18  ;;  %v1253_v61 = vsel %vm1241_vm1, %v1235_v2, %v1252_v25 }
 0x23b   : > { %v3046_v16 = vsel %vm4196_vm3, 0, %v4195_v4  ;;  %v3064_v37 = vsel %vm5903_vm15, 0, %v3062_v47  ;;  %v1250_v56 = vsel %vm1240_vm4, %v1247_v39, %v1249_v63  ;;  %v1254_v31 = vsel %vm1240_vm4, %v1251_v45, %v1253_v61 }
 0x23c   : > { %v3047_v8 = vsub.s32 32, %v3046_v16  ;;  %v3051_v48 = vsub.s32 4294967266, %v3046_v16  ;;  %v1243_v26 = vsel %vm1239_vm0, %v1223_v58, %v1226_v49  ;;  %v1245_v28 = vsel %vm1241_vm1, %v1229_v60, %v1244_v53 }
 0x23d   : > { %v5933_v27 = vmul.u32.u64.low %v1255_v3, %v1254_v31  ;;  %v5934_v10 = vmul.u32.u64.high %v1255_v3, %v1254_v31, %v5933_v27  ;;  %v5936_v7 = vmul.u32.u64.low %v1255_v3, %v1250_v56  ;;  %v5937_v40 = vmul.u32.u64.high %v1255_v3, %v1250_v56, %v5936_v7  ;;  %v4284_v31 = vpop.f32.mrf.mxu0 }
 0x23e   : > { %vm1403_vm5 = vweird.f32 %v5683_v34  ;;  %v3048_v54 = vshll.u32 %v5893_v38, %v3046_v16  ;;  %v3049_v20 = vshrl.u32 %v3031_v62, %v3047_v8  ;;  %v3052_v21 = vadd.s32 127, %v3051_v48 }
 0x23f   : > { %vm2882_vm6 = vcmp.gt.s32.totalorder %v2881_v29, 0  ;;  %v3068_v57 = vadd.s32 3, %v3064_v37  ;;  %v1246_v52 = vsel %vm1240_vm4, %v1243_v26, %v1245_v28  ;;  %v2878_v50 = vand.u32 8388607, %v2871_v32 }
 0x240   : > { %v2883_v44 = vsel %vm2882_vm6, %v2881_v29, 0  ;;  %vm1406_vm7 = vcmp.lt.s32.totalorder %v5888_v6, 2  ;;  %v3050_v43 = vor.u32 %v3049_v20, %v3048_v54  ;;  %v3053_v46 = vshll.u32 %v3052_v21, 23 }
 0x241   : > { %v2885_v30 = vand.u32 31, %v2883_v44  ;;  %v4560_v33 = vpop.eup %4559  ;;  %vm1407_vm8 = vcmp.eq.s32.totalorder %v5888_v6, 0  ;;  %vm1410_vm9 = vcmp.eq.s32.totalorder %v5888_v6, 2  ;;  %vm1264_vm10 = vc.u32 %v5934_v10, %v5936_v7 }
 0x242   : > { %v1265_v38 = vadd.s32 1, %v5937_v40  ;;  %v4562_v0 = vpop.eup %4561  ;;  %v1411_v49 = vxor.u32 2147483648, %v4560_v33  ;;  %v3054_v14 = vor.u32 4788187, %v3053_v46  ;;  %v1262_v51 = vmul.u32 %v1255_v3, %v1246_v52 }
 0x243   : > { %v2886_v55 = vsub.s32 32, %v2885_v30  ;;  %v1408_v60 = vxor.u32 2147483648, %v4562_v0  ;;  %v5951_v35 = vand.u32 3, %v3068_v57  ;;  %v2879_v36 = vor.u32 8388608, %v2878_v50 }
 0x244   : > { %v1266_v2 = vsel %vm1264_vm10, %v1265_v38, %v5937_v40  ;;  %v1412_v12 = vsel %vm1410_vm9, %v1411_v49, %v4562_v0  ;;  %v3055_v62 = vand.u32 2147483647, %v3054_v14  ;;  %v3057_v23 = vcvt.s32.f32 %v3050_v43 }
 0x245   : > { %v1267_v29 = vadd.s32 %v1266_v2, %v1262_v51  ;;  %v1409_v47 = vsel %vm1407_vm8, %v4560_v33, %v1408_v60  ;;  %v2884_v58 = vshrl.u32 %v2883_v44, 5  ;;  %v2889_v41 = vshrl.u32 %v4723_v9, %v2886_v55  ;;  %v4308_v2 = vpop.f32.mrf.mxu1 }
 0x246   : > { %v2892_v3 = vshrl.u32 %v4724_v11, %v2886_v55  ;;  %v1413_v4 = vsel %vm1406_vm7, %v1409_v47, %v1412_v12  ;;  %v3058_v39 = vmul.f32 %v3057_v23, %v3055_v62  ;;  %v2895_v18 = vshrl.u32 %v4725_v13, %v2886_v55 }
 0x247   : > { %v1268_v53 = vadd.s32 536870912, %v1267_v29  ;;  %v1414_v45 = vsel %vm1403_vm5, nan, %v1413_v4  ;;  %v2888_v25 = vshll.u32 %v4722_v5, %v2885_v30  ;;  %v2891_v63 = vshll.u32 %v4723_v9, %v2885_v30 }
 0x248   : > { %v2894_v61 = vshll.u32 %v4724_v11, %v2885_v30  ;;  %3918 = vst [vmem:[%s5188_s10 + $0x38] sm:$0xff] %v1414_v45  ;;  %v3059_v16 = vxor.u32 2147483648, %v3058_v39  ;;  %v2897_v56 = vshll.u32 %v4725_v13, %v2885_v30  ;;  %v2898_v6 = vshrl.u32 %v4726_v15, %v2886_v55 }
 0x249   : > { %v1269_v37 = vshrl.u32 %v1268_v53, 30  ;;  %v2890_v8 = vor.u32 %v2889_v41, %v2888_v25  ;;  %v2893_v48 = vor.u32 %v2892_v3, %v2891_v63  ;;  %v2900_v26 = vshll.u32 %v4726_v15, %v2885_v30 }
 0x24a   : > { %v2901_v34 = vshrl.u32 %v4727_v22, %v2886_v55  ;;  %v3060_v28 = vsel %vm2977_vm14, %v3059_v16, %v3058_v39  ;;  %v2896_v40 = vor.u32 %v2895_v18, %v2894_v61  ;;  %v2899_v54 = vor.u32 %v2898_v6, %v2897_v56 }
 0x24b   : > { %v1270_v27 = vshll.u32 %v1269_v37, 30  ;;  %v3063_v20 = vsel %vm5903_vm15, %v5740_v24, %v3060_v28  ;;  %v2919_v57 = vshll.u32 %v2879_v36, 8  ;;  %v5977_v52 = vadd.f32 %v5680_v59, %v4284_v31 }
 0x24c   : > { %v2902_v21 = vor.u32 %v2901_v34, %v2900_v26  ;;  %4563 = vcosq.f32 %v3063_v20  ;;  %v2887_v44 = vshrl.u32 %v4722_v5, %v2886_v55  ;;  %vm2903_vm12 = vcmp.lt.s32.totalorder %v2884_v58, 1 }
 0x24d   : > { %v5979_v50 = vsub.s32 %v1267_v29, %v1270_v27  ;;  %4565 = vsinq.f32 %v3063_v20  ;;  %vm2904_vm11 = vcmp.lt.s32.totalorder %v2884_v58, 2  ;;  %vm2906_vm13 = vcmp.lt.s32.totalorder %v2884_v58, 4 }
 0x24e   : > { %v2911_v43 = vsel %vm2903_vm12, %v2890_v8, %v2893_v48  ;;  %vm2905_vm14 = vcmp.lt.s32.totalorder %v2884_v58, 3  ;;  %v2908_v17 = vsel %vm2906_vm13, %v2896_v40, 2102212464  ;;  %v2912_v30 = vsel %vm2906_vm13, %v2899_v54, 920167782 }
 0x24f   : > { %v1273_v46 = vsub.s32 0, %v5979_v50  ;;  %v1293_v33 = vsub.s32 4, %v1269_v37  ;;  %v2913_v38 = vsel %vm2905_vm14, %v2896_v40, %v2912_v30  ;;  %v2915_v0 = vsel %vm2903_vm12, %v2893_v48, %v2896_v40 }
 0x250   : > { %v2916_v49 = vsel %vm2906_vm13, %v2902_v21, 1326507024  ;;  %v2907_v51 = vsel %vm2903_vm12, %v2887_v44, %v2890_v8  ;;  %v2914_v60 = vsel %vm2904_vm11, %v2911_v43, %v2913_v38  ;;  %v2909_v36 = vsel %vm2905_vm14, %v2893_v48, %v2908_v17 }
 0x251   : > { %v4126_v14 = vmin.u32 %v1273_v46, %v5979_v50  ;;  %v2917_v55 = vsel %vm2905_vm14, %v2899_v54, %v2916_v49  ;;  %v5986_v62 = vmul.u32.u64.low %v2919_v57, %v2914_v60  ;;  %v5987_v23 = vmul.u32.u64.high %v2919_v57, %v2914_v60, %v5986_v62  ;;  %v464_v60 = vpop.f32.mrf.mxu0 }
 0x252   : > { %v2918_v12 = vsel %vm2904_vm11, %v2915_v0, %v2917_v55  ;;  %vm1209_vm15 = vcmp.lt.s32.totalorder %v5848_v1, 0  ;;  %v5995_v3 = vadd.f32 %v5680_v59, %v4308_v2  ;;  %vm5999_vm0 = vcmp.le.f32.partialorder %v1207_v19, 0.7853982 }
 0x253   : > { %v1275_v29 = vclz %v4126_v14  ;;  %v5991_v47 = vmul.u32.u64.low %v2919_v57, %v2918_v12  ;;  %v5992_v41 = vmul.u32.u64.high %v2919_v57, %v2918_v12, %v5991_v47  ;;  %v2910_v53 = vsel %vm2904_vm11, %v2907_v51, %v2909_v36 }
 0x254   : > { %v1522_v18 = vand.u32 2139095040, %v5977_v52  ;;  %vm3070_vm1 = vcmp.lt.s32.totalorder %v5951_v35, 2  ;;  %vm3071_vm2 = vcmp.eq.s32.totalorder %v5951_v35, 0  ;;  %v1294_v45 = vsel %vm1209_vm15, %v1293_v33, %v1269_v37 }
 0x255   : > { %v4127_v39 = vadd.s32 4294967294, %v1275_v29  ;;  %v2929_v59 = vadd.s32 1, %v5987_v23  ;;  %v1519_v25 = vand.u32 2147483647, %v5977_v52  ;;  %vm3067_vm3 = vweird.f32 %v5740_v24 }
 0x256   : > { %vm3074_vm4 = vcmp.eq.s32.totalorder %v5951_v35, 2  ;;  %v1263_v19 = vadd.s32 %v5936_v7, %v5934_v10  ;;  %v1523_v58 = vshrl.u32 %v1522_v18, 23  ;;  %v2926_v61 = vmul.u32 %v2919_v57, %v2910_v53  ;;  %v6050_v53 = vld [vmem:[%s7328_s2] ss:$0 sm:$0xff] }
 0x257   : > { %vm4128_vm5 = vcmp.lt.s32.totalorder %v4127_v39, 0  ;;  %vm2928_vm6 = vc.u32 %v5992_v41, %v5986_v62  ;;  %v3186_v16 = vand.u32 2139095040, %v5995_v3  ;;  %v1296_v6 = vsel %vm5999_vm0, 0, %v1294_v45 }
 0x258   : > { %v1278_v63 = vsel %vm4128_vm5, 0, %v4127_v39  ;;  %v2930_v31 = vsel %vm2928_vm6, %v2929_v59, %v5987_v23  ;;  %v4137_v26 = vadd.s32 4294967169, %v1523_v58  ;;  %v1526_v10 = vand.u32 8388607, %v1519_v25 }
 0x259   : > { %v1279_v37 = vsub.s32 32, %v1278_v63  ;;  %v1283_v56 = vsub.s32 4294967266, %v1278_v63  ;;  %v4564_v8 = vpop.eup %4563  ;;  %v2931_v48 = vadd.s32 %v2930_v31, %v2926_v61  ;;  %v3183_v7 = vand.u32 2147483647, %v5995_v3 }
 0x25a   : > { %v4566_v34 = vpop.eup %4565  ;;  %v3075_v28 = vxor.u32 2147483648, %v4564_v8  ;;  %v1280_v27 = vshll.u32 %v5979_v50, %v1278_v63  ;;  %v1529_v57 = vadd.s32 1, %v4137_v26  ;;  %v3187_v44 = vshrl.u32 %v3186_v16, 23 }
 0x25b   : > { %v1281_v40 = vshrl.u32 %v1263_v19, %v1279_v37  ;;  %v1284_v54 = vadd.s32 127, %v1283_v56  ;;  %v3072_v20 = vxor.u32 2147483648, %v4566_v34  ;;  %v2932_v21 = vadd.s32 536870912, %v2931_v48 }
 0x25c   : > { %v3076_v43 = vsel %vm3074_vm4, %v3075_v28, %v4566_v34  ;;  %v1300_v30 = vadd.s32 3, %v1296_v6  ;;  %v1527_v0 = vor.u32 8388608, %v1526_v10  ;;  %vm1530_vm7 = vcmp.gt.s32.totalorder %v1529_v57, 0 }
 0x25d   : > { %v1282_v46 = vor.u32 %v1281_v40, %v1280_v27  ;;  %v1285_v17 = vshll.u32 %v1284_v54, 23  ;;  %v3073_v33 = vsel %vm3071_vm2, %v4564_v8, %v3072_v20  ;;  %v6029_v38 = vshrl.u32 %v2932_v21, 30 }
 0x25e   : > { %v3077_v50 = vsel %vm3070_vm1, %v3073_v33, %v3076_v43  ;;  %v1531_v14 = vsel %vm1530_vm7, %v1529_v57, 0  ;;  %v6035_v51 = vand.u32 8388607, %v3183_v7  ;;  %v4201_v36 = vadd.s32 4294967169, %v3187_v44 }
 0x25f   : > { %v1286_v49 = vor.u32 4788187, %v1285_v17  ;;  %v3078_v55 = vsel %vm3067_vm3, nan, %v3077_v50  ;;  %v2934_v2 = vshll.u32 %v6029_v38, 30  ;;  %v1289_v23 = vcvt.s32.f32 %v1282_v46 }
 0x260   : > { %3934 = vst [vmem:[%s5188_s10 + $0xb8] sm:$0xff] %v3078_v55  ;;  %v1533_v29 = vand.u32 31, %v1531_v14  ;;  %v6041_v47 = vand.u32 3, %v1300_v30  ;;  %v2927_v35 = vadd.s32 %v5986_v62, %v5992_v41  ;;  %v6053_v24 = vadd.f32 %v6050_v53, %v464_v60 }
 0x261   : > { %v1287_v12 = vand.u32 2147483647, %v1286_v49  ;;  %v6045_v39 = vsub.s32 %v2931_v48, %v2934_v2  ;;  %v6055_v59 = vshll.u32 %v1527_v0, 8  ;;  %v3191_v19 = vor.u32 8388608, %v6035_v51 }
 0x262   : > { %v1534_v45 = vsub.s32 32, %v1533_v29  ;;  %v1532_v63 = vshrl.u32 %v1531_v14, 5  ;;  %v1536_v62 = vshll.u32 %v4722_v5, %v1533_v29  ;;  %v3193_v41 = vadd.s32 1, %v4201_v36 }
 0x263   : > { %v1290_v18 = vmul.f32 %v1289_v23, %v1287_v12  ;;  %v2937_v58 = vsub.s32 0, %v6045_v39  ;;  %v1539_v37 = vshll.u32 %v4723_v9, %v1533_v29  ;;  %v1542_v31 = vshll.u32 %v4724_v11, %v1533_v29 }
 0x264   : > { %v1537_v16 = vshrl.u32 %v4723_v9, %v1534_v45  ;;  %v1540_v56 = vshrl.u32 %v4724_v11, %v1534_v45  ;;  %v1543_v8 = vshrl.u32 %v4725_v13, %v1534_v45  ;;  %v1545_v48 = vshll.u32 %v4725_v13, %v1533_v29 }
 0x265   : > { %v1291_v61 = vxor.u32 2147483648, %v1290_v18  ;;  %v4190_v6 = vmin.u32 %v2937_v58, %v6045_v39  ;;  %v1546_v28 = vshrl.u32 %v4726_v15, %v1534_v45  ;;  %v2957_v54 = vsub.s32 4, %v6029_v38 }
 0x266   : > { %v1538_v10 = vor.u32 %v1537_v16, %v1536_v62  ;;  %v1541_v34 = vor.u32 %v1540_v56, %v1539_v37  ;;  %vm3194_vm8 = vcmp.gt.s32.totalorder %v3193_v41, 0  ;;  %v1544_v20 = vor.u32 %v1543_v8, %v1542_v31 }
 0x267   : > { %v1292_v26 = vsel %vm1209_vm15, %v1291_v61, %v1290_v18  ;;  %v2939_v40 = vclz %v4190_v6  ;;  %v1547_v21 = vor.u32 %v1546_v28, %v1545_v48  ;;  %vm1551_vm9 = vcmp.lt.s32.totalorder %v1532_v63, 1 }
 0x268   : > { %v1295_v27 = vsel %vm5999_vm0, %v5848_v1, %v1292_v26  ;;  %vm2873_vm10 = vcmp.lt.s32.totalorder %v5870_v42, 0  ;;  %v1548_v44 = vshll.u32 %v4726_v15, %v1533_v29  ;;  %v1549_v43 = vshrl.u32 %v4727_v22, %v1534_v45 }
 0x269   : > { %4567 = vcosq.f32 %v1295_v27  ;;  %v4191_v57 = vadd.s32 4294967294, %v2939_v40  ;;  %v1535_v46 = vshrl.u32 %v4722_v5, %v1534_v45  ;;  %vm1553_vm12 = vcmp.lt.s32.totalorder %v1532_v63, 3 }
 0x26a   : > { %4569 = vsinq.f32 %v1295_v27  ;;  %vm1554_vm11 = vcmp.lt.s32.totalorder %v1532_v63, 4  ;;  %v1559_v4 = vsel %vm1551_vm9, %v1538_v10, %v1541_v34  ;;  %v1550_v17 = vor.u32 %v1549_v43, %v1548_v44 }
 0x26b   : > { %vm4192_vm13 = vcmp.lt.s32.totalorder %v4191_v57, 0  ;;  %v1556_v30 = vsel %vm1554_vm11, %v1544_v20, 2102212464  ;;  %v1560_v33 = vsel %vm1554_vm11, %v1547_v21, 920167782  ;;  %v1555_v50 = vsel %vm1551_vm9, %v1535_v46, %v1538_v10 }
 0x26c   : > { %v2942_v0 = vsel %vm4192_vm13, 0, %v4191_v57  ;;  %v1557_v49 = vsel %vm1553_vm12, %v1541_v34, %v1556_v30  ;;  %v1561_v14 = vsel %vm1553_vm12, %v1544_v20, %v1560_v33  ;;  %vm1552_vm14 = vcmp.lt.s32.totalorder %v1532_v63, 2 }
 0x26d   : > { %v2943_v60 = vsub.s32 32, %v2942_v0  ;;  %v2947_v55 = vsub.s32 4294967266, %v2942_v0  ;;  %v1563_v2 = vsel %vm1551_vm9, %v1541_v34, %v1544_v20  ;;  %v2944_v36 = vshll.u32 %v6045_v39, %v2942_v0 }
 0x26e   : > { %v1562_v12 = vsel %vm1552_vm14, %v1559_v4, %v1561_v14  ;;  %v1564_v23 = vsel %vm1554_vm11, %v1550_v17, 1326507024  ;;  %v3195_v29 = vsel %vm3194_vm8, %v3193_v41, 0  ;;  %v1558_v58 = vsel %vm1552_vm14, %v1555_v50, %v1557_v49 }
 0x26f   : > { %v2945_v18 = vshrl.u32 %v2927_v35, %v2943_v60  ;;  %v2948_v45 = vadd.s32 127, %v2947_v55  ;;  %v1565_v62 = vsel %vm1553_vm12, %v1547_v21, %v1564_v23  ;;  %vm1303_vm15 = vcmp.eq.s32.totalorder %v6041_v47, 0 }
 0x270   : > { %v1566_v61 = vsel %vm1552_vm14, %v1563_v2, %v1565_v62  ;;  %v6091_v16 = vmul.u32.u64.low %v6055_v59, %v1562_v12  ;;  %v6092_v37 = vmul.u32.u64.high %v6055_v59, %v1562_v12, %v6091_v16  ;;  %v3197_v56 = vand.u32 31, %v3195_v29 }
 0x271   : > { %vm1302_vm0 = vcmp.lt.s32.totalorder %v6041_v47, 2  ;;  %vm6098_vm1 = vcmp.le.f32.partialorder %v2871_v32, 0.7853982  ;;  %v2946_v35 = vor.u32 %v2945_v18, %v2944_v36  ;;  %v2949_v63 = vshll.u32 %v2948_v45, 23 }
 0x272   : > { %v6103_v41 = vmul.u32.u64.low %v6055_v59, %v1566_v61  ;;  %v6104_v6 = vmul.u32.u64.high %v6055_v59, %v1566_v61, %v6103_v41  ;;  %vm1299_vm2 = vweird.f32 %v5848_v1  ;;  %vm1306_vm3 = vcmp.eq.s32.totalorder %v6041_v47, 2 }
 0x273   : > { %v2958_v31 = vsel %vm2873_vm10, %v2957_v54, %v6029_v38  ;;  %v3198_v8 = vsub.s32 32, %v3197_v56  ;;  %v6113_v32 = vshll.u32 %v3191_v19, 8  ;;  %v2950_v48 = vor.u32 4788187, %v2949_v63 }
 0x274   : > { %v1574_v26 = vmul.u32 %v6055_v59, %v1558_v58  ;;  %v6116_v10 = vshrl.u32 %v3195_v29, 5  ;;  %v3200_v34 = vshll.u32 %v4722_v5, %v3197_v56  ;;  %v1577_v28 = vadd.s32 1, %v6092_v37 }
 0x275   : > { %v3201_v27 = vshrl.u32 %v4723_v9, %v3198_v8  ;;  %v3203_v40 = vshll.u32 %v4723_v9, %v3197_v56  ;;  %v3206_v38 = vshll.u32 %v4724_v11, %v3197_v56  ;;  %v2951_v20 = vand.u32 2147483647, %v2950_v48 }
 0x276   : > { %v4568_v54 = vpop.eup %4567  ;;  %v2953_v51 = vcvt.s32.f32 %v2946_v35  ;;  %vm1576_vm4 = vc.u32 %v6104_v6, %v6091_v16  ;;  %v3204_v59 = vshrl.u32 %v4724_v11, %v3198_v8  ;;  %v3207_v44 = vshrl.u32 %v4725_v13, %v3198_v8 }
 0x277   : > { %v4570_v19 = vpop.eup %4569  ;;  %v1307_v21 = vxor.u32 2147483648, %v4568_v54  ;;  %v1578_v57 = vsel %vm1576_vm4, %v1577_v28, %v6092_v37  ;;  %v3209_v43 = vshll.u32 %v4725_v13, %v3197_v56  ;;  %v3212_v30 = vshll.u32 %v4726_v15, %v3197_v56 }
 0x278   : > { %v1304_v46 = vxor.u32 2147483648, %v4570_v19  ;;  %v2954_v4 = vmul.f32 %v2953_v51, %v2951_v20  ;;  %v1579_v17 = vadd.s32 %v1578_v57, %v1574_v26  ;;  %v3202_v0 = vor.u32 %v3201_v27, %v3200_v34 }
 0x279   : > { %v1308_v33 = vsel %vm1306_vm3, %v1307_v21, %v4570_v19  ;;  %v3210_v50 = vshrl.u32 %v4726_v15, %v3198_v8  ;;  %v3213_v49 = vshrl.u32 %v4727_v22, %v3198_v8  ;;  %v3205_v2 = vor.u32 %v3204_v59, %v3203_v40 }
 0x27a   : > { %v1305_v14 = vsel %vm1303_vm15, %v4568_v54, %v1304_v46  ;;  %v2955_v60 = vxor.u32 2147483648, %v2954_v4  ;;  %v1580_v55 = vadd.s32 536870912, %v1579_v17  ;;  %v2960_v12 = vsel %vm6098_vm1, 0, %v2958_v31 }
 0x27b   : > { %v1309_v36 = vsel %vm1302_vm0, %v1305_v14, %v1308_v33  ;;  %v3208_v23 = vor.u32 %v3207_v44, %v3206_v38  ;;  %v3211_v29 = vor.u32 %v3210_v50, %v3209_v43  ;;  %v3214_v62 = vor.u32 %v3213_v49, %v3212_v30  ;;  %v544_v49 = vpop.f32.mrf.mxu1 }
 0x27c   : > { %v1310_v18 = vsel %vm1299_vm2, nan, %v1309_v36  ;;  %v2956_v45 = vsel %vm2873_vm10, %v2955_v60, %v2954_v4  ;;  %v1581_v58 = vshrl.u32 %v1580_v55, 30  ;;  %v3199_v47 = vshrl.u32 %v4722_v5, %v3198_v8 }
 0x27d   : > { %3917 = vst [vmem:[%s5188_s10 + $0x30] sm:$0xff] %v1310_v18  ;;  %v2959_v61 = vsel %vm6098_vm1, %v5870_v42, %v2956_v45  ;;  %vm3215_vm5 = vcmp.lt.s32.totalorder %v6116_v10, 1  ;;  %vm3217_vm6 = vcmp.lt.s32.totalorder %v6116_v10, 3  ;;  %vm3218_vm7 = vcmp.lt.s32.totalorder %v6116_v10, 4 }
 0x27e   : > { %4571 = vcosq.f32 %v2959_v61  ;;  %v1582_v37 = vshll.u32 %v1581_v58, 30  ;;  %v3223_v1 = vsel %vm3215_vm5, %v3202_v0, %v3205_v2  ;;  %v3220_v56 = vsel %vm3218_vm7, %v3208_v23, 2102212464 }
 0x27f   : > { %4573 = vsinq.f32 %v2959_v61  ;;  %v3224_v35 = vsel %vm3218_vm7, %v3211_v29, 920167782  ;;  %v3227_v39 = vsel %vm3215_vm5, %v3205_v2, %v3208_v23  ;;  %vm3216_vm8 = vcmp.lt.s32.totalorder %v6116_v10, 2 }
 0x280   : > { %v6156_v63 = vsub.s32 %v1579_v17, %v1582_v37  ;;  %v3225_v41 = vsel %vm3217_vm6, %v3208_v23, %v3224_v35  ;;  %v3228_v31 = vsel %vm3218_vm7, %v3214_v62, 1326507024  ;;  %v2964_v8 = vadd.s32 3, %v2960_v12 }
 0x281   : > { %v1605_v48 = vsub.s32 4, %v1581_v58  ;;  %v3226_v26 = vsel %vm3216_vm8, %v3223_v1, %v3225_v41  ;;  %v3229_v34 = vsel %vm3217_vm6, %v3211_v29, %v3228_v31  ;;  %v3219_v27 = vsel %vm3215_vm5, %v3199_v47, %v3202_v0 }
 0x282   : > { %v1585_v28 = vsub.s32 0, %v6156_v63  ;;  %v3221_v40 = vsel %vm3217_vm6, %v3205_v2, %v3220_v56  ;;  %v3230_v38 = vsel %vm3216_vm8, %v3227_v39, %v3229_v34  ;;  %vm1521_vm9 = vcmp.lt.s32.totalorder %v5977_v52, 0 }
 0x283   : > { %v6173_v54 = vmul.u32.u64.low %v6113_v32, %v3230_v38  ;;  %v6174_v20 = vmul.u32.u64.high %v6113_v32, %v3230_v38, %v6173_v54  ;;  %v6177_v51 = vmul.u32.u64.low %v6113_v32, %v3226_v26  ;;  %v6178_v59 = vmul.u32.u64.high %v6113_v32, %v3226_v26, %v6177_v51 }
 0x284   : > { %v4138_v19 = vmin.u32 %v1585_v28, %v6156_v63  ;;  %v2965_v21 = vand.u32 3, %v2964_v8  ;;  %v1606_v57 = vsel %vm1521_vm9, %v1605_v48, %v1581_v58  ;;  %v3222_v44 = vsel %vm3216_vm8, %v3219_v27, %v3221_v40 }
 0x285   : > { %v1418_v43 = vand.u32 2139095040, %v6053_v24  ;;  %vm6189_vm10 = vcmp.le.f32.partialorder %v1519_v25, 0.7853982  ;;  %vm3240_vm12 = vc.u32 %v6174_v20, %v6177_v51  ;;  %v3241_v17 = vadd.s32 1, %v6178_v59 }
 0x286   : > { %v1587_v46 = vclz %v4138_v19  ;;  %v1608_v0 = vsel %vm6189_vm10, 0, %v1606_v57  ;;  %v3238_v10 = vmul.u32 %v6113_v32, %v3222_v44  ;;  %v1415_v50 = vand.u32 2147483647, %v6053_v24 }
 0x287   : > { %v1419_v30 = vshrl.u32 %v1418_v43, 23  ;;  %vm2966_vm11 = vcmp.lt.s32.totalorder %v2965_v21, 2  ;;  %vm2967_vm13 = vcmp.eq.s32.totalorder %v2965_v21, 0  ;;  %v3242_v25 = vsel %vm3240_vm12, %v3241_v17, %v6178_v59 }
 0x288   : > { %v4139_v33 = vadd.s32 4294967294, %v1587_v46  ;;  %vm2970_vm14 = vcmp.eq.s32.totalorder %v2965_v21, 2  ;;  %v1575_v60 = vadd.s32 %v6091_v16, %v6104_v6  ;;  %v3243_v55 = vadd.s32 %v3242_v25, %v3238_v10 }
 0x289   : > { %v4133_v14 = vadd.s32 4294967169, %v1419_v30  ;;  %v1612_v12 = vadd.s32 3, %v1608_v0  ;;  %v6203_v32 = vadd.f32 %v6050_v53, %v544_v49  ;;  %v1422_v62 = vand.u32 8388607, %v1415_v50 }
 0x28a   : > { %vm4140_vm15 = vcmp.lt.s32.totalorder %v4139_v33, 0  ;;  %v3244_v16 = vadd.s32 536870912, %v3243_v55  ;;  %vm2963_vm1 = vweird.f32 %v5870_v42  ;;  %vm3185_vm2 = vcmp.lt.s32.totalorder %v5995_v3, 0 }
 0x28b   : > { %v4572_v2 = vpop.eup %4571  ;;  %v1590_v36 = vsel %vm4140_vm15, 0, %v4139_v33  ;;  %v1425_v23 = vadd.s32 1, %v4133_v14  ;;  %v3082_v31 = vand.u32 2139095040, %v6203_v32  ;;  %v6215_v40 = vand.u32 3, %v1612_v12 }
 0x28c   : > { %v4574_v29 = vpop.eup %4573  ;;  %v2971_v18 = vxor.u32 2147483648, %v4572_v2  ;;  %v1591_v45 = vsub.s32 32, %v1590_v36  ;;  %v1595_v58 = vsub.s32 4294967266, %v1590_v36  ;;  %v1592_v47 = vshll.u32 %v6156_v63, %v1590_v36 }
 0x28d   : > { %v2968_v61 = vxor.u32 2147483648, %v4574_v29  ;;  %vm1426_vm0 = vcmp.gt.s32.totalorder %v1425_v23, 0  ;;  %v3245_v39 = vshrl.u32 %v3244_v16, 30  ;;  %v3239_v38 = vadd.s32 %v6177_v51, %v6174_v20 }
 0x28e   : > { %v2972_v6 = vsel %vm2970_vm14, %v2971_v18, %v4574_v29  ;;  %v1593_v37 = vshrl.u32 %v1575_v60, %v1591_v45  ;;  %v1596_v1 = vadd.s32 127, %v1595_v58  ;;  %v1427_v56 = vsel %vm1426_vm0, %v1425_v23, 0 }
 0x28f   : > { %v2969_v35 = vsel %vm2967_vm13, %v4572_v2, %v2968_v61  ;;  %v1429_v41 = vand.u32 31, %v1427_v56  ;;  %v3246_v34 = vshll.u32 %v3245_v39, 30  ;;  %v1423_v54 = vor.u32 8388608, %v1422_v62 }
 0x290   : > { %v2973_v8 = vsel %vm2966_vm11, %v2969_v35, %v2972_v6  ;;  %v1594_v48 = vor.u32 %v1593_v37, %v1592_v47  ;;  %v1597_v63 = vshll.u32 %v1596_v1, 23  ;;  %v3269_v19 = vsub.s32 4, %v3245_v39 }
 0x291   : > { %v2974_v26 = vsel %vm2963_vm1, nan, %v2973_v8  ;;  %v1430_v28 = vsub.s32 32, %v1429_v41  ;;  %v6218_v59 = vsub.s32 %v3243_v55, %v3246_v34  ;;  %v3083_v21 = vshrl.u32 %v3082_v31, 23 }
 0x292   : > { %3933 = vst [vmem:[%s5188_s10 + $0xb0] sm:$0xff] %v2974_v26  ;;  %v1598_v27 = vor.u32 4788187, %v1597_v63  ;;  %v1601_v44 = vcvt.s32.f32 %v1594_v48  ;;  %v1432_v43 = vshll.u32 %v4722_v5, %v1429_v41  ;;  %v1435_v30 = vshll.u32 %v4723_v9, %v1429_v41 }
 0x293   : > { %v1433_v42 = vshrl.u32 %v4723_v9, %v1430_v28  ;;  %v1436_v46 = vshrl.u32 %v4724_v11, %v1430_v28  ;;  %v3249_v17 = vsub.s32 0, %v6218_v59  ;;  %v1438_v33 = vshll.u32 %v4724_v11, %v1429_v41 }
 0x294   : > { %v1599_v57 = vand.u32 2147483647, %v1598_v27  ;;  %v1439_v20 = vshrl.u32 %v4725_v13, %v1430_v28  ;;  %v1428_v0 = vshrl.u32 %v1427_v56, 5  ;;  %v1441_v10 = vshll.u32 %v4725_v13, %v1429_v41 }
 0x295   : > { %v1442_v49 = vshrl.u32 %v4726_v15, %v1430_v28  ;;  %v4202_v25 = vmin.u32 %v3249_v17, %v6218_v59  ;;  %v1434_v14 = vor.u32 %v1433_v42, %v1432_v43  ;;  %v1437_v60 = vor.u32 %v1436_v46, %v1435_v30 }
 0x296   : > { %v1602_v51 = vmul.f32 %v1601_v44, %v1599_v57  ;;  %v1440_v55 = vor.u32 %v1439_v20, %v1438_v33  ;;  %v1444_v12 = vshll.u32 %v4726_v15, %v1429_v41  ;;  %v1445_v23 = vshrl.u32 %v4727_v22, %v1430_v28 }
 0x297   : > { %v1443_v36 = vor.u32 %v1442_v49, %v1441_v10  ;;  %vm6234_vm3 = vcmp.le.f32.partialorder %v3183_v7, 0.7853982  ;;  %v3251_v18 = vclz %v4202_v25  ;;  %v3270_v45 = vsel %vm3185_vm2, %v3269_v19, %v3245_v39  ;;  %v4287_v49 = vpop.f32.mrf.mxu0 }
 0x298   : > { %v1603_v2 = vxor.u32 2147483648, %v1602_v51  ;;  %v1463_v58 = vshll.u32 %v1423_v54, 8  ;;  %v4197_v62 = vadd.s32 4294967169, %v3083_v21  ;;  %v1431_v47 = vshrl.u32 %v4722_v5, %v1430_v28 }
 0x299   : > { %v1446_v16 = vor.u32 %v1445_v23, %v1444_v12  ;;  %vm1447_vm4 = vcmp.lt.s32.totalorder %v1428_v0, 1  ;;  %v4203_v6 = vadd.s32 4294967294, %v3251_v18  ;;  %vm1449_vm5 = vcmp.lt.s32.totalorder %v1428_v0, 3 }
 0x29a   : > { %v1604_v61 = vsel %vm1521_vm9, %v1603_v2, %v1602_v51  ;;  %vm1450_vm6 = vcmp.lt.s32.totalorder %v1428_v0, 4  ;;  %v1455_v1 = vsel %vm1447_vm4, %v1434_v14, %v1437_v60  ;;  %vm1448_vm8 = vcmp.lt.s32.totalorder %v1428_v0, 2 }
 0x29b   : > { %v1607_v7 = vsel %vm6189_vm10, %v5977_v52, %v1604_v61  ;;  %v1452_v37 = vsel %vm1450_vm6, %v1440_v55, 2102212464  ;;  %v1456_v56 = vsel %vm1450_vm6, %v1443_v36, 920167782  ;;  %vm4204_vm7 = vcmp.lt.s32.totalorder %v4203_v6, 0 }
 0x29c   : > { %4575 = vcosq.f32 %v1607_v7  ;;  %v1457_v35 = vsel %vm1449_vm5, %v1440_v55, %v1456_v56  ;;  %v3254_v39 = vsel %vm4204_vm7, 0, %v4203_v6  ;;  %v1451_v41 = vsel %vm1447_vm4, %v1431_v47, %v1434_v14 }
 0x29d   : > { %4577 = vsinq.f32 %v1607_v7  ;;  %v1458_v4 = vsel %vm1448_vm8, %v1455_v1, %v1457_v35  ;;  %v1459_v31 = vsel %vm1447_vm4, %v1437_v60, %v1440_v55  ;;  %v3255_v8 = vsub.s32 32, %v3254_v39 }
 0x29e   : > { %v3259_v48 = vsub.s32 4294967266, %v3254_v39  ;;  %v1453_v63 = vsel %vm1449_vm5, %v1437_v60, %v1452_v37  ;;  %v1460_v26 = vsel %vm1450_vm6, %v1446_v16, 1326507024  ;;  %v3256_v34 = vshll.u32 %v6218_v59, %v3254_v39 }
 0x29f   : > { %v1461_v28 = vsel %vm1449_vm5, %v1443_v36, %v1460_v26  ;;  %v6257_v27 = vmul.u32.u64.low %v1463_v58, %v1458_v4  ;;  %v6258_v54 = vmul.u32.u64.high %v1463_v58, %v1458_v4, %v6257_v27  ;;  %v3257_v19 = vshrl.u32 %v3239_v38, %v3255_v8 }
 0x2a0   : > { %v3260_v42 = vadd.s32 127, %v3259_v48  ;;  %v1462_v21 = vsel %vm1448_vm8, %v1459_v31, %v1461_v28  ;;  %v3089_v57 = vadd.s32 1, %v4197_v62  ;;  %v3272_v44 = vsel %vm6234_vm3, 0, %v3270_v45 }
 0x2a1   : > { %v6264_v43 = vmul.u32.u64.low %v1463_v58, %v1462_v21  ;;  %v6265_v46 = vmul.u32.u64.high %v1463_v58, %v1462_v21, %v6264_v43  ;;  %v3079_v17 = vand.u32 2147483647, %v6203_v32  ;;  %v3258_v59 = vor.u32 %v3257_v19, %v3256_v34 }
 0x2a2   : > { %v3261_v30 = vshll.u32 %v3260_v42, 23  ;;  %v1454_v33 = vsel %vm1448_vm8, %v1451_v41, %v1453_v63  ;;  %vm3090_vm9 = vcmp.gt.s32.totalorder %v3089_v57, 0  ;;  %v1473_v20 = vadd.s32 1, %v6258_v54 }
 0x2a3   : > { %v3091_v38 = vsel %vm3090_vm9, %v3089_v57, 0  ;;  %vm1614_vm10 = vcmp.lt.s32.totalorder %v6215_v40, 2  ;;  %vm1615_vm12 = vcmp.eq.s32.totalorder %v6215_v40, 0  ;;  %vm1618_vm11 = vcmp.eq.s32.totalorder %v6215_v40, 2 }
 0x2a4   : > { %v3262_v51 = vor.u32 4788187, %v3261_v30  ;;  %v3093_v10 = vand.u32 31, %v3091_v38  ;;  %vm1611_vm13 = vweird.f32 %v5977_v52  ;;  %v3276_v25 = vadd.s32 3, %v3272_v44 }
 0x2a5   : > { %v1470_v14 = vmul.u32 %v1463_v58, %v1454_v33  ;;  %vm1472_vm14 = vc.u32 %v6265_v46, %v6257_v27  ;;  %v3086_v0 = vand.u32 8388607, %v3079_v17  ;;  %v3265_v55 = vcvt.s32.f32 %v3258_v59 }
 0x2a6   : > { %v3263_v60 = vand.u32 2147483647, %v3262_v51  ;;  %v1474_v2 = vsel %vm1472_vm14, %v1473_v20, %v6258_v54  ;;  %v3094_v36 = vsub.s32 32, %v3093_v10  ;;  %v6279_v23 = vshrl.u32 %v3091_v38, 5 }
 0x2a7   : > { %v1475_v12 = vadd.s32 %v1474_v2, %v1470_v14  ;;  %v3096_v18 = vshll.u32 %v4722_v5, %v3093_v10  ;;  %v6283_v45 = vadd.f32 %v6050_v53, %v4287_v49  ;;  %v3099_v47 = vshll.u32 %v4723_v9, %v3093_v10 }
 0x2a8   : > { %v3266_v62 = vmul.f32 %v3265_v55, %v3263_v60  ;;  %v3097_v61 = vshrl.u32 %v4723_v9, %v3094_v36  ;;  %v3100_v16 = vshrl.u32 %v4724_v11, %v3094_v36  ;;  %v3102_v1 = vshll.u32 %v4724_v11, %v3093_v10 }
 0x2a9   : > { %v4576_v58 = vpop.eup %4575  ;;  %v1476_v37 = vadd.s32 536870912, %v1475_v12  ;;  %v3103_v56 = vshrl.u32 %v4725_v13, %v3094_v36  ;;  %v3105_v41 = vshll.u32 %v4725_v13, %v3093_v10  ;;  %v3106_v4 = vshrl.u32 %v4726_v15, %v3094_v36 }
 0x2aa   : > { %v4578_v7 = vpop.eup %4577  ;;  %v1619_v6 = vxor.u32 2147483648, %v4576_v58  ;;  %v3267_v39 = vxor.u32 2147483648, %v3266_v62  ;;  %v3098_v48 = vor.u32 %v3097_v61, %v3096_v18  ;;  %v3101_v63 = vor.u32 %v3100_v16, %v3099_v47 }
 0x2ab   : > { %v1616_v35 = vxor.u32 2147483648, %v4578_v7  ;;  %v6294_v8 = vshrl.u32 %v1476_v37, 30  ;;  %v3108_v28 = vshll.u32 %v4726_v15, %v3093_v10  ;;  %v3109_v54 = vshrl.u32 %v4727_v22, %v3094_v36 }
 0x2ac   : > { %v1620_v31 = vsel %vm1618_vm11, %v1619_v6, %v4578_v7  ;;  %v3268_v34 = vsel %vm3185_vm2, %v3267_v39, %v3266_v62  ;;  %v3104_v57 = vor.u32 %v3103_v56, %v3102_v1  ;;  %v3107_v43 = vor.u32 %v3106_v4, %v3105_v41  ;;  %v4311_v7 = vpop.f32.mrf.mxu1 }
 0x2ad   : > { %v1617_v26 = vsel %vm1615_vm12, %v4576_v58, %v1616_v35  ;;  %v3271_v42 = vsel %vm6234_vm3, %v5995_v3, %v3268_v34  ;;  %v1478_v21 = vshll.u32 %v6294_v8, 30  ;;  %v3110_v59 = vor.u32 %v3109_v54, %v3108_v28 }
 0x2ae   : > { %v1621_v19 = vsel %vm1614_vm10, %v1617_v26, %v1620_v31  ;;  %4579 = vcosq.f32 %v3271_v42  ;;  %v6313_v33 = vand.u32 3, %v3276_v25  ;;  %v3087_v40 = vor.u32 8388608, %v3086_v0 }
 0x2af   : > { %v1622_v44 = vsel %vm1611_vm13, nan, %v1621_v19  ;;  %4581 = vsinq.f32 %v3271_v42  ;;  %v6311_v30 = vsub.s32 %v1475_v12, %v1478_v21  ;;  %vm3111_vm15 = vcmp.lt.s32.totalorder %v6279_v23, 1 }
 0x2b0   : > { %3920 = vst [vmem:[%s5188_s10 + $0x48] sm:$0xff] %v1622_v44  ;;  %v1730_v29 = vand.u32 2139095040, %v6283_v45  ;;  %vm3113_vm0 = vcmp.lt.s32.totalorder %v6279_v23, 3  ;;  %vm3114_vm1 = vcmp.lt.s32.totalorder %v6279_v23, 4  ;;  %v3119_v52 = vsel %vm3111_vm15, %v3098_v48, %v3101_v63 }
 0x2b1   : > { %v1481_v20 = vsub.s32 0, %v6311_v30  ;;  %v3095_v38 = vshrl.u32 %v4722_v5, %v3094_v36  ;;  %v3116_v51 = vsel %vm3114_vm1, %v3104_v57, 2102212464  ;;  %v3120_v10 = vsel %vm3114_vm1, %v3107_v43, 920167782 }
 0x2b2   : > { %v3124_v49 = vsel %vm3114_vm1, %v3110_v59, 1326507024  ;;  %vm3112_vm2 = vcmp.lt.s32.totalorder %v6279_v23, 2  ;;  %v3121_v14 = vsel %vm3113_vm0, %v3104_v57, %v3120_v10  ;;  %v3123_v0 = vsel %vm3111_vm15, %v3101_v63, %v3104_v57 }
 0x2b3   : > { %v4134_v25 = vmin.u32 %v1481_v20, %v6311_v30  ;;  %v3122_v60 = vsel %vm3112_vm2, %v3119_v52, %v3121_v14  ;;  %v3125_v55 = vsel %vm3113_vm0, %v3107_v43, %v3124_v49  ;;  %v3127_v2 = vshll.u32 %v3087_v40, 8 }
 0x2b4   : > { %v1731_v36 = vshrl.u32 %v1730_v29, 23  ;;  %v3115_v18 = vsel %vm3111_vm15, %v3095_v38, %v3098_v48  ;;  %v3117_v58 = vsel %vm3113_vm0, %v3101_v63, %v3116_v51  ;;  %v3126_v62 = vsel %vm3112_vm2, %v3123_v0, %v3125_v55 }
 0x2b5   : > { %v1483_v12 = vclz %v4134_v25  ;;  %v6339_v61 = vmul.u32.u64.low %v3127_v2, %v3122_v60  ;;  %v6340_v47 = vmul.u32.u64.high %v3127_v2, %v3122_v60, %v6339_v61  ;;  %v1501_v37 = vsub.s32 4, %v6294_v8 }
 0x2b6   : > { %v4145_v16 = vadd.s32 4294967169, %v1731_v36  ;;  %v6344_v1 = vmul.u32.u64.low %v3127_v2, %v3126_v62  ;;  %v6345_v56 = vmul.u32.u64.high %v3127_v2, %v3126_v62, %v6344_v1  ;;  %vm3275_vm3 = vweird.f32 %v5995_v3 }
 0x2b7   : > { %v4135_v6 = vadd.s32 4294967294, %v1483_v12  ;;  %vm3279_vm4 = vcmp.eq.s32.totalorder %v6313_v33, 0  ;;  %vm1417_vm5 = vcmp.lt.s32.totalorder %v6053_v24, 0  ;;  %v3118_v35 = vsel %vm3112_vm2, %v3115_v18, %v3117_v58 }
 0x2b8   : > { %v1737_v39 = vadd.s32 1, %v4145_v16  ;;  %vm3282_vm6 = vcmp.eq.s32.totalorder %v6313_v33, 2  ;;  %v1727_v41 = vand.u32 2147483647, %v6283_v45  ;;  %v6355_v4 = vadd.f32 %v6050_v53, %v4311_v7 }
 0x2b9   : > { %vm4136_vm7 = vcmp.lt.s32.totalorder %v4135_v6, 0  ;;  %v1471_v31 = vadd.s32 %v6257_v27, %v6265_v46  ;;  %v3137_v63 = vadd.s32 1, %v6340_v47  ;;  %v1502_v28 = vsel %vm1417_vm5, %v1501_v37, %v6294_v8 }
 0x2ba   : > { %v1486_v48 = vsel %vm4136_vm7, 0, %v4135_v6  ;;  %vm1738_vm8 = vcmp.gt.s32.totalorder %v1737_v39, 0  ;;  %v3134_v54 = vmul.u32 %v3127_v2, %v3118_v35  ;;  %vm3136_vm9 = vc.u32 %v6345_v56, %v6339_v61 }
 0x2bb   : > { %v4580_v26 = vpop.eup %4579  ;;  %v1487_v34 = vsub.s32 32, %v1486_v48  ;;  %v1491_v23 = vsub.s32 4294967266, %v1486_v48  ;;  %v1488_v21 = vshll.u32 %v6311_v30, %v1486_v48  ;;  %v1739_v27 = vsel %vm1738_vm8, %v1737_v39, 0 }
 0x2bc   : > { %v4582_v19 = vpop.eup %4581  ;;  %v3283_v42 = vxor.u32 2147483648, %v4580_v26  ;;  %v3138_v43 = vsel %vm3136_vm9, %v3137_v63, %v6340_v47  ;;  %v1734_v8 = vand.u32 8388607, %v1727_v41  ;;  %v1741_v29 = vand.u32 31, %v1739_v27 }
 0x2bd   : > { %v3280_v46 = vxor.u32 2147483648, %v4582_v19  ;;  %v1489_v57 = vshrl.u32 %v1471_v31, %v1487_v34  ;;  %v1492_v44 = vadd.s32 127, %v1491_v23  ;;  %v3139_v40 = vadd.s32 %v3138_v43, %v3134_v54 }
 0x2be   : > { %v3284_v59 = vsel %vm3282_vm6, %v3283_v42, %v4582_v19  ;;  %vm3278_vm10 = vcmp.lt.s32.totalorder %v6313_v33, 2  ;;  %vm6376_vm12 = vcmp.le.f32.partialorder %v1415_v50, 0.7853982  ;;  %v1742_v49 = vsub.s32 32, %v1741_v29 }
 0x2bf   : > { %v3281_v30 = vsel %vm3279_vm4, %v4580_v26, %v3280_v46  ;;  %v1490_v20 = vor.u32 %v1489_v57, %v1488_v21  ;;  %v1493_v52 = vshll.u32 %v1492_v44, 23  ;;  %v3140_v10 = vadd.s32 536870912, %v3139_v40 }
 0x2c0   : > { %v3285_v38 = vsel %vm3278_vm10, %v3281_v30, %v3284_v59  ;;  %v1504_v0 = vsel %vm6376_vm12, 0, %v1502_v28  ;;  %v1735_v60 = vor.u32 8388608, %v1734_v8  ;;  %v1745_v55 = vshrl.u32 %v4723_v9, %v1742_v49 }
 0x2c1   : > { %v3286_v25 = vsel %vm3275_vm3, nan, %v3285_v38  ;;  %v1494_v14 = vor.u32 4788187, %v1493_v52  ;;  %v6385_v33 = vshrl.u32 %v3140_v10, 30  ;;  %v3394_v50 = vand.u32 2139095040, %v6355_v4 }
 0x2c2   : > { %3936 = vst [vmem:[%s5188_s10 + $0xc8] sm:$0xff] %v3286_v25  ;;  %v1497_v36 = vcvt.s32.f32 %v1490_v20  ;;  %v1748_v12 = vshrl.u32 %v4724_v11, %v1742_v49  ;;  %v1751_v18 = vshrl.u32 %v4725_v13, %v1742_v49  ;;  %v1740_v58 = vshrl.u32 %v1739_v27, 5 }
 0x2c3   : > { %v1495_v2 = vand.u32 2147483647, %v1494_v14  ;;  %v3142_v3 = vshll.u32 %v6385_v33, 30  ;;  %v1744_v62 = vshll.u32 %v4722_v5, %v1741_v29  ;;  %v1750_v47 = vshll.u32 %v4724_v11, %v1741_v29 }
 0x2c4   : > { %v1747_v7 = vshll.u32 %v4723_v9, %v1741_v29  ;;  %v1753_v6 = vshll.u32 %v4725_v13, %v1741_v29  ;;  %v1754_v37 = vshrl.u32 %v4726_v15, %v1742_v49  ;;  %v1757_v31 = vshrl.u32 %v4727_v22, %v1742_v49 }
 0x2c5   : > { %v1498_v16 = vmul.f32 %v1497_v36, %v1495_v2  ;;  %v6397_v1 = vsub.s32 %v3139_v40, %v3142_v3  ;;  %v1746_v35 = vor.u32 %v1745_v55, %v1744_v62  ;;  %v1752_v39 = vor.u32 %v1751_v18, %v1750_v47 }
 0x2c6   : > { %v1749_v63 = vor.u32 %v1748_v12, %v1747_v7  ;;  %v1755_v26 = vor.u32 %v1754_v37, %v1753_v6  ;;  %v1756_v34 = vshll.u32 %v4726_v15, %v1741_v29  ;;  %v1508_v23 = vadd.s32 3, %v1504_v0 }
 0x2c7   : > { %v1499_v48 = vxor.u32 2147483648, %v1498_v16  ;;  %v3145_v28 = vsub.s32 0, %v6397_v1  ;;  %v1775_v54 = vshll.u32 %v1735_v60, 8  ;;  %v3395_v19 = vshrl.u32 %v3394_v50, 23 }
 0x2c8   : > { %v1743_v21 = vshrl.u32 %v4722_v5, %v1742_v49  ;;  %v1758_v27 = vor.u32 %v1757_v31, %v1756_v34  ;;  %vm1762_vm11 = vcmp.lt.s32.totalorder %v1740_v58, 4  ;;  %vm1759_vm13 = vcmp.lt.s32.totalorder %v1740_v58, 1 }
 0x2c9   : > { %v1500_v42 = vsel %vm1417_vm5, %v1499_v48, %v1498_v16  ;;  %v4198_v57 = vmin.u32 %v3145_v28, %v6397_v1  ;;  %v1764_v44 = vsel %vm1762_vm11, %v1752_v39, 2102212464  ;;  %vm1760_vm14 = vcmp.lt.s32.totalorder %v1740_v58, 2 }
 0x2ca   : > { %v1503_v46 = vsel %vm6376_vm12, %v6053_v24, %v1500_v42  ;;  %v1767_v43 = vsel %vm1759_vm13, %v1746_v35, %v1749_v63  ;;  %v1768_v59 = vsel %vm1762_vm11, %v1755_v26, 920167782  ;;  %vm1761_vm15 = vcmp.lt.s32.totalorder %v1740_v58, 3 }
 0x2cb   : > { %4583 = vcosq.f32 %v1503_v46  ;;  %v3147_v40 = vclz %v4198_v57  ;;  %v1771_v8 = vsel %vm1759_vm13, %v1749_v63, %v1752_v39  ;;  %v1763_v29 = vsel %vm1759_vm13, %v1743_v21, %v1746_v35 }
 0x2cc   : > { %4585 = vsinq.f32 %v1503_v46  ;;  %v1765_v30 = vsel %vm1761_vm15, %v1749_v63, %v1764_v44  ;;  %v1769_v20 = vsel %vm1761_vm15, %v1752_v39, %v1768_v59  ;;  %v1772_v52 = vsel %vm1762_vm11, %v1758_v27, 1326507024 }
 0x2cd   : > { %v4199_v38 = vadd.s32 4294967294, %v3147_v40  ;;  %v3165_v51 = vsub.s32 4, %v6385_v33  ;;  %v1770_v10 = vsel %vm1760_vm14, %v1767_v43, %v1769_v20  ;;  %v1773_v49 = vsel %vm1761_vm15, %v1755_v26, %v1772_v52 }
 0x2ce   : > { %v1774_v25 = vsel %vm1760_vm14, %v1771_v8, %v1773_v49  ;;  %v6415_v14 = vmul.u32.u64.low %v1775_v54, %v1770_v10  ;;  %v6416_v0 = vmul.u32.u64.high %v1775_v54, %v1770_v10, %v6415_v14  ;;  %v4209_v60 = vadd.s32 4294967169, %v3395_v19 }
 0x2cf   : > { %vm4200_vm0 = vcmp.lt.s32.totalorder %v4199_v38, 0  ;;  %v1766_v55 = vsel %vm1760_vm14, %v1763_v29, %v1765_v30  ;;  %v6420_v50 = vmul.u32.u64.low %v1775_v54, %v1774_v25  ;;  %v6421_v2 = vmul.u32.u64.high %v1775_v54, %v1774_v25, %v6420_v50 }
 0x2d0   : > { %v1509_v36 = vand.u32 3, %v1508_v23  ;;  %vm3081_vm1 = vcmp.lt.s32.totalorder %v6203_v32, 0  ;;  %v3150_v12 = vsel %vm4200_vm0, 0, %v4199_v38  ;;  %v3401_v18 = vadd.s32 1, %v4209_v60 }
 0x2d1   : > { %v3135_v3 = vadd.s32 %v6339_v61, %v6345_v56  ;;  %v3151_v62 = vsub.s32 32, %v3150_v12  ;;  %v3155_v47 = vsub.s32 4294967266, %v3150_v12  ;;  %v3391_v16 = vand.u32 2147483647, %v6355_v4 }
 0x2d2   : > { %v3166_v58 = vsel %vm3081_vm1, %v3165_v51, %v6385_v33  ;;  %v1782_v7 = vmul.u32 %v1775_v54, %v1766_v55  ;;  %v1785_v6 = vadd.s32 1, %v6416_v0  ;;  %vm3402_vm2 = vcmp.gt.s32.totalorder %v3401_v18, 0  ;;  %v474_v54 = vpop.f32.mrf.mxu0 }
 0x2d3   : > { %v3152_v37 = vshll.u32 %v6397_v1, %v3150_v12  ;;  %v3153_v35 = vshrl.u32 %v3135_v3, %v3151_v62  ;;  %v3156_v39 = vadd.s32 127, %v3155_v47  ;;  %vm1784_vm3 = vc.u32 %v6421_v2, %v6415_v14 }
 0x2d4   : > { %vm6436_vm4 = vcmp.le.f32.partialorder %v3079_v17, 0.7853982  ;;  %v1786_v56 = vsel %vm1784_vm3, %v1785_v6, %v6416_v0  ;;  %v3403_v33 = vsel %vm3402_vm2, %v3401_v18, 0  ;;  %vm1507_vm5 = vweird.f32 %v6053_v24 }
 0x2d5   : > { %v3154_v31 = vor.u32 %v3153_v35, %v3152_v37  ;;  %v3157_v48 = vshll.u32 %v3156_v39, 23  ;;  %v3168_v63 = vsel %vm6436_vm4, 0, %v3166_v58  ;;  %v1787_v1 = vadd.s32 %v1786_v56, %v1782_v7 }
 0x2d6   : > { %v3398_v26 = vand.u32 8388607, %v3391_v16  ;;  %v3405_v34 = vand.u32 31, %v3403_v33  ;;  %vm1510_vm6 = vcmp.lt.s32.totalorder %v1509_v36, 2  ;;  %vm1511_vm7 = vcmp.eq.s32.totalorder %v1509_v36, 0 }
 0x2d7   : > { %v3158_v17 = vor.u32 4788187, %v3157_v48  ;;  %v1788_v28 = vadd.s32 536870912, %v1787_v1  ;;  %vm1514_vm8 = vcmp.eq.s32.totalorder %v1509_v36, 2  ;;  %v6446_v21 = vadd.s32 3, %v3168_v63 }
 0x2d8   : > { %v4584_v23 = vpop.eup %4583  ;;  %v3406_v27 = vsub.s32 32, %v3405_v34  ;;  %v3161_v44 = vcvt.s32.f32 %v3154_v31  ;;  %v3399_v40 = vor.u32 8388608, %v3398_v26  ;;  %v6452_v29 = vadd.f32 %v6050_v53, %v474_v54 }
 0x2d9   : > { %v4586_v19 = vpop.eup %4585  ;;  %v1515_v42 = vxor.u32 2147483648, %v4584_v23  ;;  %v3159_v57 = vand.u32 2147483647, %v3158_v17  ;;  %v6448_v43 = vshrl.u32 %v1788_v28, 30  ;;  %v3408_v10 = vshll.u32 %v4722_v5, %v3405_v34 }
 0x2da   : > { %v1512_v46 = vxor.u32 2147483648, %v4586_v19  ;;  %v3409_v8 = vshrl.u32 %v4723_v9, %v3406_v27  ;;  %v3412_v38 = vshrl.u32 %v4724_v11, %v3406_v27  ;;  %v3411_v49 = vshll.u32 %v4723_v9, %v3405_v34 }
 0x2db   : > { %v1516_v59 = vsel %vm1514_vm8, %v1515_v42, %v4586_v19  ;;  %v3162_v20 = vmul.f32 %v3161_v44, %v3159_v57  ;;  %v1790_v52 = vshll.u32 %v6448_v43, 30  ;;  %v3415_v25 = vshrl.u32 %v4725_v13, %v3406_v27 }
 0x2dc   : > { %v1513_v30 = vsel %vm1511_vm7, %v4584_v23, %v1512_v46  ;;  %v3414_v55 = vshll.u32 %v4724_v11, %v3405_v34  ;;  %v3404_v50 = vshrl.u32 %v3403_v33, 5  ;;  %v3410_v12 = vor.u32 %v3409_v8, %v3408_v10  ;;  %v554_v10 = vpop.f32.mrf.mxu1 }
 0x2dd   : > { %v1517_v51 = vsel %vm1510_vm6, %v1513_v30, %v1516_v59  ;;  %v3163_v53 = vxor.u32 2147483648, %v3162_v20  ;;  %v6463_v60 = vsub.s32 %v1787_v1, %v1790_v52  ;;  %v3417_v36 = vshll.u32 %v4725_v13, %v3405_v34 }
 0x2de   : > { %v1518_v0 = vsel %vm1507_vm5, nan, %v1517_v51  ;;  %v3418_v18 = vshrl.u32 %v4726_v15, %v3406_v27  ;;  %v3413_v47 = vor.u32 %v3412_v38, %v3411_v49  ;;  %v3416_v24 = vor.u32 %v3415_v25, %v3414_v55 }
 0x2df   : > { %3919 = vst [vmem:[%s5188_s10 + $0x40] sm:$0xff] %v1518_v0  ;;  %v3164_v3 = vsel %vm3081_vm1, %v3163_v53, %v3162_v20  ;;  %v1793_v62 = vsub.s32 0, %v6463_v60  ;;  %v3420_v6 = vshll.u32 %v4726_v15, %v3405_v34  ;;  %v3421_v37 = vshrl.u32 %v4727_v22, %v3406_v27 }
 0x2e0   : > { %v3167_v58 = vsel %vm6436_vm4, %v6203_v32, %v3164_v3  ;;  %v3419_v7 = vor.u32 %v3418_v18, %v3417_v36  ;;  %v3439_v39 = vshll.u32 %v3399_v40, 8  ;;  %v1626_v56 = vand.u32 2139095040, %v6452_v29 }
 0x2e1   : > { %4587 = vcosq.f32 %v3167_v58  ;;  %v4146_v35 = vmin.u32 %v1793_v62, %v6463_v60  ;;  %v3407_v33 = vshrl.u32 %v4722_v5, %v3406_v27  ;;  %v3422_v31 = vor.u32 %v3421_v37, %v3420_v6 }
 0x2e2   : > { %4589 = vsinq.f32 %v3167_v58  ;;  %vm3423_vm9 = vcmp.lt.s32.totalorder %v3404_v50, 1  ;;  %vm3424_vm10 = vcmp.lt.s32.totalorder %v3404_v50, 2  ;;  %vm3425_vm12 = vcmp.lt.s32.totalorder %v3404_v50, 3 }
 0x2e3   : > { %v1795_v48 = vclz %v4146_v35  ;;  %vm3426_vm11 = vcmp.lt.s32.totalorder %v3404_v50, 4  ;;  %v3431_v63 = vsel %vm3423_vm9, %v3410_v12, %v3413_v47  ;;  %v3435_v26 = vsel %vm3423_vm9, %v3413_v47, %v3416_v24 }
 0x2e4   : > { %v3428_v61 = vsel %vm3426_vm11, %v3416_v24, 2102212464  ;;  %v3432_v1 = vsel %vm3426_vm11, %v3419_v7, 920167782  ;;  %v3427_v23 = vsel %vm3423_vm9, %v3407_v33, %v3410_v12  ;;  %v3436_v28 = vsel %vm3426_vm11, %v3422_v31, 1326507024 }
 0x2e5   : > { %v4147_v34 = vadd.s32 4294967294, %v1795_v48  ;;  %v3433_v17 = vsel %vm3425_vm12, %v3416_v24, %v3432_v1  ;;  %v3429_v54 = vsel %vm3425_vm12, %v3413_v47, %v3428_v61  ;;  %v3437_v42 = vsel %vm3425_vm12, %v3419_v7, %v3436_v28 }
 0x2e6   : > { %v3434_v19 = vsel %vm3424_vm10, %v3431_v63, %v3433_v17  ;;  %v1627_v46 = vshrl.u32 %v1626_v56, 23  ;;  %v3438_v27 = vsel %vm3424_vm10, %v3435_v26, %v3437_v42  ;;  %v1783_v59 = vadd.s32 %v6415_v14, %v6421_v2 }
 0x2e7   : > { %vm4148_vm13 = vcmp.lt.s32.totalorder %v4147_v34, 0  ;;  %v6482_v57 = vmul.u32.u64.low %v3439_v39, %v3434_v19  ;;  %v6483_v44 = vmul.u32.u64.high %v3439_v39, %v3434_v19, %v6482_v57  ;;  %v3430_v38 = vsel %vm3424_vm10, %v3427_v23, %v3429_v54 }
 0x2e8   : > { %v1798_v40 = vsel %vm4148_vm13, 0, %v4147_v34  ;;  %v6488_v8 = vmul.u32.u64.low %v3439_v39, %v3438_v27  ;;  %v6489_v30 = vmul.u32.u64.high %v3439_v39, %v3438_v27, %v6488_v8  ;;  %v4141_v51 = vadd.s32 4294967169, %v1627_v46 }
 0x2e9   : > { %v1799_v20 = vsub.s32 32, %v1798_v40  ;;  %v1803_v52 = vsub.s32 4294967266, %v1798_v40  ;;  %v3173_v49 = vand.u32 3, %v6446_v21  ;;  %v1800_v25 = vshll.u32 %v6463_v60, %v1798_v40  ;;  %v6504_v21 = vld [vmem:[%s7328_s2] ss:$0 sm:$0xff] }
 0x2ea   : > { %v1813_v0 = vsub.s32 4, %v6448_v43  ;;  %v1623_v53 = vand.u32 2147483647, %v6452_v29  ;;  %vm3171_vm14 = vweird.f32 %v6203_v32  ;;  %v3449_v55 = vadd.s32 1, %v6483_v44 }
 0x2eb   : > { %v1801_v14 = vshrl.u32 %v1783_v59, %v1799_v20  ;;  %v1804_v2 = vadd.s32 127, %v1803_v52  ;;  %v1633_v12 = vadd.s32 1, %v4141_v51  ;;  %vm1729_vm15 = vcmp.lt.s32.totalorder %v6283_v45, 0 }
 0x2ec   : > { %v3446_v50 = vmul.u32 %v3439_v39, %v3430_v38  ;;  %vm3448_vm0 = vc.u32 %v6489_v30, %v6482_v57  ;;  %v6507_v60 = vadd.f32 %v6504_v21, %v554_v10  ;;  %vm3178_vm2 = vcmp.eq.s32.totalorder %v3173_v49, 2 }
 0x2ed   : > { %v1802_v36 = vor.u32 %v1801_v14, %v1800_v25  ;;  %v1805_v18 = vshll.u32 %v1804_v2, 23  ;;  %v3450_v3 = vsel %vm3448_vm0, %v3449_v55, %v6483_v44  ;;  %vm1634_vm1 = vcmp.gt.s32.totalorder %v1633_v12, 0 }
 0x2ee   : > { %v4588_v62 = vpop.eup %4587  ;;  %vm6512_vm3 = vcmp.le.f32.partialorder %v1727_v41, 0.7853982  ;;  %v3451_v24 = vadd.s32 %v3450_v3, %v3446_v50  ;;  %v1635_v58 = vsel %vm1634_vm1, %v1633_v12, 0  ;;  %v6519_v35 = vsel %vm1729_vm15, %v1813_v0, %v6448_v43 }
 0x2ef   : > { %v4590_v7 = vpop.eup %4589  ;;  %v3179_v6 = vxor.u32 2147483648, %v4588_v62  ;;  %v1806_v37 = vor.u32 4788187, %v1805_v18  ;;  %v1630_v39 = vand.u32 8388607, %v1623_v53  ;;  %v1637_v31 = vand.u32 31, %v1635_v58 }
 0x2f0   : > { %v3176_v56 = vxor.u32 2147483648, %v4590_v7  ;;  %v3452_v33 = vadd.s32 536870912, %v3451_v24  ;;  %v3290_v41 = vand.u32 2139095040, %v6507_v60  ;;  %vm3175_vm4 = vcmp.eq.s32.totalorder %v3173_v49, 0 }
 0x2f1   : > { %v3180_v48 = vsel %vm3178_vm2, %v3179_v6, %v4590_v7  ;;  %v1807_v61 = vand.u32 2147483647, %v1806_v37  ;;  %v1809_v63 = vcvt.s32.f32 %v1802_v36  ;;  %vm3174_vm5 = vcmp.lt.s32.totalorder %v3173_v49, 2 }
 0x2f2   : > { %v3177_v1 = vsel %vm3175_vm4, %v4588_v62, %v3176_v56  ;;  %v6524_v26 = vshrl.u32 %v3452_v33, 30  ;;  %v1638_v34 = vsub.s32 32, %v1637_v31  ;;  %v1816_v17 = vsel %vm6512_vm3, 0, %v6519_v35 }
 0x2f3   : > { %v3181_v43 = vsel %vm3174_vm5, %v3177_v1, %v3180_v48  ;;  %v1810_v23 = vmul.f32 %v1809_v63, %v1807_v61  ;;  %v1631_v28 = vor.u32 8388608, %v1630_v39  ;;  %v1640_v42 = vshll.u32 %v4722_v5, %v1637_v31 }
 0x2f4   : > { %v3182_v54 = vsel %vm3171_vm14, nan, %v3181_v43  ;;  %v3454_v19 = vshll.u32 %v6524_v26, 30  ;;  %v3291_v46 = vshrl.u32 %v3290_v41, 23  ;;  %v1641_v44 = vshrl.u32 %v4723_v9, %v1638_v34 }
 0x2f5   : > { %3935 = vst [vmem:[%s5188_s10 + $0xc0] sm:$0xff] %v3182_v54  ;;  %v1811_v27 = vxor.u32 2147483648, %v1810_v23  ;;  %v1644_v59 = vshrl.u32 %v4724_v11, %v1638_v34  ;;  %v1647_v40 = vshrl.u32 %v4725_v13, %v1638_v34  ;;  %v1643_v20 = vshll.u32 %v4723_v9, %v1637_v31 }
 0x2f6   : > { %v6537_v8 = vsub.s32 %v3451_v24, %v3454_v19  ;;  %v1646_v32 = vshll.u32 %v4724_v11, %v1637_v31  ;;  %v1650_v52 = vshrl.u32 %v4726_v15, %v1638_v34  ;;  %v1636_v51 = vshrl.u32 %v1635_v58, 5 }
 0x2f7   : > { %v1812_v38 = vsel %vm1729_vm15, %v1811_v27, %v1810_v23  ;;  %v1642_v10 = vor.u32 %v1641_v44, %v1640_v42  ;;  %v1649_v49 = vshll.u32 %v4725_v13, %v1637_v31  ;;  %v1645_v14 = vor.u32 %v1644_v59, %v1643_v20 }
 0x2f8   : > { %v1815_v25 = vsel %vm6512_vm3, %v6283_v45, %v1812_v38  ;;  %v3457_v0 = vsub.s32 0, %v6537_v8  ;;  %v1648_v2 = vor.u32 %v1647_v40, %v1646_v32  ;;  %vm3393_vm6 = vcmp.lt.s32.totalorder %v6355_v4, 0 }
 0x2f9   : > { %4591 = vcosq.f32 %v1815_v25  ;;  %v1651_v55 = vor.u32 %v1650_v52, %v1649_v49  ;;  %v1652_v12 = vshll.u32 %v4726_v15, %v1637_v31  ;;  %v1653_v50 = vshrl.u32 %v4727_v22, %v1638_v34 }
 0x2fa   : > { %4593 = vsinq.f32 %v1815_v25  ;;  %v4210_v36 = vmin.u32 %v3457_v0, %v6537_v8  ;;  %v1671_v18 = vshll.u32 %v1631_v28, 8  ;;  %v4205_v3 = vadd.s32 4294967169, %v3291_v46 }
 0x2fb   : > { %v1639_v62 = vshrl.u32 %v4722_v5, %v1638_v34  ;;  %v1654_v47 = vor.u32 %v1653_v50, %v1652_v12  ;;  %vm1655_vm7 = vcmp.lt.s32.totalorder %v1636_v51, 1  ;;  %vm1656_vm8 = vcmp.lt.s32.totalorder %v1636_v51, 2  ;;  %v4290_v50 = vpop.f32.mrf.mxu0 }
 0x2fc   : > { %v3459_v24 = vclz %v4210_v36  ;;  %vm1657_vm9 = vcmp.lt.s32.totalorder %v1636_v51, 3  ;;  %vm1658_vm10 = vcmp.lt.s32.totalorder %v1636_v51, 4  ;;  %v1663_v58 = vsel %vm1655_vm7, %v1642_v10, %v1645_v14 }
 0x2fd   : > { %v1660_v7 = vsel %vm1658_vm10, %v1648_v2, 2102212464  ;;  %v1664_v6 = vsel %vm1658_vm10, %v1651_v55, 920167782  ;;  %v1667_v37 = vsel %vm1655_vm7, %v1645_v14, %v1648_v2  ;;  %v1668_v35 = vsel %vm1658_vm10, %v1654_v47, 1326507024 }
 0x2fe   : > { %v4211_v39 = vadd.s32 4294967294, %v3459_v24  ;;  %v3477_v56 = vsub.s32 4, %v6524_v26  ;;  %v1665_v33 = vsel %vm1657_vm9, %v1648_v2, %v1664_v6  ;;  %v1669_v31 = vsel %vm1657_vm9, %v1651_v55, %v1668_v35 }
 0x2ff   : > { %v1820_v41 = vadd.s32 3, %v1816_v17  ;;  %v1659_v48 = vsel %vm1655_vm7, %v1639_v62, %v1642_v10  ;;  %v1666_v61 = vsel %vm1656_vm8, %v1663_v58, %v1665_v33  ;;  %v1670_v63 = vsel %vm1656_vm8, %v1667_v37, %v1669_v31 }
 0x300   : > { %vm4212_vm12 = vcmp.lt.s32.totalorder %v4211_v39, 0  ;;  %v1661_v1 = vsel %vm1657_vm9, %v1645_v14, %v1660_v7  ;;  %v6560_v34 = vmul.u32.u64.low %v1671_v18, %v1670_v63  ;;  %v6561_v43 = vmul.u32.u64.high %v1671_v18, %v1670_v63, %v6560_v34 }
 0x301   : > { %v3462_v23 = vsel %vm4212_vm12, 0, %v4211_v39  ;;  %v6563_v28 = vmul.u32.u64.low %v1671_v18, %v1666_v61  ;;  %v6564_v54 = vmul.u32.u64.high %v1671_v18, %v1666_v61, %v6563_v28  ;;  %v3297_v19 = vadd.s32 1, %v4205_v3 }
 0x302   : > { %v3447_v17 = vadd.s32 %v6482_v57, %v6489_v30  ;;  %v3463_v42 = vsub.s32 32, %v3462_v23  ;;  %v3467_v46 = vsub.s32 4294967266, %v3462_v23  ;;  %v3478_v27 = vsel %vm3393_vm6, %v3477_v56, %v6524_v26 }
 0x303   : > { %vm1819_vm11 = vweird.f32 %v6283_v45  ;;  %v1821_v44 = vand.u32 3, %v1820_v41  ;;  %vm6575_vm13 = vcmp.le.f32.partialorder %v3391_v16, 0.7853982  ;;  %v1662_v40 = vsel %vm1656_vm8, %v1659_v48, %v1661_v1 }
 0x304   : > { %vm3298_vm14 = vcmp.gt.s32.totalorder %v3297_v19, 0  ;;  %v3464_v57 = vshll.u32 %v6537_v8, %v3462_v23  ;;  %v3465_v30 = vshrl.u32 %v3447_v17, %v3463_v42  ;;  %v3468_v20 = vadd.s32 127, %v3467_v46 }
 0x305   : > { %vm1680_vm15 = vc.u32 %v6561_v43, %v6563_v28  ;;  %v3480_v26 = vsel %vm6575_vm13, 0, %v3478_v27  ;;  %v1681_v32 = vadd.s32 1, %v6564_v54  ;;  %v3287_v16 = vand.u32 2147483647, %v6507_v60 }
 0x306   : > { %v3299_v52 = vsel %vm3298_vm14, %v3297_v19, 0  ;;  %v4592_v38 = vpop.eup %4591  ;;  %v3466_v10 = vor.u32 %v3465_v30, %v3464_v57  ;;  %v3469_v51 = vshll.u32 %v3468_v20, 23  ;;  %v1678_v49 = vmul.u32 %v1671_v18, %v1662_v40 }
 0x307   : > { %v3301_v25 = vand.u32 31, %v3299_v52  ;;  %v4594_v0 = vpop.eup %4593  ;;  %vm1822_vm0 = vcmp.lt.s32.totalorder %v1821_v44, 2  ;;  %vm1823_vm1 = vcmp.eq.s32.totalorder %v1821_v44, 0  ;;  %v1827_v8 = vxor.u32 2147483648, %v4592_v38 }
 0x308   : > { %v1682_v14 = vsel %vm1680_vm15, %v1681_v32, %v6564_v54  ;;  %v1824_v2 = vxor.u32 2147483648, %v4594_v0  ;;  %vm1826_vm2 = vcmp.eq.s32.totalorder %v1821_v44, 2  ;;  %v3470_v55 = vor.u32 4788187, %v3469_v51 }
 0x309   : > { %v1683_v12 = vadd.s32 %v1682_v14, %v1678_v49  ;;  %v1828_v36 = vsel %vm1826_vm2, %v1827_v8, %v4594_v0  ;;  %v3484_v3 = vadd.s32 3, %v3480_v26  ;;  %v3294_v62 = vand.u32 8388607, %v3287_v16 }
 0x30a   : > { %v3302_v47 = vsub.s32 32, %v3301_v25  ;;  %v1825_v18 = vsel %vm1823_vm1, %v4592_v38, %v1824_v2  ;;  %v3471_v24 = vand.u32 2147483647, %v3470_v55  ;;  %v3473_v58 = vcvt.s32.f32 %v3466_v10 }
 0x30b   : > { %v1684_v7 = vadd.s32 536870912, %v1683_v12  ;;  %v1829_v6 = vsel %vm1822_vm0, %v1825_v18, %v1828_v36  ;;  %v6594_v39 = vadd.f32 %v6504_v21, %v4290_v50  ;;  %v3300_v48 = vshrl.u32 %v3299_v52, 5  ;;  %v4314_v18 = vpop.f32.mrf.mxu1 }
 0x30c   : > { %v3305_v37 = vshrl.u32 %v4723_v9, %v3302_v47  ;;  %v3308_v35 = vshrl.u32 %v4724_v11, %v3302_v47  ;;  %v1830_v56 = vsel %vm1819_vm11, nan, %v1829_v6  ;;  %v3474_v33 = vmul.f32 %v3473_v58, %v3471_v24 }
 0x30d   : > { %v6598_v31 = vshrl.u32 %v1684_v7, 30  ;;  %v3311_v41 = vshrl.u32 %v4725_v13, %v3302_v47  ;;  %3922 = vst [vmem:[%s5188_s10 + $0x58] sm:$0xff] %v1830_v56  ;;  %v3304_v61 = vshll.u32 %v4722_v5, %v3301_v25  ;;  %v3307_v63 = vshll.u32 %v4723_v9, %v3301_v25 }
 0x30e   : > { %v3314_v1 = vshrl.u32 %v4726_v15, %v3302_v47  ;;  %v3475_v34 = vxor.u32 2147483648, %v3474_v33  ;;  %v3310_v54 = vshll.u32 %v4724_v11, %v3301_v25  ;;  %v3313_v45 = vshll.u32 %v4725_v13, %v3301_v25 }
 0x30f   : > { %v1686_v23 = vshll.u32 %v6598_v31, 30  ;;  %v3306_v19 = vor.u32 %v3305_v37, %v3304_v61  ;;  %v3309_v17 = vor.u32 %v3308_v35, %v3307_v63  ;;  %v3316_v42 = vshll.u32 %v4726_v15, %v3301_v25 }
 0x310   : > { %v3317_v46 = vshrl.u32 %v4727_v22, %v3302_v47  ;;  %v3476_v27 = vsel %vm3393_vm6, %v3475_v34, %v3474_v33  ;;  %v3312_v40 = vor.u32 %v3311_v41, %v3310_v54  ;;  %v3315_v57 = vor.u32 %v3314_v1, %v3313_v45 }
 0x311   : > { %v6612_v44 = vsub.s32 %v1683_v12, %v1686_v23  ;;  %v3479_v30 = vsel %vm6575_vm13, %v6355_v4, %v3476_v27  ;;  %v6617_v20 = vand.u32 3, %v3484_v3  ;;  %v3295_v26 = vor.u32 8388608, %v3294_v62 }
 0x312   : > { %v3318_v32 = vor.u32 %v3317_v46, %v3316_v42  ;;  %4595 = vcosq.f32 %v3479_v30  ;;  %v3303_v38 = vshrl.u32 %v4722_v5, %v3302_v47  ;;  %v1938_v10 = vand.u32 2139095040, %v6594_v39 }
 0x313   : > { %v1689_v52 = vsub.s32 0, %v6612_v44  ;;  %4597 = vsinq.f32 %v3479_v30  ;;  %vm3319_vm3 = vcmp.lt.s32.totalorder %v3300_v48, 1  ;;  %vm3321_vm4 = vcmp.lt.s32.totalorder %v3300_v48, 3 }
 0x314   : > { %vm3322_vm5 = vcmp.lt.s32.totalorder %v3300_v48, 4  ;;  %v3327_v59 = vsel %vm3319_vm3, %v3306_v19, %v3309_v17  ;;  %v3331_v8 = vsel %vm3319_vm3, %v3309_v17, %v3312_v40  ;;  %v3335_v2 = vshll.u32 %v3295_v26, 8 }
 0x315   : > { %v4142_v51 = vmin.u32 %v1689_v52, %v6612_v44  ;;  %v3324_v49 = vsel %vm3322_vm5, %v3312_v40, 2102212464  ;;  %v3328_v25 = vsel %vm3322_vm5, %v3315_v57, 920167782  ;;  %v3332_v14 = vsel %vm3322_vm5, %v3318_v32, 1326507024 }
 0x316   : > { %v3329_v0 = vsel %vm3321_vm4, %v3312_v40, %v3328_v25  ;;  %v1709_v12 = vsub.s32 4, %v6598_v31  ;;  %vm3320_vm6 = vcmp.lt.s32.totalorder %v3300_v48, 2  ;;  %v3323_v50 = vsel %vm3319_vm3, %v3303_v38, %v3306_v19 }
 0x317   : > { %v1691_v55 = vclz %v4142_v51  ;;  %v3325_v36 = vsel %vm3321_vm4, %v3309_v17, %v3324_v49  ;;  %v3330_v3 = vsel %vm3320_vm6, %v3327_v59, %v3329_v0  ;;  %v3333_v62 = vsel %vm3321_vm4, %v3315_v57, %v3332_v14 }
 0x318   : > { %v1939_v47 = vshrl.u32 %v1938_v10, 23  ;;  %v3334_v58 = vsel %vm3320_vm6, %v3331_v8, %v3333_v62  ;;  %v6627_v7 = vmul.u32.u64.low %v3335_v2, %v3330_v3  ;;  %v6628_v6 = vmul.u32.u64.high %v3335_v2, %v3330_v3, %v6627_v7 }
 0x319   : > { %v4143_v24 = vadd.s32 4294967294, %v1691_v55  ;;  %vm1625_vm7 = vcmp.lt.s32.totalorder %v6452_v29, 0  ;;  %v6631_v37 = vmul.u32.u64.low %v3335_v2, %v3334_v58  ;;  %v6632_v35 = vmul.u32.u64.high %v3335_v2, %v3334_v58, %v6631_v37 }
 0x31a   : > { %v4153_v56 = vadd.s32 4294967169, %v1939_v47  ;;  %vm6636_vm8 = vcmp.le.f32.partialorder %v1623_v53, 0.7853982  ;;  %v3326_v41 = vsel %vm3320_vm6, %v3323_v50, %v3325_v36  ;;  %v6641_v48 = vadd.f32 %v6504_v21, %v4314_v18 }
 0x31b   : > { %vm4144_vm9 = vcmp.lt.s32.totalorder %v4143_v24, 0  ;;  %vm3486_vm10 = vcmp.lt.s32.totalorder %v6617_v20, 2  ;;  %v1679_v61 = vadd.s32 %v6563_v28, %v6561_v43  ;;  %v1935_v1 = vand.u32 2147483647, %v6594_v39 }
 0x31c   : > { %v1694_v63 = vsel %vm4144_vm9, 0, %v4143_v24  ;;  %v1945_v34 = vadd.s32 1, %v4153_v56  ;;  %vm3483_vm12 = vweird.f32 %v6355_v4  ;;  %v1710_v54 = vsel %vm1625_vm7, %v1709_v12, %v6598_v31 }
 0x31d   : > { %v1695_v53 = vsub.s32 32, %v1694_v63  ;;  %v1699_v23 = vsub.s32 4294967266, %v1694_v63  ;;  %v3345_v45 = vadd.s32 1, %v6628_v6  ;;  %v1696_v19 = vshll.u32 %v6612_v44, %v1694_v63 }
 0x31e   : > { %v3342_v17 = vmul.u32 %v3335_v2, %v3326_v41  ;;  %vm3344_vm11 = vc.u32 %v6632_v35, %v6627_v7  ;;  %vm1946_vm13 = vcmp.gt.s32.totalorder %v1945_v34, 0  ;;  %v1712_v40 = vsel %vm6636_vm8, 0, %v1710_v54 }
 0x31f   : > { %v1697_v43 = vshrl.u32 %v1679_v61, %v1695_v53  ;;  %v1700_v28 = vadd.s32 127, %v1699_v23  ;;  %v3346_v42 = vsel %vm3344_vm11, %v3345_v45, %v6628_v6  ;;  %v1947_v46 = vsel %vm1946_vm13, %v1945_v34, 0  ;;  %v4596_v27 = vpop.eup %4595 }
 0x320   : > { %v3347_v57 = vadd.s32 %v3346_v42, %v3342_v17  ;;  %v1942_v31 = vand.u32 8388607, %v1935_v1  ;;  %v1949_v30 = vand.u32 31, %v1947_v46  ;;  %v4598_v26 = vpop.eup %4597  ;;  %vm3487_vm14 = vcmp.eq.s32.totalorder %v6617_v20, 0 }
 0x321   : > { %v3491_v44 = vxor.u32 2147483648, %v4596_v27  ;;  %v1698_v32 = vor.u32 %v1697_v43, %v1696_v19  ;;  %v1701_v52 = vshll.u32 %v1700_v28, 23  ;;  %v3488_v38 = vxor.u32 2147483648, %v4598_v26 }
 0x322   : > { %vm3490_vm15 = vcmp.eq.s32.totalorder %v6617_v20, 2  ;;  %v3348_v10 = vadd.s32 536870912, %v3347_v57  ;;  %v1950_v51 = vsub.s32 32, %v1949_v30  ;;  %v6661_v25 = vadd.s32 3, %v1712_v40 }
 0x323   : > { %v3492_v49 = vsel %vm3490_vm15, %v3491_v44, %v4598_v26  ;;  %v1702_v59 = vor.u32 4788187, %v1701_v52  ;;  %v3599_v0 = vand.u32 2147483647, %v6641_v48  ;;  %v3489_v8 = vsel %vm3487_vm14, %v4596_v27, %v3488_v38 }
 0x324   : > { %v3349_v14 = vshrl.u32 %v3348_v10, 30  ;;  %v1943_v2 = vor.u32 8388608, %v1942_v31  ;;  %v3602_v55 = vand.u32 2139095040, %v6641_v48  ;;  %v3493_v12 = vsel %vm3486_vm10, %v3489_v8, %v3492_v49 }
 0x325   : > { %v1703_v50 = vand.u32 2147483647, %v1702_v59  ;;  %v1705_v36 = vcvt.s32.f32 %v1698_v32  ;;  %v1953_v3 = vshrl.u32 %v4723_v9, %v1950_v51  ;;  %v3494_v62 = vsel %vm3483_vm12, nan, %v3493_v12 }
 0x326   : > { %v6671_v47 = vadd.s32 %v6627_v7, %v6632_v35  ;;  %v3350_v18 = vshll.u32 %v3349_v14, 30  ;;  %v1956_v24 = vshrl.u32 %v4724_v11, %v1950_v51  ;;  %3938 = vst [vmem:[%s5188_s10 + $0xd8] sm:$0xff] %v3494_v62  ;;  %v1948_v6 = vshrl.u32 %v1947_v46, 5 }
 0x327   : > { %v1706_v58 = vmul.f32 %v1705_v36, %v1703_v50  ;;  %v1952_v37 = vshll.u32 %v4722_v5, %v1949_v30  ;;  %v1959_v20 = vshrl.u32 %v4725_v13, %v1950_v51  ;;  %v1955_v41 = vshll.u32 %v4723_v9, %v1949_v30 }
 0x328   : > { %v6677_v56 = vsub.s32 %v3347_v57, %v3350_v18  ;;  %v1958_v4 = vshll.u32 %v4724_v11, %v1949_v30  ;;  %v1962_v61 = vshrl.u32 %v4726_v15, %v1950_v51  ;;  %v1961_v63 = vshll.u32 %v4725_v13, %v1949_v30 }
 0x329   : > { %v1707_v7 = vxor.u32 2147483648, %v1706_v58  ;;  %v1954_v35 = vor.u32 %v1953_v3, %v1952_v37  ;;  %v1965_v34 = vshrl.u32 %v4727_v22, %v1950_v51  ;;  %vm3289_vm0 = vcmp.lt.s32.totalorder %v6507_v60, 0 }
 0x32a   : > { %v3353_v53 = vsub.s32 0, %v6677_v56  ;;  %v1957_v23 = vor.u32 %v1956_v24, %v1955_v41  ;;  %v1960_v54 = vor.u32 %v1959_v20, %v1958_v4  ;;  %v1964_v45 = vshll.u32 %v4726_v15, %v1949_v30 }
 0x32b   : > { %v1708_v19 = vsel %vm1625_vm7, %v1707_v7, %v1706_v58  ;;  %v1963_v17 = vor.u32 %v1962_v61, %v1961_v63  ;;  %v1983_v43 = vshll.u32 %v1943_v2, 8  ;;  %v3603_v28 = vshrl.u32 %v3602_v55, 23 }
 0x32c   : > { %v1711_v42 = vsel %vm6636_vm8, %v6452_v29, %v1708_v19  ;;  %v4206_v46 = vmin.u32 %v3353_v53, %v6677_v56  ;;  %v1951_v27 = vshrl.u32 %v4722_v5, %v1950_v51  ;;  %v1966_v40 = vor.u32 %v1965_v34, %v1964_v45 }
 0x32d   : > { %4599 = vcosq.f32 %v1711_v42  ;;  %v3373_v57 = vsub.s32 4, %v3349_v14  ;;  %vm1967_vm1 = vcmp.lt.s32.totalorder %v1948_v6, 1  ;;  %vm1970_vm2 = vcmp.lt.s32.totalorder %v1948_v6, 4 }
 0x32e   : > { %4601 = vsinq.f32 %v1711_v42  ;;  %v3355_v31 = vclz %v4206_v46  ;;  %v1972_v30 = vsel %vm1970_vm2, %v1960_v54, 2102212464  ;;  %v1975_v26 = vsel %vm1967_vm1, %v1954_v35, %v1957_v23 }
 0x32f   : > { %vm1968_vm3 = vcmp.lt.s32.totalorder %v1948_v6, 2  ;;  %vm1969_vm4 = vcmp.lt.s32.totalorder %v1948_v6, 3  ;;  %v1976_v44 = vsel %vm1970_vm2, %v1963_v17, 920167782  ;;  %v1979_v32 = vsel %vm1967_vm1, %v1957_v23, %v1960_v54 }
 0x330   : > { %v4207_v52 = vadd.s32 4294967294, %v3355_v31  ;;  %v1971_v33 = vsel %vm1967_vm1, %v1951_v27, %v1954_v35  ;;  %v1977_v38 = vsel %vm1969_vm4, %v1960_v54, %v1976_v44  ;;  %v1980_v10 = vsel %vm1970_vm2, %v1966_v40, 1326507024 }
 0x331   : > { %v1973_v49 = vsel %vm1969_vm4, %v1957_v23, %v1972_v30  ;;  %v1978_v51 = vsel %vm1968_vm3, %v1975_v26, %v1977_v38  ;;  %v1981_v59 = vsel %vm1969_vm4, %v1963_v17, %v1980_v10  ;;  %v4217_v8 = vadd.s32 4294967169, %v3603_v28 }
 0x332   : > { %vm4208_vm5 = vcmp.lt.s32.totalorder %v4207_v52, 0  ;;  %v1982_v2 = vsel %vm1968_vm3, %v1979_v32, %v1981_v59  ;;  %v6696_v55 = vmul.u32.u64.low %v1983_v43, %v1978_v51  ;;  %v6697_v12 = vmul.u32.u64.high %v1983_v43, %v1978_v51, %v6696_v55 }
 0x333   : > { %v3358_v50 = vsel %vm4208_vm5, 0, %v4207_v52  ;;  %v3374_v36 = vsel %vm3289_vm0, %v3373_v57, %v3349_v14  ;;  %v6702_v3 = vmul.u32.u64.low %v1983_v43, %v1982_v2  ;;  %v6703_v62 = vmul.u32.u64.high %v1983_v43, %v1982_v2, %v6702_v3 }
 0x334   : > { %v3359_v18 = vsub.s32 32, %v3358_v50  ;;  %v3363_v24 = vsub.s32 4294967266, %v3358_v50  ;;  %v1974_v58 = vsel %vm1968_vm3, %v1971_v33, %v1973_v49  ;;  %v3609_v37 = vadd.s32 1, %v4217_v8 }
 0x335   : > { %v1717_v20 = vand.u32 3, %v6661_v25  ;;  %vm6709_vm6 = vcmp.le.f32.partialorder %v3287_v16, 0.7853982  ;;  %v3360_v4 = vshll.u32 %v6677_v56, %v3358_v50  ;;  %v1993_v7 = vadd.s32 1, %v6697_v12  ;;  %v484_v50 = vpop.f32.mrf.mxu0 }
 0x336   : > { %v3361_v14 = vshrl.u32 %v6671_v47, %v3359_v18  ;;  %v3364_v61 = vadd.s32 127, %v3363_v24  ;;  %vm3610_vm7 = vcmp.gt.s32.totalorder %v3609_v37, 0  ;;  %v3376_v6 = vsel %vm6709_vm6, 0, %v3374_v36 }
 0x337   : > { %v1990_v35 = vmul.u32 %v1983_v43, %v1974_v58  ;;  %vm1992_vm8 = vc.u32 %v6703_v62, %v6696_v55  ;;  %v3611_v25 = vsel %vm3610_vm7, %v3609_v37, 0  ;;  %v3606_v56 = vand.u32 8388607, %v3599_v0 }
 0x338   : > { %v3362_v16 = vor.u32 %v3361_v14, %v3360_v4  ;;  %v3365_v63 = vshll.u32 %v3364_v61, 23  ;;  %v1994_v34 = vsel %vm1992_vm8, %v1993_v7, %v6697_v12  ;;  %vm1715_vm9 = vweird.f32 %v6452_v29 }
 0x339   : > { %v1995_v47 = vadd.s32 %v1994_v34, %v1990_v35  ;;  %v3613_v53 = vand.u32 31, %v3611_v25  ;;  %vm1718_vm10 = vcmp.lt.s32.totalorder %v1717_v20, 2  ;;  %vm1719_vm12 = vcmp.eq.s32.totalorder %v1717_v20, 0 }
 0x33a   : > { %v4600_v23 = vpop.eup %4599  ;;  %vm1722_vm11 = vcmp.eq.s32.totalorder %v1717_v20, 2  ;;  %v3366_v54 = vor.u32 4788187, %v3365_v63  ;;  %v6724_v17 = vadd.s32 3, %v3376_v6  ;;  %v3369_v27 = vcvt.s32.f32 %v3362_v16 }
 0x33b   : > { %v4602_v45 = vpop.eup %4601  ;;  %v1723_v19 = vxor.u32 2147483648, %v4600_v23  ;;  %v1996_v43 = vadd.s32 536870912, %v1995_v47  ;;  %v3614_v28 = vsub.s32 32, %v3613_v53  ;;  %v3607_v40 = vor.u32 8388608, %v3606_v56 }
 0x33c   : > { %v1720_v42 = vxor.u32 2147483648, %v4602_v45  ;;  %v3367_v46 = vand.u32 2147483647, %v3366_v54  ;;  %v3616_v30 = vshll.u32 %v4722_v5, %v3613_v53  ;;  %v3612_v49 = vshrl.u32 %v3611_v25, 5 }
 0x33d   : > { %v1724_v57 = vsel %vm1722_vm11, %v1723_v19, %v4602_v45  ;;  %v1997_v31 = vshrl.u32 %v1996_v43, 30  ;;  %v3617_v26 = vshrl.u32 %v4723_v9, %v3614_v28  ;;  %v3620_v52 = vshrl.u32 %v4724_v11, %v3614_v28 }
 0x33e   : > { %v1721_v44 = vsel %vm1719_vm12, %v4600_v23, %v1720_v42  ;;  %v3370_v32 = vmul.f32 %v3369_v27, %v3367_v46  ;;  %v3623_v33 = vshrl.u32 %v4725_v13, %v3614_v28  ;;  %v3619_v51 = vshll.u32 %v4723_v9, %v3613_v53  ;;  %v564_v27 = vpop.f32.mrf.mxu1 }
 0x33f   : > { %v1725_v38 = vsel %vm1718_vm10, %v1721_v44, %v1724_v57  ;;  %v1998_v10 = vshll.u32 %v1997_v31, 30  ;;  %vm1937_vm13 = vcmp.lt.s32.totalorder %v6594_v39, 0  ;;  %v3618_v2 = vor.u32 %v3617_v26, %v3616_v30 }
 0x340   : > { %v1726_v59 = vsel %vm1715_vm9, nan, %v1725_v38  ;;  %v3371_v8 = vxor.u32 2147483648, %v3370_v32  ;;  %v3622_v12 = vshll.u32 %v4724_v11, %v3613_v53  ;;  %v3621_v3 = vor.u32 %v3620_v52, %v3619_v51 }
 0x341   : > { %3921 = vst [vmem:[%s5188_s10 + $0x50] sm:$0xff] %v1726_v59  ;;  %v6738_v36 = vsub.s32 %v1995_v47, %v1998_v10  ;;  %v3625_v18 = vshll.u32 %v4725_v13, %v3613_v53  ;;  %v3626_v24 = vshrl.u32 %v4726_v15, %v3614_v28  ;;  %v3628_v37 = vshll.u32 %v4726_v15, %v3613_v53 }
 0x342   : > { %v3372_v58 = vsel %vm3289_vm0, %v3371_v8, %v3370_v32  ;;  %v3624_v29 = vor.u32 %v3623_v33, %v3622_v12  ;;  %v3629_v20 = vshrl.u32 %v4727_v22, %v3614_v28  ;;  %v6751_v7 = vadd.f32 %v6504_v21, %v484_v50 }
 0x343   : > { %v3375_v4 = vsel %vm6709_vm6, %v6507_v60, %v3372_v58  ;;  %v2001_v14 = vsub.s32 0, %v6738_v36  ;;  %v3627_v61 = vor.u32 %v3626_v24, %v3625_v18  ;;  %v3615_v6 = vshrl.u32 %v4722_v5, %v3614_v28 }
 0x344   : > { %4603 = vcosq.f32 %v3375_v4  ;;  %v3630_v35 = vor.u32 %v3629_v20, %v3628_v37  ;;  %vm3631_vm14 = vcmp.lt.s32.totalorder %v3612_v49, 1  ;;  %v2021_v16 = vsub.s32 4, %v1997_v31 }
 0x345   : > { %4605 = vsinq.f32 %v3375_v4  ;;  %v4154_v25 = vmin.u32 %v2001_v14, %v6738_v36  ;;  %vm3634_vm15 = vcmp.lt.s32.totalorder %v3612_v49, 4  ;;  %v3639_v34 = vsel %vm3631_vm14, %v3618_v2, %v3621_v3 }
 0x346   : > { %v3636_v63 = vsel %vm3634_vm15, %v3624_v29, 2102212464  ;;  %v3640_v41 = vsel %vm3634_vm15, %v3627_v61, 920167782  ;;  %v3647_v56 = vshll.u32 %v3607_v40, 8  ;;  %vm3633_vm0 = vcmp.lt.s32.totalorder %v3612_v49, 3 }
 0x347   : > { %v2003_v47 = vclz %v4154_v25  ;;  %v3635_v53 = vsel %vm3631_vm14, %v3615_v6, %v3618_v2  ;;  %v3643_v23 = vsel %vm3631_vm14, %v3621_v3, %v3624_v29  ;;  %vm3632_vm1 = vcmp.lt.s32.totalorder %v3612_v49, 2 }
 0x348   : > { %v3637_v54 = vsel %vm3633_vm0, %v3621_v3, %v3636_v63  ;;  %v3641_v45 = vsel %vm3633_vm0, %v3624_v29, %v3640_v41  ;;  %v3644_v19 = vsel %vm3634_vm15, %v3630_v35, 1326507024  ;;  %v2022_v28 = vsel %vm1937_vm13, %v2021_v16, %v1997_v31 }
 0x349   : > { %v4155_v43 = vadd.s32 4294967294, %v2003_v47  ;;  %v3642_v42 = vsel %vm3632_vm1, %v3639_v34, %v3641_v45  ;;  %v3645_v46 = vsel %vm3633_vm0, %v3627_v61, %v3644_v19  ;;  %v3638_v57 = vsel %vm3632_vm1, %v3635_v53, %v3637_v54 }
 0x34a   : > { %v3646_v30 = vsel %vm3632_vm1, %v3643_v23, %v3645_v46  ;;  %v6757_v26 = vmul.u32.u64.low %v3647_v56, %v3642_v42  ;;  %v6758_v44 = vmul.u32.u64.high %v3647_v56, %v3642_v42, %v6757_v26  ;;  %v1834_v52 = vand.u32 2139095040, %v6751_v7 }
 0x34b   : > { %vm4156_vm2 = vcmp.lt.s32.totalorder %v4155_v43, 0  ;;  %v6761_v40 = vmul.u32.u64.low %v3647_v56, %v3646_v30  ;;  %v6762_v32 = vmul.u32.u64.high %v3647_v56, %v3646_v30, %v6761_v40  ;;  %v3381_v33 = vand.u32 3, %v6724_v17 }
 0x34c   : > { %vm6768_vm3 = vcmp.le.f32.partialorder %v1935_v1, 0.7853982  ;;  %v2006_v38 = vsel %vm4156_vm2, 0, %v4155_v43  ;;  %v6773_v10 = vadd.f32 %v6504_v21, %v564_v27  ;;  %v1991_v49 = vadd.s32 %v6696_v55, %v6703_v62 }
 0x34d   : > { %v2007_v51 = vsub.s32 32, %v2006_v38  ;;  %v2011_v59 = vsub.s32 4294967266, %v2006_v38  ;;  %v1835_v8 = vshrl.u32 %v1834_v52, 23  ;;  %v2024_v2 = vsel %vm6768_vm3, 0, %v2022_v28 }
 0x34e   : > { %v3654_v17 = vmul.u32 %v3647_v56, %v3638_v57  ;;  %v3657_v12 = vadd.s32 1, %v6758_v44  ;;  %v1831_v1 = vand.u32 2147483647, %v6751_v7  ;;  %v2008_v50 = vshll.u32 %v6738_v36, %v2006_v38 }
 0x34f   : > { %v2009_v3 = vshrl.u32 %v1991_v49, %v2007_v51  ;;  %v2012_v18 = vadd.s32 127, %v2011_v59  ;;  %vm3656_vm4 = vc.u32 %v6762_v32, %v6757_v26  ;;  %vm3382_vm5 = vcmp.lt.s32.totalorder %v3381_v33, 2 }
 0x350   : > { %v3658_v21 = vsel %vm3656_vm4, %v3657_v12, %v6758_v44  ;;  %v4149_v55 = vadd.s32 4294967169, %v1835_v8  ;;  %v3498_v62 = vand.u32 2139095040, %v6773_v10  ;;  %vm3383_vm6 = vcmp.eq.s32.totalorder %v3381_v33, 0 }
 0x351   : > { %v4604_v24 = vpop.eup %4603  ;;  %v2010_v58 = vor.u32 %v2009_v3, %v2008_v50  ;;  %v2013_v29 = vshll.u32 %v2012_v18, 23  ;;  %v3659_v37 = vadd.s32 %v3658_v21, %v3654_v17  ;;  %vm3386_vm7 = vcmp.eq.s32.totalorder %v3381_v33, 2 }
 0x352   : > { %v4606_v20 = vpop.eup %4605  ;;  %v3387_v4 = vxor.u32 2147483648, %v4604_v24  ;;  %v2028_v36 = vadd.s32 3, %v2024_v2  ;;  %v1841_v14 = vadd.s32 1, %v4149_v55  ;;  %v1838_v25 = vand.u32 8388607, %v1831_v1 }
 0x353   : > { %v3384_v61 = vxor.u32 2147483648, %v4606_v20  ;;  %v2014_v6 = vor.u32 4788187, %v2013_v29  ;;  %v3660_v35 = vadd.s32 536870912, %v3659_v37  ;;  %v2017_v63 = vcvt.s32.f32 %v2010_v58 }
 0x354   : > { %v3388_v16 = vsel %vm3386_vm7, %v3387_v4, %v4606_v20  ;;  %vm1842_vm8 = vcmp.gt.s32.totalorder %v1841_v14, 0  ;;  %v3499_v34 = vshrl.u32 %v3498_v62, 23  ;;  %vm3379_vm9 = vweird.f32 %v6507_v60 }
 0x355   : > { %v3385_v41 = vsel %vm3383_vm6, %v4604_v24, %v3384_v61  ;;  %v2015_v56 = vand.u32 2147483647, %v2014_v6  ;;  %v3661_v47 = vshrl.u32 %v3660_v35, 30  ;;  %v1843_v53 = vsel %vm1842_vm8, %v1841_v14, 0 }
 0x356   : > { %v3389_v23 = vsel %vm3382_vm5, %v3385_v41, %v3388_v16  ;;  %v1845_v54 = vand.u32 31, %v1843_v53  ;;  %v6791_v43 = vand.u32 3, %v2028_v36  ;;  %vm3601_vm10 = vcmp.lt.s32.totalorder %v6641_v48, 0 }
 0x357   : > { %v3390_v45 = vsel %vm3379_vm9, nan, %v3389_v23  ;;  %v2018_v19 = vmul.f32 %v2017_v63, %v2015_v56  ;;  %v3662_v28 = vshll.u32 %v3661_v47, 30  ;;  %v1839_v42 = vor.u32 8388608, %v1838_v25 }
 0x358   : > { %3937 = vst [vmem:[%s5188_s10 + $0xd0] sm:$0xff] %v3390_v45  ;;  %v1846_v46 = vsub.s32 32, %v1845_v54  ;;  %v3495_v27 = vand.u32 2147483647, %v6773_v10  ;;  %v4213_v57 = vadd.s32 4294967169, %v3499_v34  ;;  %v3685_v60 = vsub.s32 4, %v3661_v47 }
 0x359   : > { %v2019_v30 = vxor.u32 2147483648, %v2018_v19  ;;  %v6796_v44 = vsub.s32 %v3659_v37, %v3662_v28  ;;  %v1844_v40 = vshrl.u32 %v1843_v53, 5  ;;  %v1848_v52 = vshll.u32 %v4722_v5, %v1845_v54 }
 0x35a   : > { %v1849_v33 = vshrl.u32 %v4723_v9, %v1846_v46  ;;  %v1851_v38 = vshll.u32 %v4723_v9, %v1845_v54  ;;  %v1852_v49 = vshrl.u32 %v4724_v11, %v1846_v46  ;;  %vm6806_vm12 = vcmp.le.f32.partialorder %v3599_v0, 0.7853982 }
 0x35b   : > { %v2020_v51 = vsel %vm1937_vm13, %v2019_v30, %v2018_v19  ;;  %v3665_v8 = vsub.s32 0, %v6796_v44  ;;  %v1854_v2 = vshll.u32 %v4724_v11, %v1845_v54  ;;  %v1855_v17 = vshrl.u32 %v4725_v13, %v1846_v46 }
 0x35c   : > { %v2023_v12 = vsel %vm6768_vm3, %v6594_v39, %v2020_v51  ;;  %v1850_v50 = vor.u32 %v1849_v33, %v1848_v52  ;;  %v1857_v3 = vshll.u32 %v4725_v13, %v1845_v54  ;;  %v1858_v18 = vshrl.u32 %v4726_v15, %v1846_v46 }
 0x35d   : > { %4607 = vcosq.f32 %v2023_v12  ;;  %v4218_v0 = vmin.u32 %v3665_v8, %v6796_v44  ;;  %v1853_v21 = vor.u32 %v1852_v49, %v1851_v38  ;;  %v1856_v55 = vor.u32 %v1855_v17, %v1854_v2 }
 0x35e   : > { %4609 = vsinq.f32 %v2023_v12  ;;  %v1859_v62 = vor.u32 %v1858_v18, %v1857_v3  ;;  %v1860_v24 = vshll.u32 %v4726_v15, %v1845_v54  ;;  %v1861_v58 = vshrl.u32 %v4727_v22, %v1846_v46 }
 0x35f   : > { %v3655_v31 = vadd.s32 %v6757_v26, %v6762_v32  ;;  %v3667_v29 = vclz %v4218_v0  ;;  %v1879_v37 = vshll.u32 %v1839_v42, 8  ;;  %v3505_v20 = vadd.s32 1, %v4213_v57 }
 0x360   : > { %v3686_v4 = vsel %vm3601_vm10, %v3685_v60, %v3661_v47  ;;  %v1847_v36 = vshrl.u32 %v4722_v5, %v1846_v46  ;;  %v1862_v14 = vor.u32 %v1861_v58, %v1860_v24  ;;  %vm1863_vm11 = vcmp.lt.s32.totalorder %v1844_v40, 1 }
 0x361   : > { %v4219_v61 = vadd.s32 4294967294, %v3667_v29  ;;  %vm1865_vm13 = vcmp.lt.s32.totalorder %v1844_v40, 3  ;;  %vm1866_vm14 = vcmp.lt.s32.totalorder %v1844_v40, 4  ;;  %v1871_v6 = vsel %vm1863_vm11, %v1850_v50, %v1853_v21 }
 0x362   : > { %v1868_v35 = vsel %vm1866_vm14, %v1856_v55, 2102212464  ;;  %v1872_v25 = vsel %vm1866_vm14, %v1859_v62, 920167782  ;;  %v1875_v16 = vsel %vm1863_vm11, %v1853_v21, %v1856_v55  ;;  %v1876_v26 = vsel %vm1866_vm14, %v1862_v14, 1326507024 }
 0x363   : > { %vm4220_vm15 = vcmp.lt.s32.totalorder %v4219_v61, 0  ;;  %vm1864_vm0 = vcmp.lt.s32.totalorder %v1844_v40, 2  ;;  %v1873_v32 = vsel %vm1865_vm13, %v1856_v55, %v1872_v25  ;;  %v1877_v63 = vsel %vm1865_vm13, %v1859_v62, %v1876_v26 }
 0x364   : > { %v3670_v34 = vsel %vm4220_vm15, 0, %v4219_v61  ;;  %v3688_v41 = vsel %vm6806_vm12, 0, %v3686_v4  ;;  %v1874_v56 = vsel %vm1864_vm0, %v1871_v6, %v1873_v32  ;;  %v1878_v47 = vsel %vm1864_vm0, %v1875_v16, %v1877_v63 }
 0x365   : > { %v3671_v53 = vsub.s32 32, %v3670_v34  ;;  %v3675_v23 = vsub.s32 4294967266, %v3670_v34  ;;  %v1867_v54 = vsel %vm1863_vm11, %v1847_v36, %v1850_v50  ;;  %v1869_v45 = vsel %vm1865_vm13, %v1853_v21, %v1868_v35 }
 0x366   : > { %v6836_v19 = vmul.u32.u64.low %v1879_v37, %v1878_v47  ;;  %v6837_v28 = vmul.u32.u64.high %v1879_v37, %v1878_v47, %v6836_v19  ;;  %v6839_v42 = vmul.u32.u64.low %v1879_v37, %v1874_v56  ;;  %v6840_v46 = vmul.u32.u64.high %v1879_v37, %v1874_v56, %v6839_v42  ;;  %v4293_v56 = vpop.f32.mrf.mxu0 }
 0x367   : > { %vm2027_vm1 = vweird.f32 %v6594_v39  ;;  %v3672_v57 = vshll.u32 %v6796_v44, %v3670_v34  ;;  %v3673_v30 = vshrl.u32 %v3655_v31, %v3671_v53  ;;  %v3676_v60 = vadd.s32 127, %v3675_v23 }
 0x368   : > { %vm3506_vm2 = vcmp.gt.s32.totalorder %v3505_v20, 0  ;;  %v3692_v52 = vadd.s32 3, %v3688_v41  ;;  %v1870_v33 = vsel %vm1864_vm0, %v1867_v54, %v1869_v45  ;;  %v3502_v38 = vand.u32 8388607, %v3495_v27 }
 0x369   : > { %v3507_v49 = vsel %vm3506_vm2, %v3505_v20, 0  ;;  %vm2030_vm3 = vcmp.lt.s32.totalorder %v6791_v43, 2  ;;  %v3674_v51 = vor.u32 %v3673_v30, %v3672_v57  ;;  %v3677_v8 = vshll.u32 %v3676_v60, 23 }
 0x36a   : > { %v3509_v2 = vand.u32 31, %v3507_v49  ;;  %v4608_v17 = vpop.eup %4607  ;;  %vm2031_vm4 = vcmp.eq.s32.totalorder %v6791_v43, 0  ;;  %vm2034_vm5 = vcmp.eq.s32.totalorder %v6791_v43, 2  ;;  %vm1888_vm6 = vc.u32 %v6837_v28, %v6839_v42 }
 0x36b   : > { %v1889_v44 = vadd.s32 1, %v6840_v46  ;;  %v4610_v40 = vpop.eup %4609  ;;  %v2035_v12 = vxor.u32 2147483648, %v4608_v17  ;;  %v3678_v50 = vor.u32 4788187, %v3677_v8  ;;  %v1886_v3 = vmul.u32 %v1879_v37, %v1870_v33 }
 0x36c   : > { %v3510_v18 = vsub.s32 32, %v3509_v2  ;;  %v2032_v0 = vxor.u32 2147483648, %v4610_v40  ;;  %v6854_v21 = vand.u32 3, %v3692_v52  ;;  %v3503_v62 = vor.u32 8388608, %v3502_v38  ;;  %v6884_v52 = vld [vmem:[%s7328_s2] ss:$0 sm:$0xff] }
 0x36d   : > { %v1890_v55 = vsel %vm1888_vm6, %v1889_v44, %v6840_v46  ;;  %v2036_v24 = vsel %vm2034_vm5, %v2035_v12, %v4610_v40  ;;  %v3679_v58 = vand.u32 2147483647, %v3678_v50  ;;  %v3681_v31 = vcvt.s32.f32 %v3674_v51 }
 0x36e   : > { %v1891_v29 = vadd.s32 %v1890_v55, %v1886_v3  ;;  %v2033_v20 = vsel %vm2031_vm4, %v4608_v17, %v2032_v0  ;;  %v6859_v4 = vshrl.u32 %v3507_v49, 5  ;;  %v3513_v36 = vshrl.u32 %v4723_v9, %v3510_v18  ;;  %v4317_v55 = vpop.f32.mrf.mxu1 }
 0x36f   : > { %v3516_v37 = vshrl.u32 %v4724_v11, %v3510_v18  ;;  %v2037_v14 = vsel %vm2030_vm3, %v2033_v20, %v2036_v24  ;;  %v3682_v61 = vmul.f32 %v3681_v31, %v3679_v58  ;;  %v3519_v35 = vshrl.u32 %v4725_v13, %v3510_v18 }
 0x370   : > { %v1892_v6 = vadd.s32 536870912, %v1891_v29  ;;  %v2038_v25 = vsel %vm2027_vm1, nan, %v2037_v14  ;;  %v3512_v16 = vshll.u32 %v4722_v5, %v3509_v2  ;;  %v3515_v26 = vshll.u32 %v4723_v9, %v3509_v2 }
 0x371   : > { %v3518_v32 = vshll.u32 %v4724_v11, %v3509_v2  ;;  %3924 = vst [vmem:[%s5188_s10 + $0x68] sm:$0xff] %v2038_v25  ;;  %v3683_v63 = vxor.u32 2147483648, %v3682_v61  ;;  %v3521_v41 = vshll.u32 %v4725_v13, %v3509_v2  ;;  %v3522_v43 = vshrl.u32 %v4726_v15, %v3510_v18 }
 0x372   : > { %v1893_v34 = vshrl.u32 %v1892_v6, 30  ;;  %v3514_v47 = vor.u32 %v3513_v36, %v3512_v16  ;;  %v3517_v53 = vor.u32 %v3516_v37, %v3515_v26  ;;  %v3524_v23 = vshll.u32 %v4726_v15, %v3509_v2 }
 0x373   : > { %v3525_v39 = vshrl.u32 %v4727_v22, %v3510_v18  ;;  %v3684_v54 = vsel %vm3601_vm10, %v3683_v63, %v3682_v61  ;;  %v3520_v19 = vor.u32 %v3519_v35, %v3518_v32  ;;  %v3523_v46 = vor.u32 %v3522_v43, %v3521_v41 }
 0x374   : > { %v1894_v45 = vshll.u32 %v1893_v34, 30  ;;  %v3687_v57 = vsel %vm6806_vm12, %v6641_v48, %v3684_v54  ;;  %v3543_v60 = vshll.u32 %v3503_v62, 8  ;;  %v6887_v33 = vadd.f32 %v6884_v52, %v4293_v56 }
 0x375   : > { %v3526_v30 = vor.u32 %v3525_v39, %v3524_v23  ;;  %4611 = vcosq.f32 %v3687_v57  ;;  %v3511_v49 = vshrl.u32 %v4722_v5, %v3510_v18  ;;  %vm3527_vm7 = vcmp.lt.s32.totalorder %v6859_v4, 1 }
 0x376   : > { %v6889_v38 = vsub.s32 %v1891_v29, %v1894_v45  ;;  %4613 = vsinq.f32 %v3687_v57  ;;  %vm3528_vm8 = vcmp.lt.s32.totalorder %v6859_v4, 2  ;;  %vm3530_vm9 = vcmp.lt.s32.totalorder %v6859_v4, 4 }
 0x377   : > { %v3535_v59 = vsel %vm3527_vm7, %v3514_v47, %v3517_v53  ;;  %vm3529_vm10 = vcmp.lt.s32.totalorder %v6859_v4, 3  ;;  %v3532_v8 = vsel %vm3530_vm9, %v3520_v19, 2102212464  ;;  %v3536_v2 = vsel %vm3530_vm9, %v3523_v46, 920167782 }
 0x378   : > { %v1897_v51 = vsub.s32 0, %v6889_v38  ;;  %v1917_v17 = vsub.s32 4, %v1893_v34  ;;  %v3537_v44 = vsel %vm3529_vm10, %v3520_v19, %v3536_v2  ;;  %v3539_v40 = vsel %vm3527_vm7, %v3517_v53, %v3520_v19 }
 0x379   : > { %v3540_v12 = vsel %vm3530_vm9, %v3526_v30, 1326507024  ;;  %v3531_v3 = vsel %vm3527_vm7, %v3511_v49, %v3514_v47  ;;  %v3538_v18 = vsel %vm3528_vm8, %v3535_v59, %v3537_v44  ;;  %v3533_v62 = vsel %vm3529_vm10, %v3517_v53, %v3532_v8 }
 0x37a   : > { %v4150_v50 = vmin.u32 %v1897_v51, %v6889_v38  ;;  %v3541_v0 = vsel %vm3529_vm10, %v3523_v46, %v3540_v12  ;;  %v6902_v58 = vmul.u32.u64.low %v3543_v60, %v3538_v18  ;;  %v6903_v31 = vmul.u32.u64.high %v3543_v60, %v3538_v18, %v6902_v58 }
 0x37b   : > { %v3542_v24 = vsel %vm3528_vm8, %v3539_v40, %v3541_v0  ;;  %vm1833_vm12 = vcmp.lt.s32.totalorder %v6751_v7, 0  ;;  %v6911_v37 = vadd.f32 %v6884_v52, %v4317_v55  ;;  %vm6915_vm11 = vcmp.le.f32.partialorder %v1831_v1, 0.7853982  ;;  %v494_v0 = vpop.f32.mrf.mxu0 }
 0x37c   : > { %v1899_v29 = vclz %v4150_v50  ;;  %v6907_v20 = vmul.u32.u64.low %v3543_v60, %v3542_v24  ;;  %v6908_v36 = vmul.u32.u64.high %v3543_v60, %v3542_v24, %v6907_v20  ;;  %v3534_v6 = vsel %vm3528_vm8, %v3531_v3, %v3533_v62 }
 0x37d   : > { %v2146_v35 = vand.u32 2139095040, %v6887_v33  ;;  %vm3694_vm13 = vcmp.lt.s32.totalorder %v6854_v21, 2  ;;  %vm3695_vm14 = vcmp.eq.s32.totalorder %v6854_v21, 0  ;;  %v1918_v25 = vsel %vm1833_vm12, %v1917_v17, %v1893_v34 }
 0x37e   : > { %v4151_v61 = vadd.s32 4294967294, %v1899_v29  ;;  %v3553_v16 = vadd.s32 1, %v6903_v31  ;;  %v2143_v1 = vand.u32 2147483647, %v6887_v33  ;;  %vm3691_vm15 = vweird.f32 %v6641_v48 }
 0x37f   : > { %vm3698_vm0 = vcmp.eq.s32.totalorder %v6854_v21, 2  ;;  %v1887_v4 = vadd.s32 %v6839_v42, %v6837_v28  ;;  %v2147_v26 = vshrl.u32 %v2146_v35, 23  ;;  %v3550_v63 = vmul.u32 %v3543_v60, %v3534_v6 }
 0x380   : > { %vm4152_vm1 = vcmp.lt.s32.totalorder %v4151_v61, 0  ;;  %vm3552_vm2 = vc.u32 %v6908_v36, %v6902_v58  ;;  %v3810_v34 = vand.u32 2139095040, %v6911_v37  ;;  %v1920_v56 = vsel %vm6915_vm11, 0, %v1918_v25 }
 0x381   : > { %v1902_v32 = vsel %vm4152_vm1, 0, %v4151_v61  ;;  %v3554_v47 = vsel %vm3552_vm2, %v3553_v16, %v6903_v31  ;;  %v4161_v39 = vadd.s32 4294967169, %v2147_v26  ;;  %v2150_v28 = vand.u32 8388607, %v2143_v1 }
 0x382   : > { %v1903_v41 = vsub.s32 32, %v1902_v32  ;;  %v1907_v43 = vsub.s32 4294967266, %v1902_v32  ;;  %v4612_v53 = vpop.eup %4611  ;;  %v3555_v23 = vadd.s32 %v3554_v47, %v3550_v63  ;;  %v3807_v42 = vand.u32 2147483647, %v6911_v37 }
 0x383   : > { %v4614_v54 = vpop.eup %4613  ;;  %v3699_v45 = vxor.u32 2147483648, %v4612_v53  ;;  %v1904_v19 = vshll.u32 %v6889_v38, %v1902_v32  ;;  %v2153_v49 = vadd.s32 1, %v4161_v39  ;;  %v3811_v59 = vshrl.u32 %v3810_v34, 23 }
 0x384   : > { %v1905_v46 = vshrl.u32 %v1887_v4, %v1903_v41  ;;  %v1908_v57 = vadd.s32 127, %v1907_v43  ;;  %v3696_v30 = vxor.u32 2147483648, %v4614_v54  ;;  %v3556_v60 = vadd.s32 536870912, %v3555_v23 }
 0x385   : > { %v3700_v51 = vsel %vm3698_vm0, %v3699_v45, %v4614_v54  ;;  %v1924_v17 = vadd.s32 3, %v1920_v56  ;;  %v2151_v12 = vor.u32 8388608, %v2150_v28  ;;  %vm2154_vm3 = vcmp.gt.s32.totalorder %v2153_v49, 0 }
 0x386   : > { %v1906_v8 = vor.u32 %v1905_v46, %v1904_v19  ;;  %v1909_v2 = vshll.u32 %v1908_v57, 23  ;;  %v3697_v44 = vsel %vm3695_vm14, %v4612_v53, %v3696_v30  ;;  %v6946_v40 = vshrl.u32 %v3556_v60, 30 }
 0x387   : > { %v3701_v38 = vsel %vm3694_vm13, %v3697_v44, %v3700_v51  ;;  %v2155_v3 = vsel %vm2154_vm3, %v2153_v49, 0  ;;  %v6952_v18 = vand.u32 8388607, %v3807_v42  ;;  %v4225_v24 = vadd.s32 4294967169, %v3811_v59 }
 0x388   : > { %v1910_v50 = vor.u32 4788187, %v1909_v2  ;;  %v3702_v55 = vsel %vm3691_vm15, nan, %v3701_v38  ;;  %v3558_v62 = vshll.u32 %v6946_v40, 30  ;;  %v1913_v29 = vcvt.s32.f32 %v1906_v8 }
 0x389   : > { %3940 = vst [vmem:[%s5188_s10 + $0xe8] sm:$0xff] %v3702_v55  ;;  %v2157_v20 = vand.u32 31, %v2155_v3  ;;  %v6958_v61 = vand.u32 3, %v1924_v17  ;;  %v3551_v21 = vadd.s32 %v6902_v58, %v6908_v36  ;;  %v6965_v35 = vadd.f32 %v6884_v52, %v494_v0 }
 0x38a   : > { %v1911_v31 = vand.u32 2147483647, %v1910_v50  ;;  %v6962_v6 = vsub.s32 %v3555_v23, %v3558_v62  ;;  %v6967_v16 = vshll.u32 %v2151_v12, 8  ;;  %v3815_v4 = vor.u32 8388608, %v6952_v18 }
 0x38b   : > { %v2158_v48 = vsub.s32 32, %v2157_v20  ;;  %v2156_v32 = vshrl.u32 %v2155_v3, 5  ;;  %v2160_v63 = vshll.u32 %v4722_v5, %v2157_v20  ;;  %v3817_v34 = vadd.s32 1, %v4225_v24 }
 0x38c   : > { %v1914_v25 = vmul.f32 %v1913_v29, %v1911_v31  ;;  %v3561_v26 = vsub.s32 0, %v6962_v6  ;;  %v2163_v36 = vshll.u32 %v4723_v9, %v2157_v20  ;;  %v2166_v47 = vshll.u32 %v4724_v11, %v2157_v20 }
 0x38d   : > { %v2161_v58 = vshrl.u32 %v4723_v9, %v2158_v48  ;;  %v2164_v43 = vshrl.u32 %v4724_v11, %v2158_v48  ;;  %v2167_v53 = vshrl.u32 %v4725_v13, %v2158_v48  ;;  %v2169_v23 = vshll.u32 %v4725_v13, %v2157_v20 }
 0x38e   : > { %v1915_v41 = vxor.u32 2147483648, %v1914_v25  ;;  %v4214_v56 = vmin.u32 %v3561_v26, %v6962_v6  ;;  %v2170_v45 = vshrl.u32 %v4726_v15, %v2158_v48  ;;  %v3581_v57 = vsub.s32 4, %v6946_v40 }
 0x38f   : > { %v2162_v28 = vor.u32 %v2161_v58, %v2160_v63  ;;  %v2165_v54 = vor.u32 %v2164_v43, %v2163_v36  ;;  %vm3818_vm4 = vcmp.gt.s32.totalorder %v3817_v34, 0  ;;  %v2168_v30 = vor.u32 %v2167_v53, %v2166_v47 }
 0x390   : > { %v1916_v39 = vsel %vm1833_vm12, %v1915_v41, %v1914_v25  ;;  %v3563_v46 = vclz %v4214_v56  ;;  %v2171_v60 = vor.u32 %v2170_v45, %v2169_v23  ;;  %vm2175_vm5 = vcmp.lt.s32.totalorder %v2156_v32, 1 }
 0x391   : > { %v1919_v19 = vsel %vm6915_vm11, %v6751_v7, %v1916_v39  ;;  %vm3497_vm6 = vcmp.lt.s32.totalorder %v6773_v10, 0  ;;  %v2172_v59 = vshll.u32 %v4726_v15, %v2157_v20  ;;  %v2173_v51 = vshrl.u32 %v4727_v22, %v2158_v48 }
 0x392   : > { %4615 = vcosq.f32 %v1919_v19  ;;  %v4215_v49 = vadd.s32 4294967294, %v3563_v46  ;;  %v2159_v8 = vshrl.u32 %v4722_v5, %v2158_v48  ;;  %vm2177_vm7 = vcmp.lt.s32.totalorder %v2156_v32, 3 }
 0x393   : > { %4617 = vsinq.f32 %v1919_v19  ;;  %vm2178_vm8 = vcmp.lt.s32.totalorder %v2156_v32, 4  ;;  %v2183_v14 = vsel %vm2175_vm5, %v2162_v28, %v2165_v54  ;;  %v2174_v2 = vor.u32 %v2173_v51, %v2172_v59 }
 0x394   : > { %vm4216_vm9 = vcmp.lt.s32.totalorder %v4215_v49, 0  ;;  %v2180_v17 = vsel %vm2178_vm8, %v2168_v30, 2102212464  ;;  %v2184_v44 = vsel %vm2178_vm8, %v2171_v60, 920167782  ;;  %v2179_v38 = vsel %vm2175_vm5, %v2159_v8, %v2162_v28 }
 0x395   : > { %v3566_v12 = vsel %vm4216_vm9, 0, %v4215_v49  ;;  %v2181_v50 = vsel %vm2177_vm7, %v2165_v54, %v2180_v17  ;;  %v2185_v3 = vsel %vm2177_vm7, %v2168_v30, %v2184_v44  ;;  %vm2176_vm10 = vcmp.lt.s32.totalorder %v2156_v32, 2 }
 0x396   : > { %v3567_v0 = vsub.s32 32, %v3566_v12  ;;  %v3571_v55 = vsub.s32 4294967266, %v3566_v12  ;;  %v2187_v62 = vsel %vm2175_vm5, %v2165_v54, %v2168_v30  ;;  %v3568_v24 = vshll.u32 %v6962_v6, %v3566_v12 }
 0x397   : > { %v2186_v31 = vsel %vm2176_vm10, %v2183_v14, %v2185_v3  ;;  %v2188_v29 = vsel %vm2178_vm8, %v2174_v2, 1326507024  ;;  %v3819_v20 = vsel %vm3818_vm4, %v3817_v34, 0  ;;  %v2182_v26 = vsel %vm2176_vm10, %v2179_v38, %v2181_v50 }
 0x398   : > { %v3569_v25 = vshrl.u32 %v3551_v21, %v3567_v0  ;;  %v3572_v48 = vadd.s32 127, %v3571_v55  ;;  %v2189_v63 = vsel %vm2177_vm7, %v2171_v60, %v2188_v29  ;;  %vm1927_vm12 = vcmp.eq.s32.totalorder %v6958_v61, 0 }
 0x399   : > { %v2190_v41 = vsel %vm2176_vm10, %v2187_v62, %v2189_v63  ;;  %v7003_v58 = vmul.u32.u64.low %v6967_v16, %v2186_v31  ;;  %v7004_v36 = vmul.u32.u64.high %v6967_v16, %v2186_v31, %v7003_v58  ;;  %v3821_v43 = vand.u32 31, %v3819_v20 }
 0x39a   : > { %vm1926_vm11 = vcmp.lt.s32.totalorder %v6958_v61, 2  ;;  %vm7010_vm13 = vcmp.le.f32.partialorder %v3495_v27, 0.7853982  ;;  %v3570_v21 = vor.u32 %v3569_v25, %v3568_v24  ;;  %v3573_v32 = vshll.u32 %v3572_v48, 23 }
 0x39b   : > { %v7015_v34 = vmul.u32.u64.low %v6967_v16, %v2190_v41  ;;  %v7016_v56 = vmul.u32.u64.high %v6967_v16, %v2190_v41, %v7015_v34  ;;  %vm1923_vm14 = vweird.f32 %v6751_v7  ;;  %vm1930_vm15 = vcmp.eq.s32.totalorder %v6958_v61, 2 }
 0x39c   : > { %v3582_v47 = vsel %vm3497_vm6, %v3581_v57, %v6946_v40  ;;  %v3822_v53 = vsub.s32 32, %v3821_v43  ;;  %v7025_v27 = vshll.u32 %v3815_v4, 8  ;;  %v3574_v23 = vor.u32 4788187, %v3573_v32 }
 0x39d   : > { %v2198_v39 = vmul.u32 %v6967_v16, %v2182_v26  ;;  %v7028_v28 = vshrl.u32 %v3819_v20, 5  ;;  %v3824_v54 = vshll.u32 %v4722_v5, %v3821_v43  ;;  %v2201_v45 = vadd.s32 1, %v7004_v36 }
 0x39e   : > { %v3825_v19 = vshrl.u32 %v4723_v9, %v3822_v53  ;;  %v3827_v46 = vshll.u32 %v4723_v9, %v3821_v43  ;;  %v3830_v40 = vshll.u32 %v4724_v11, %v3821_v43  ;;  %v3575_v30 = vand.u32 2147483647, %v3574_v23 }
 0x39f   : > { %v4616_v57 = vpop.eup %4615  ;;  %v3577_v18 = vcvt.s32.f32 %v3570_v21  ;;  %vm2200_vm0 = vc.u32 %v7016_v56, %v7003_v58  ;;  %v3828_v16 = vshrl.u32 %v4724_v11, %v3822_v53  ;;  %v3831_v59 = vshrl.u32 %v4725_v13, %v3822_v53 }
 0x3a0   : > { %v4618_v4 = vpop.eup %4617  ;;  %v1931_v60 = vxor.u32 2147483648, %v4616_v57  ;;  %v2202_v49 = vsel %vm2200_vm0, %v2201_v45, %v7004_v36  ;;  %v3833_v51 = vshll.u32 %v4725_v13, %v3821_v43  ;;  %v3836_v17 = vshll.u32 %v4726_v15, %v3821_v43 }
 0x3a1   : > { %v1928_v8 = vxor.u32 2147483648, %v4618_v4  ;;  %v3578_v14 = vmul.f32 %v3577_v18, %v3575_v30  ;;  %v2203_v2 = vadd.s32 %v2202_v49, %v2198_v39  ;;  %v3826_v12 = vor.u32 %v3825_v19, %v3824_v54 }
 0x3a2   : > { %v1932_v44 = vsel %vm1930_vm15, %v1931_v60, %v4618_v4  ;;  %v3834_v38 = vshrl.u32 %v4726_v15, %v3822_v53  ;;  %v3837_v50 = vshrl.u32 %v4727_v22, %v3822_v53  ;;  %v3829_v62 = vor.u32 %v3828_v16, %v3827_v46 }
 0x3a3   : > { %v1929_v3 = vsel %vm1927_vm12, %v4616_v57, %v1928_v8  ;;  %v3579_v0 = vxor.u32 2147483648, %v3578_v14  ;;  %v2204_v55 = vadd.s32 536870912, %v2203_v2  ;;  %v3584_v31 = vsel %vm7010_vm13, 0, %v3582_v47 }
 0x3a4   : > { %v1933_v24 = vsel %vm1926_vm11, %v1929_v3, %v1932_v44  ;;  %v3832_v29 = vor.u32 %v3831_v59, %v3830_v40  ;;  %v3835_v20 = vor.u32 %v3834_v38, %v3833_v51  ;;  %v3838_v63 = vor.u32 %v3837_v50, %v3836_v17  ;;  %v574_v50 = vpop.f32.mrf.mxu1 }
 0x3a5   : > { %v1934_v25 = vsel %vm1923_vm14, nan, %v1933_v24  ;;  %v3580_v48 = vsel %vm3497_vm6, %v3579_v0, %v3578_v14  ;;  %v2205_v26 = vshrl.u32 %v2204_v55, 30  ;;  %v3823_v61 = vshrl.u32 %v4722_v5, %v3822_v53 }
 0x3a6   : > { %3923 = vst [vmem:[%s5188_s10 + $0x60] sm:$0xff] %v1934_v25  ;;  %v3583_v41 = vsel %vm7010_vm13, %v6773_v10, %v3580_v48  ;;  %vm3839_vm1 = vcmp.lt.s32.totalorder %v7028_v28, 1  ;;  %vm3841_vm2 = vcmp.lt.s32.totalorder %v7028_v28, 3  ;;  %vm3842_vm3 = vcmp.lt.s32.totalorder %v7028_v28, 4 }
 0x3a7   : > { %4619 = vcosq.f32 %v3583_v41  ;;  %v2206_v36 = vshll.u32 %v2205_v26, 30  ;;  %v3847_v7 = vsel %vm3839_vm1, %v3826_v12, %v3829_v62  ;;  %v3844_v43 = vsel %vm3842_vm3, %v3832_v29, 2102212464 }
 0x3a8   : > { %4621 = vsinq.f32 %v3583_v41  ;;  %v3848_v21 = vsel %vm3842_vm3, %v3835_v20, 920167782  ;;  %v3851_v6 = vsel %vm3839_vm1, %v3829_v62, %v3832_v29  ;;  %vm3840_vm4 = vcmp.lt.s32.totalorder %v7028_v28, 2 }
 0x3a9   : > { %v7068_v32 = vsub.s32 %v2203_v2, %v2206_v36  ;;  %v3849_v34 = vsel %vm3841_vm2, %v3832_v29, %v3848_v21  ;;  %v3852_v47 = vsel %vm3842_vm3, %v3838_v63, 1326507024  ;;  %v3588_v53 = vadd.s32 3, %v3584_v31 }
 0x3aa   : > { %v2229_v23 = vsub.s32 4, %v2205_v26  ;;  %v3850_v39 = vsel %vm3840_vm4, %v3847_v7, %v3849_v34  ;;  %v3853_v54 = vsel %vm3841_vm2, %v3835_v20, %v3852_v47  ;;  %v3843_v19 = vsel %vm3839_vm1, %v3823_v61, %v3826_v12 }
 0x3ab   : > { %v2209_v45 = vsub.s32 0, %v7068_v32  ;;  %v3845_v46 = vsel %vm3841_vm2, %v3829_v62, %v3844_v43  ;;  %v3854_v40 = vsel %vm3840_vm4, %v3851_v6, %v3853_v54  ;;  %vm2145_vm5 = vcmp.lt.s32.totalorder %v6887_v33, 0 }
 0x3ac   : > { %v7085_v57 = vmul.u32.u64.low %v7025_v27, %v3854_v40  ;;  %v7086_v30 = vmul.u32.u64.high %v7025_v27, %v3854_v40, %v7085_v57  ;;  %v7089_v18 = vmul.u32.u64.low %v7025_v27, %v3850_v39  ;;  %v7090_v16 = vmul.u32.u64.high %v7025_v27, %v3850_v39, %v7089_v18 }
 0x3ad   : > { %v4162_v4 = vmin.u32 %v2209_v45, %v7068_v32  ;;  %v3589_v60 = vand.u32 3, %v3588_v53  ;;  %v2230_v49 = vsel %vm2145_vm5, %v2229_v23, %v2205_v26  ;;  %v3846_v59 = vsel %vm3840_vm4, %v3843_v19, %v3845_v46 }
 0x3ae   : > { %v2042_v51 = vand.u32 2139095040, %v6965_v35  ;;  %vm7101_vm6 = vcmp.le.f32.partialorder %v2143_v1, 0.7853982  ;;  %vm3864_vm7 = vc.u32 %v7086_v30, %v7089_v18  ;;  %v3865_v2 = vadd.s32 1, %v7090_v16 }
 0x3af   : > { %v2211_v8 = vclz %v4162_v4  ;;  %v2232_v12 = vsel %vm7101_vm6, 0, %v2230_v49  ;;  %v3862_v28 = vmul.u32 %v7025_v27, %v3846_v59  ;;  %v2039_v38 = vand.u32 2147483647, %v6965_v35 }
 0x3b0   : > { %v2043_v17 = vshrl.u32 %v2042_v51, 23  ;;  %vm3590_vm8 = vcmp.lt.s32.totalorder %v3589_v60, 2  ;;  %vm3591_vm9 = vcmp.eq.s32.totalorder %v3589_v60, 0  ;;  %v3866_v1 = vsel %vm3864_vm7, %v3865_v2, %v7090_v16 }
 0x3b1   : > { %v4163_v44 = vadd.s32 4294967294, %v2211_v8  ;;  %vm3594_vm10 = vcmp.eq.s32.totalorder %v3589_v60, 2  ;;  %v2199_v0 = vadd.s32 %v7003_v58, %v7016_v56  ;;  %v3867_v55 = vadd.s32 %v3866_v1, %v3862_v28 }
 0x3b2   : > { %v4157_v3 = vadd.s32 4294967169, %v2043_v17  ;;  %v2236_v31 = vadd.s32 3, %v2232_v12  ;;  %v7115_v27 = vadd.f32 %v6884_v52, %v574_v50  ;;  %v2046_v63 = vand.u32 8388607, %v2039_v38 }
 0x3b3   : > { %vm4164_vm12 = vcmp.lt.s32.totalorder %v4163_v44, 0  ;;  %v3868_v58 = vadd.s32 536870912, %v3867_v55  ;;  %vm3587_vm13 = vweird.f32 %v6773_v10  ;;  %v3863_v46 = vadd.s32 %v7089_v18, %v7086_v30 }
 0x3b4   : > { %v4620_v62 = vpop.eup %4619  ;;  %v2214_v24 = vsel %vm4164_vm12, 0, %v4163_v44  ;;  %v2049_v29 = vadd.s32 1, %v4157_v3  ;;  %v3706_v34 = vand.u32 2139095040, %v7115_v27  ;;  %v7129_v19 = vand.u32 3, %v2236_v31 }
 0x3b5   : > { %v4622_v20 = vpop.eup %4621  ;;  %v3595_v25 = vxor.u32 2147483648, %v4620_v62  ;;  %v2215_v48 = vsub.s32 32, %v2214_v24  ;;  %v2219_v26 = vsub.s32 4294967266, %v2214_v24  ;;  %v2216_v61 = vshll.u32 %v7068_v32, %v2214_v24 }
 0x3b6   : > { %v3592_v41 = vxor.u32 2147483648, %v4622_v20  ;;  %vm2050_vm11 = vcmp.gt.s32.totalorder %v2049_v29, 0  ;;  %v7122_v21 = vshrl.u32 %v3868_v58, 30  ;;  %v2047_v57 = vor.u32 8388608, %v2046_v63 }
 0x3b7   : > { %v3596_v56 = vsel %vm3594_vm10, %v3595_v25, %v4622_v20  ;;  %v2217_v36 = vshrl.u32 %v2199_v0, %v2215_v48  ;;  %v2220_v7 = vadd.s32 127, %v2219_v26  ;;  %v2051_v43 = vsel %vm2050_vm11, %v2049_v29, 0 }
 0x3b8   : > { %v3593_v52 = vsel %vm3591_vm9, %v4620_v62, %v3592_v41  ;;  %v2053_v6 = vand.u32 31, %v2051_v43  ;;  %v3870_v39 = vshll.u32 %v7122_v21, 30  ;;  %v3707_v10 = vshrl.u32 %v3706_v34, 23 }
 0x3b9   : > { %v3597_v47 = vsel %vm3590_vm8, %v3593_v52, %v3596_v56  ;;  %v2218_v32 = vor.u32 %v2217_v36, %v2216_v61  ;;  %v2221_v53 = vshll.u32 %v2220_v7, 23  ;;  %v2052_v17 = vshrl.u32 %v2051_v43, 5 }
 0x3ba   : > { %v3598_v23 = vsel %vm3587_vm13, nan, %v3597_v47  ;;  %v2054_v54 = vsub.s32 32, %v2053_v6  ;;  %v7132_v40 = vsub.s32 %v3867_v55, %v3870_v39  ;;  %v2056_v49 = vshll.u32 %v4722_v5, %v2053_v6 }
 0x3bb   : > { %3939 = vst [vmem:[%s5188_s10 + $0xe0] sm:$0xff] %v3598_v23  ;;  %v2222_v45 = vor.u32 4788187, %v2221_v53  ;;  %v2225_v60 = vcvt.s32.f32 %v2218_v32  ;;  %v2059_v8 = vshll.u32 %v4723_v9, %v2053_v6  ;;  %v2062_v2 = vshll.u32 %v4724_v11, %v2053_v6 }
 0x3bc   : > { %v2057_v16 = vshrl.u32 %v4723_v9, %v2054_v54  ;;  %v2060_v59 = vshrl.u32 %v4724_v11, %v2054_v54  ;;  %v3873_v51 = vsub.s32 0, %v7132_v40  ;;  %v2063_v30 = vshrl.u32 %v4725_v13, %v2054_v54 }
 0x3bd   : > { %v2223_v4 = vand.u32 2147483647, %v2222_v45  ;;  %v2065_v44 = vshll.u32 %v4725_v13, %v2053_v6  ;;  %v2066_v12 = vshrl.u32 %v4726_v15, %v2054_v54  ;;  %v2068_v62 = vshll.u32 %v4726_v15, %v2053_v6 }
 0x3be   : > { %v4226_v28 = vmin.u32 %v3873_v51, %v7132_v40  ;;  %v2058_v50 = vor.u32 %v2057_v16, %v2056_v49  ;;  %v2061_v1 = vor.u32 %v2060_v59, %v2059_v8  ;;  %v2064_v3 = vor.u32 %v2063_v30, %v2062_v2 }
 0x3bf   : > { %v2226_v18 = vmul.f32 %v2225_v60, %v2223_v4  ;;  %v2067_v55 = vor.u32 %v2066_v12, %v2065_v44  ;;  %v2069_v24 = vshrl.u32 %v4727_v22, %v2054_v54  ;;  %v3893_v29 = vsub.s32 4, %v7122_v21 }
 0x3c0   : > { %v3875_v31 = vclz %v4226_v28  ;;  %v2087_v20 = vshll.u32 %v2047_v57, 8  ;;  %v4221_v25 = vadd.s32 4294967169, %v3707_v10  ;;  %v2055_v26 = vshrl.u32 %v4722_v5, %v2054_v54 }
 0x3c1   : > { %v2227_v0 = vxor.u32 2147483648, %v2226_v18  ;;  %v2070_v63 = vor.u32 %v2069_v24, %v2068_v62  ;;  %vm2071_vm14 = vcmp.lt.s32.totalorder %v2052_v17, 1  ;;  %vm2073_vm15 = vcmp.lt.s32.totalorder %v2052_v17, 3 }
 0x3c2   : > { %v4227_v61 = vadd.s32 4294967294, %v3875_v31  ;;  %vm2074_vm0 = vcmp.lt.s32.totalorder %v2052_v17, 4  ;;  %v2079_v56 = vsel %vm2071_vm14, %v2058_v50, %v2061_v1  ;;  %vm2072_vm2 = vcmp.lt.s32.totalorder %v2052_v17, 2 }
 0x3c3   : > { %v2228_v48 = vsel %vm2145_vm5, %v2227_v0, %v2226_v18  ;;  %v2076_v58 = vsel %vm2074_vm0, %v2064_v3, 2102212464  ;;  %v2080_v36 = vsel %vm2074_vm0, %v2067_v55, 920167782  ;;  %v2075_v52 = vsel %vm2071_vm14, %v2055_v26, %v2058_v50 }
 0x3c4   : > { %v2231_v41 = vsel %vm7101_vm6, %v6887_v33, %v2228_v48  ;;  %vm4228_vm1 = vcmp.lt.s32.totalorder %v4227_v61, 0  ;;  %v2081_v7 = vsel %vm2073_vm15, %v2064_v3, %v2080_v36  ;;  %v2083_v6 = vsel %vm2071_vm14, %v2061_v1, %v2064_v3 }
 0x3c5   : > { %4623 = vcosq.f32 %v2231_v41  ;;  %v3878_v43 = vsel %vm4228_vm1, 0, %v4227_v61  ;;  %v2082_v14 = vsel %vm2072_vm2, %v2079_v56, %v2081_v7  ;;  %v2077_v32 = vsel %vm2073_vm15, %v2061_v1, %v2076_v58 }
 0x3c6   : > { %4625 = vsinq.f32 %v2231_v41  ;;  %v3879_v34 = vsub.s32 32, %v3878_v43  ;;  %v3883_v47 = vsub.s32 4294967266, %v3878_v43  ;;  %v2084_v53 = vsel %vm2074_vm0, %v2070_v63, 1326507024 }
 0x3c7   : > { %v3880_v23 = vshll.u32 %v7132_v40, %v3878_v43  ;;  %v2085_v39 = vsel %vm2073_vm15, %v2067_v55, %v2084_v53  ;;  %v7164_v54 = vmul.u32.u64.low %v2087_v20, %v2082_v14  ;;  %v7165_v45 = vmul.u32.u64.high %v2087_v20, %v2082_v14, %v7164_v54 }
 0x3c8   : > { %v3881_v57 = vshrl.u32 %v3863_v46, %v3879_v34  ;;  %v3884_v16 = vadd.s32 127, %v3883_v47  ;;  %v2086_v10 = vsel %vm2072_vm2, %v2083_v6, %v2085_v39  ;;  %v3713_v4 = vadd.s32 1, %v4221_v25 }
 0x3c9   : > { %vm3809_vm3 = vcmp.lt.s32.totalorder %v6911_v37, 0  ;;  %v7170_v60 = vmul.u32.u64.low %v2087_v20, %v2086_v10  ;;  %v7171_v49 = vmul.u32.u64.high %v2087_v20, %v2086_v10, %v7170_v60  ;;  %v2078_v40 = vsel %vm2072_vm2, %v2075_v52, %v2077_v32 }
 0x3ca   : > { %v3882_v59 = vor.u32 %v3881_v57, %v3880_v23  ;;  %v3885_v51 = vshll.u32 %v3884_v16, 23  ;;  %vm3714_vm4 = vcmp.gt.s32.totalorder %v3713_v4, 0  ;;  %vm7176_vm5 = vcmp.le.f32.partialorder %v3807_v42, 0.7853982 }
 0x3cb   : > { %v2097_v46 = vadd.s32 1, %v7165_v45  ;;  %v3703_v2 = vand.u32 2147483647, %v7115_v27  ;;  %v3715_v30 = vsel %vm3714_vm4, %v3713_v4, 0  ;;  %vm2238_vm6 = vcmp.lt.s32.totalorder %v7129_v19, 2 }
 0x3cc   : > { %v3886_v18 = vor.u32 4788187, %v3885_v51  ;;  %v3894_v17 = vsel %vm3809_vm3, %v3893_v29, %v7122_v21  ;;  %v3717_v44 = vand.u32 31, %v3715_v30  ;;  %vm2235_vm7 = vweird.f32 %v6887_v33 }
 0x3cd   : > { %vm2239_vm8 = vcmp.eq.s32.totalorder %v7129_v19, 0  ;;  %vm2242_vm9 = vcmp.eq.s32.totalorder %v7129_v19, 2  ;;  %v2094_v42 = vmul.u32 %v2087_v20, %v2078_v40  ;;  %vm2096_vm10 = vc.u32 %v7171_v49, %v7164_v54 }
 0x3ce   : > { %v3887_v12 = vand.u32 2147483647, %v3886_v18  ;;  %v3889_v28 = vcvt.s32.f32 %v3882_v59  ;;  %v2098_v50 = vsel %vm2096_vm10, %v2097_v46, %v7165_v45  ;;  %v3718_v1 = vsub.s32 32, %v3717_v44 }
 0x3cf   : > { %v3896_v3 = vsel %vm7176_vm5, 0, %v3894_v17  ;;  %v2099_v21 = vadd.s32 %v2098_v50, %v2094_v42  ;;  %v3710_v0 = vand.u32 8388607, %v3703_v2  ;;  %v7196_v55 = vshrl.u32 %v3715_v30, 5 }
 0x3d0   : > { %v3890_v24 = vmul.f32 %v3889_v28, %v3887_v12  ;;  %v3720_v31 = vshll.u32 %v4722_v5, %v3717_v44  ;;  %v3721_v29 = vshrl.u32 %v4723_v9, %v3718_v1  ;;  %v3723_v20 = vshll.u32 %v4723_v9, %v3717_v44 }
 0x3d1   : > { %v2100_v26 = vadd.s32 536870912, %v2099_v21  ;;  %v3724_v63 = vshrl.u32 %v4724_v11, %v3718_v1  ;;  %v3726_v41 = vshll.u32 %v4724_v11, %v3717_v44  ;;  %v3729_v56 = vshll.u32 %v4725_v13, %v3717_v44 }
 0x3d2   : > { %v4624_v62 = vpop.eup %4623  ;;  %v3891_v58 = vxor.u32 2147483648, %v3890_v24  ;;  %v3730_v36 = vshrl.u32 %v4726_v15, %v3718_v1  ;;  %v3722_v9 = vor.u32 %v3721_v29, %v3720_v31  ;;  %v3727_v52 = vshrl.u32 %v4725_v13, %v3718_v1 }
 0x3d3   : > { %v4626_v25 = vpop.eup %4625  ;;  %v2243_v48 = vxor.u32 2147483648, %v4624_v62  ;;  %v7207_v43 = vshrl.u32 %v2100_v26, 30  ;;  %v3732_v6 = vshll.u32 %v4726_v15, %v3717_v44  ;;  %v3733_v34 = vshrl.u32 %v4727_v22, %v3718_v1 }
 0x3d4   : > { %v2240_v61 = vxor.u32 2147483648, %v4626_v25  ;;  %v3892_v11 = vsel %vm3809_vm3, %v3891_v58, %v3890_v24  ;;  %v3725_v13 = vor.u32 %v3724_v63, %v3723_v20  ;;  %v3731_v39 = vor.u32 %v3730_v36, %v3729_v56 }
 0x3d5   : > { %v2244_v7 = vsel %vm2242_vm9, %v2243_v48, %v4626_v25  ;;  %v3895_v32 = vsel %vm7176_vm5, %v6911_v37, %v3892_v11  ;;  %v2102_v53 = vshll.u32 %v7207_v43, 30  ;;  %v3734_v45 = vor.u32 %v3733_v34, %v3732_v6 }
 0x3d6   : > { %v2241_v14 = vsel %vm2239_vm8, %v4624_v62, %v2240_v61  ;;  %4627 = vcosq.f32 %v3895_v32  ;;  %v3728_v22 = vor.u32 %v3727_v52, %v3726_v41  ;;  %v3900_v57 = vadd.s32 3, %v3896_v3 }
 0x3d7   : > { %v2245_v47 = vsel %vm2238_vm6, %v2241_v14, %v2244_v7  ;;  %4629 = vsinq.f32 %v3895_v32  ;;  %v2103_v15 = vsub.s32 %v2099_v21, %v2102_v53  ;;  %v3711_v19 = vor.u32 8388608, %v3710_v0 }
 0x3d8   : > { %v2246_v23 = vsel %vm2235_vm7, nan, %v2245_v47  ;;  %vm3735_vm12 = vcmp.lt.s32.totalorder %v7196_v55, 1  ;;  %v3719_v10 = vshrl.u32 %v4722_v5, %v3718_v1  ;;  %vm3738_vm11 = vcmp.lt.s32.totalorder %v7196_v55, 4 }
 0x3d9   : > { %3926 = vst [vmem:[%s5188_s10 + $0x78] sm:$0xff] %v2246_v23  ;;  %v2105_v16 = vsub.s32 0, %v2103_v15  ;;  %v3743_v33 = vsel %vm3735_vm12, %v3722_v9, %v3725_v13  ;;  %vm3736_vm13 = vcmp.lt.s32.totalorder %v7196_v55, 2  ;;  %vm3737_vm14 = vcmp.lt.s32.totalorder %v7196_v55, 3 }
 0x3da   : > { %v3744_v4 = vsel %vm3738_vm11, %v3731_v39, 920167782  ;;  %v3748_v60 = vsel %vm3738_vm11, %v3734_v45, 1326507024  ;;  %v3740_v51 = vsel %vm3738_vm11, %v3728_v22, 2102212464  ;;  %v3747_v8 = vsel %vm3735_vm12, %v3725_v13, %v3728_v22 }
 0x3db   : > { %v4158_v59 = vmin.u32 %v2105_v16, %v2103_v15  ;;  %v3745_v40 = vsel %vm3737_vm14, %v3728_v22, %v3744_v4  ;;  %v3749_v46 = vsel %vm3737_vm14, %v3731_v39, %v3748_v60  ;;  %v3751_v30 = vshll.u32 %v3711_v19, 8 }
 0x3dc   : > { %v3746_v5 = vsel %vm3736_vm13, %v3743_v33, %v3745_v40  ;;  %v3739_v17 = vsel %vm3735_vm12, %v3719_v10, %v3722_v9  ;;  %v3741_v44 = vsel %vm3737_vm14, %v3725_v13, %v3740_v51  ;;  %v3750_v42 = vsel %vm3736_vm13, %v3747_v8, %v3749_v46 }
 0x3dd   : > { %v2107_v18 = vclz %v4158_v59  ;;  %v7240_v12 = vmul.u32.u64.low %v3751_v30, %v3746_v5  ;;  %v7241_v28 = vmul.u32.u64.high %v3751_v30, %v3746_v5, %v7240_v12  ;;  %v3901_v50 = vand.u32 3, %v3900_v57 }
 0x3de   : > { %v7243_v3 = vmul.u32.u64.low %v3751_v30, %v3750_v42  ;;  %v7244_v21 = vmul.u32.u64.high %v3751_v30, %v3750_v42, %v7243_v3  ;;  %v3742_v0 = vsel %vm3736_vm13, %v3739_v17, %v3741_v44  ;;  %v2095_v29 = vadd.s32 %v7164_v54, %v7171_v49 }
 0x3df   : > { %v4159_v1 = vadd.s32 4294967294, %v2107_v18  ;;  %v3761_v24 = vadd.s32 1, %v7241_v28  ;;  %vm3906_vm0 = vcmp.eq.s32.totalorder %v3901_v50, 2  ;;  %v3758_v41 = vmul.u32 %v3751_v30, %v3742_v0 }
 0x3e0   : > { %vm3760_vm1 = vc.u32 %v7244_v21, %v7240_v12  ;;  %vm3903_vm2 = vcmp.eq.s32.totalorder %v3901_v50, 0  ;;  %vm3902_vm3 = vcmp.lt.s32.totalorder %v3901_v50, 2  ;;  %vm3899_vm4 = vweird.f32 %v6911_v37 }
 0x3e1   : > { %vm4160_vm15 = vcmp.lt.s32.totalorder %v4159_v1, 0  ;;  %v3762_v56 = vsel %vm3760_vm1, %v3761_v24, %v7241_v28  ;;  %vm2041_vm5 = vcmp.lt.s32.totalorder %v6965_v35, 0  ;;  %v2125_v45 = vsub.s32 4, %v7207_v43 }
 0x3e2   : > { %v2110_v62 = vsel %vm4160_vm15, 0, %v4159_v1  ;;  %v3763_v7 = vadd.s32 %v3762_v56, %v3758_v41  ;;  %vm2040_vm6 = vcmp.le.f32.partialorder %v2039_v38, 0.7853982  ;;  %v3759_v59 = vadd.s32 %v7240_v12, %v7244_v21 }
 0x3e3   : > { %v4628_v31 = vpop.eup %4627  ;;  %v2111_v20 = vsub.s32 32, %v2110_v62  ;;  %v2115_v25 = vsub.s32 4294967266, %v2110_v62  ;;  %v2112_v63 = vshll.u32 %v2103_v15, %v2110_v62  ;;  %v2126_v19 = vsel %vm2041_vm5, %v2125_v45, %v7207_v43 }
 0x3e4   : > { %v4630_v48 = vpop.eup %4629  ;;  %v3907_v26 = vxor.u32 2147483648, %v4628_v31  ;;  %v3764_v14 = vadd.s32 536870912, %v3763_v7  ;;  %v2128_v33 = vsel %vm2040_vm6, 0, %v2126_v19  ;;  %vm2131_vm12 = vweird.f32 %v6965_v35 }
 0x3e5   : > { %v3904_v61 = vxor.u32 2147483648, %v4630_v48  ;;  %v2113_v55 = vshrl.u32 %v2095_v29, %v2111_v20  ;;  %v2116_v58 = vadd.s32 127, %v2115_v25  ;;  %v2132_v60 = vadd.s32 3, %v2128_v33 }
 0x3e6   : > { %v3908_v36 = vsel %vm3906_vm0, %v3907_v26, %v4630_v48  ;;  %v3765_v34 = vshrl.u32 %v3764_v14, 30  ;;  %vm3705_vm11 = vcmp.lt.s32.totalorder %v7115_v27, 0  ;;  %vm3704_vm13 = vcmp.le.f32.partialorder %v3703_v2, 0.7853982 }
 0x3e7   : > { %v3905_v9 = vsel %vm3903_vm2, %v4628_v31, %v3904_v61  ;;  %v2114_v54 = vor.u32 %v2113_v55, %v2112_v63  ;;  %v2117_v49 = vshll.u32 %v2116_v58, 23  ;;  %v2133_v46 = vand.u32 3, %v2132_v60 }
 0x3e8   : > { %v3909_v52 = vsel %vm3902_vm3, %v3905_v9, %v3908_v36  ;;  %v3766_v53 = vshll.u32 %v3765_v34, 30  ;;  %v3789_v31 = vsub.s32 4, %v3765_v34  ;;  %vm3795_vm1 = vweird.f32 %v7115_v27 }
 0x3e9   : > { %v3910_v11 = vsel %vm3899_vm4, nan, %v3909_v52  ;;  %v2118_v6 = vor.u32 4788187, %v2117_v49  ;;  %v2121_v32 = vcvt.s32.f32 %v2114_v54  ;;  %vm2138_vm8 = vcmp.eq.s32.totalorder %v2133_v46, 2 }
 0x3ea   : > { %3942 = vst [vmem:[%s5188_s10 + $0xf8] sm:$0xff] %v3910_v11  ;;  %v3767_v23 = vsub.s32 %v3763_v7, %v3766_v53  ;;  %vm2135_vm9 = vcmp.eq.s32.totalorder %v2133_v46, 0  ;;  %vm2134_vm10 = vcmp.lt.s32.totalorder %v2133_v46, 2  ;;  %v3790_v25 = vsel %vm3705_vm11, %v3789_v31, %v3765_v34 }
 0x3eb   : > { %v2119_v47 = vand.u32 2147483647, %v2118_v6  ;;  %v3792_v48 = vsel %vm3704_vm13, 0, %v3790_v25 }
 0x3ec   : > { %v3769_v15 = vsub.s32 0, %v3767_v23 }
 0x3ed   : > { %v2122_v13 = vmul.f32 %v2121_v32, %v2119_v47 }
 0x3ee   : > { %v4222_v57 = vmin.u32 %v3769_v15, %v3767_v23 }
 0x3ef   : > { %v2123_v39 = vxor.u32 2147483648, %v2122_v13 }
 0x3f0   : > { %v3771_v16 = vclz %v4222_v57 }
 0x3f1   : > { %v2124_v37 = vsel %vm2041_vm5, %v2123_v39, %v2122_v13 }
 0x3f2   : > { %v2127_v22 = vsel %vm2040_vm6, %v6965_v35, %v2124_v37  ;;  %v4223_v10 = vadd.s32 4294967294, %v3771_v16  ;;  %v3796_v35 = vadd.s32 3, %v3792_v48 }
 0x3f3   : > { %4631 = vcosq.f32 %v2127_v22 }
 0x3f4   : > { %4633 = vsinq.f32 %v2127_v22  ;;  %vm4224_vm7 = vcmp.lt.s32.totalorder %v4223_v10, 0  ;;  %v3797_v26 = vand.u32 3, %v3796_v35 }
 0x3f5   : > { %v3774_v4 = vsel %vm4224_vm7, 0, %v4223_v10 }
 0x3f6   : > { %v3775_v51 = vsub.s32 32, %v3774_v4  ;;  %v3779_v40 = vsub.s32 4294967266, %v3774_v4  ;;  %v3776_v8 = vshll.u32 %v3767_v23, %v3774_v4  ;;  %vm3802_vm14 = vcmp.eq.s32.totalorder %v3797_v26, 2 }
 0x3f7   : > { %vm3799_vm15 = vcmp.eq.s32.totalorder %v3797_v26, 0  ;;  %vm3798_vm0 = vcmp.lt.s32.totalorder %v3797_v26, 2 }
 0x3f8   : > { %v3777_v38 = vshrl.u32 %v3759_v59, %v3775_v51  ;;  %v3780_v5 = vadd.s32 127, %v3779_v40 }
 0x3fa   : > { %v3778_v30 = vor.u32 %v3777_v38, %v3776_v8  ;;  %v3781_v18 = vshll.u32 %v3780_v5, 23 }
 0x3fc   : > { %v3782_v44 = vor.u32 4788187, %v3781_v18  ;;  %v3785_v1 = vcvt.s32.f32 %v3778_v30 }
 0x3fe   : > { %v3783_v50 = vand.u32 2147483647, %v3782_v44 }
 0x400   : > { %v4632_v17 = vpop.eup %4631  ;;  %v3786_v21 = vmul.f32 %v3785_v1, %v3783_v50 }
 0x401   : > { %v4634_v43 = vpop.eup %4633  ;;  %v2139_v42 = vxor.u32 2147483648, %v4632_v17 }
 0x402   : > { %v2136_v28 = vxor.u32 2147483648, %v4634_v43  ;;  %v3787_v24 = vxor.u32 2147483648, %v3786_v21 }
 0x403   : > { %v2140_v3 = vsel %vm2138_vm8, %v2139_v42, %v4634_v43 }
 0x404   : > { %v2137_v12 = vsel %vm2135_vm9, %v4632_v17, %v2136_v28  ;;  %v3788_v29 = vsel %vm3705_vm11, %v3787_v24, %v3786_v21 }
 0x405   : > { %v2141_v0 = vsel %vm2134_vm10, %v2137_v12, %v2140_v3  ;;  %v3791_v20 = vsel %vm3704_vm13, %v7115_v27, %v3788_v29 }
 0x406   : > { %v2142_v62 = vsel %vm2131_vm12, nan, %v2141_v0  ;;  %4635 = vcosq.f32 %v3791_v20 }
 0x407   : > { %3925 = vst [vmem:[%s5188_s10 + $0x70] sm:$0xff] %v2142_v62  ;;  %4637 = vsinq.f32 %v3791_v20 }
 0x413   : > { %v4636_v63 = vpop.eup %4635 }
 0x414   : > { %v4638_v41 = vpop.eup %4637  ;;  %v3803_v61 = vxor.u32 2147483648, %v4636_v63 }
 0x415   : > { %v3800_v55 = vxor.u32 2147483648, %v4638_v41 }
 0x416   : > { %v3804_v2 = vsel %vm3802_vm14, %v3803_v61, %v4638_v41 }
 0x417   : > { %v3801_v58 = vsel %vm3799_vm15, %v4636_v63, %v3800_v55 }
 0x418   : > { %v3805_v56 = vsel %vm3798_vm0, %v3801_v58, %v3804_v2 }
 0x419   : > { %v3806_v36 = vsel %vm3795_vm1, nan, %v3805_v56 }
 0x41a   : > { %3941 = vst [vmem:[%s5188_s10 + $0xf0] sm:$0xff] %v3806_v36 }
 0x41b   : > { %4657 = shalt.err (!%p4654_p5)
}
 0x41c   : > { %s4658_s8 = scalar_lea.hbm %s7273_s9, 4096  ;;  %s4662_s26 = scalar_lea.hbm %s7329_s3, 8192 }
 0x41d   : > { %p4659_p6 = scmp.ne.s32.totalorder %s7273_s9, %s4658_s8  ;;  %p4663_p10 = scmp.lt.s32.totalorder %s7273_s9, %s7329_s3 }
 0x41e   : > { %p4664_p11 = scmp.lt.s32.totalorder %s4662_s26, %s4658_s8 }
 0x41f   : > { %p4660_p7 = pnand %p4659_p6, %p4791_p4 }
 0x420   : > { %p4665_p12 = por %p4664_p11, %p4663_p10 }
 0x421   : > { %p4661_p9 = pneg %p4660_p7 }
 0x423   : > { %p4666_p13 = pnand %p4665_p12, %p4661_p9 }
 0x425   : > { %4669 = shalt.err (!%p4666_p13)
}
 0x426   : > { %s4729_s29 = smov 128   ;;  %s4730_s30 = smov 8  }
 0x427   : > { %4448 = dma.vmem_to_hbm [thread:$0]  (%p4791_p4), %s7275_s5, 4096, %s7273_s9, %s7281_s15, %s4729_s29, %s4729_s29, %s4730_s30  }
 0x428 PF: > { %p4454_p0 = scmp.ge.s32.totalorder %s4720_s17, 2  ;;  %s3973_s4 = sand.u32 1, %s4700_s12  }
 0x429   : > { %s3974_s6 = scalar_lea.sflag [#allocation3], %s3973_s4 }
 0x42a   : > { %p4451_p1 = pnand %p4454_p0, %p4798_p8 }
 0x42c   : > { %p4452_p2 = pneg %p4451_p1 }
 0x42e   : > { %4695 = dma.done.wait (%p4452_p2), %s3974_s6, 4096  }
 0x42f   : > { %4697 = vsyncadd (%p4452_p2), %s3974_s6, 4294963200  ;;  %s16_s17 = sadd.s32 1, %s4720_s17   ;;  %s7392_s12 = smov %s4704_s13 }
 0x430   : > { %p13_p3 = scmp.ge.s32.totalorder %s16_s17, 4   ;;  %s7393_s13 = smov %s4708_s14 }
 0x431   : > { %s7394_s14 = smov %s4804_s25  ;;  %s7395_s15 = smov %s4716_s16 }
 0x432   : > { %s7396_s16 = smov %s7398_s20  ;;  %15 = sbr.rel (!%p13_p3) target bundleno = 4 (0x4), region = 73 }
 0x437   :  { %3979 = vsyncpa [#allocation3], 1 }
 0x438   :  { %3981 = vsyncpa [#allocation3 + $0x1], 1 }

</bundles_post_ra>
